<compile_context>
chip_gen: v5e
topology: v5e:2x2
jax: 0.10.0
libtpu: 0.0.40
codegen_flags: <defaults>
</compile_context>

<pallas_src>
import functools

import jax
import jax.numpy as jnp
from jax import lax
from jax.experimental import pallas as pl
from jax.experimental.pallas import tpu as pltpu


# ------------------------------- fused kernel ------------------------------- #

def _bottleneck_kernel(*refs, T_out, T_in, Wo, stride, has_shortcut, n_h,
                       compute_dtype):
    if has_shortcut:
        (xm_ref, xu_ref, xd_ref,
         s1_ref, b1_ref, w1_ref, s2_ref, b2_ref, w2_ref,
         s3_ref, b3_ref, w3_ref, wsc_ref,
         out_ref, apad_ref) = refs
    else:
        (xm_ref, xu_ref, xd_ref,
         s1_ref, b1_ref, w1_ref, s2_ref, b2_ref, w2_ref,
         s3_ref, b3_ref, w3_ref,
         out_ref, apad_ref) = refs
        wsc_ref = None

    h = pl.program_id(1)
    W = xm_ref.shape[2]
    Cin = xm_ref.shape[3]
    Cm = w1_ref.shape[1]            # planes
    Co = out_ref.shape[3]           # expansion * planes
    cdt = compute_dtype
    f32 = jnp.float32
    s = stride

    # ---- stage conv2's zero-padded input in VMEM (f32): ------------------------------
    #      apad = relu(bn2(conv1(relu(bn1(x)))))  of shape (T_in+2, W+2, Cm)
    # Pad columns are zeroed every step (cheap single-column stores); pad/halo rows are
    # zeroed at the image edges.  No concatenates anywhere.
    apad_ref[:, 0:1, :] = jnp.zeros((T_in + 2, 1, Cm), f32)
    apad_ref[:, W + 1:W + 2, :] = jnp.zeros((T_in + 2, 1, Cm), f32)

    # middle band (also reused by the projection shortcut)
    xm = xm_ref[...].reshape(T_in, W, Cin)
    pre = jnp.maximum(xm * s1_ref[...] + b1_ref[...], 0.0)               # f32 (T_in,W,Cin)
    a_mid = jnp.dot(pre.reshape(T_in * W, Cin).astype(cdt), w1_ref[...],
                    preferred_element_type=f32)
    a_mid = jnp.maximum(a_mid * s2_ref[...] + b2_ref[...], 0.0)
    apad_ref[1:T_in + 1, 1:W + 1, :] = a_mid.reshape(T_in, W, Cm)

    # one-row halos (clamped rows fetched by BlockSpec; zeroed at the image edge)
    def halo_row(row_ref, is_edge):
        xr = row_ref[...].reshape(W, Cin)
        pr = jnp.maximum(xr * s1_ref[...] + b1_ref[...], 0.0)
        ar = jnp.dot(pr.astype(cdt), w1_ref[...], preferred_element_type=f32)
        ar = jnp.maximum(ar * s2_ref[...] + b2_ref[...], 0.0)
        ar = jnp.where(is_edge, 0.0, ar)
        return ar.reshape(1, W, Cm)

    apad_ref[0:1, 1:W + 1, :] = halo_row(xu_ref, h == 0)
    apad_ref[T_in + 1:T_in + 2, 1:W + 1, :] = halo_row(xd_ref, h == n_h - 1)

    # ---- conv2: 3x3 stride s as 9 accumulating K = Cm matmuls (local f32 accumulator)
    a_all = apad_ref[...].astype(cdt)                                    # one cast
    acc = jnp.zeros((T_out * Wo, Cm), f32)
    for dy in range(3):
        for dx in range(3):
            if s == 1:
                tap = a_all[dy:dy + T_out, dx:dx + Wo, :]
            else:
                # TODO(synk): stride>1 strided value-slice path untested on hardware.
                tap = a_all[dy:dy + (T_out - 1) * s + 1,
                            dx:dx + (Wo - 1) * s + 1, :][::s, ::s, :]
            acc = acc + jnp.dot(tap.reshape(T_out * Wo, Cm),
                                w2_ref[dy * 3 + dx],
                                preferred_element_type=f32)

    # ---- bn3 + relu + conv3 (1x1) ----
    hid = jnp.maximum(acc * s3_ref[...] + b3_ref[...], 0.0)              # (T_out*Wo, Cm)
    y = jnp.dot(hid.astype(cdt), w3_ref[...], preferred_element_type=f32)

    # ---- residual shortcut (projection on `pre`, or identity on x) ----
    if has_shortcut:
        ps = pre if s == 1 else pre[::s, ::s, :]
        sc = jnp.dot(ps.reshape(T_out * Wo, Cin).astype(cdt), wsc_ref[...],
                     preferred_element_type=f32)
    else:
        sc = xm_ref[...].reshape(T_out * Wo, Co)

    out_ref[...] = (y + sc).reshape(1, T_out, Wo, Co).astype(out_ref.dtype)


# ------------------------------- host wrapper ------------------------------- #

def _pick_conv_tiles(H, Ho, stride, target):
    """Largest output-row tile T_out <= target with Ho % T_out == 0 and
    H % (T_out*stride) == 0 (so aligned BlockSpecs tile evenly)."""
    for t in range(min(target, Ho), 0, -1):
        if Ho % t == 0 and H % (t * stride) == 0:
            return t, t * stride
    return Ho, H   # fallback: one tile per image


def preact_bottleneck_forward(x_nchw, params, *, stride=1, expansion=4,
                              tile_h=32, compute_dtype=jnp.bfloat16,
                              vmem_limit_bytes=48 * 1024 * 1024):
    """Forward pass of PreActBottleneck. Input/output are NCHW (PyTorch layout)."""
    x = jnp.transpose(x_nchw, (0, 2, 3, 1)).astype(jnp.float32)          # -> NHWC
    N, H, W, Cin = x.shape
    planes = params["w1"].shape[1]
    Cout = expansion * planes
    has_shortcut = (stride != 1) or (Cin != Cout)

    Ho = (H - 1) // stride + 1
    Wo = (W - 1) // stride + 1
    T_out, T_in = _pick_conv_tiles(H, Ho, stride, tile_h)
    n_h = Ho // T_out

    # Weights cast ONCE on the host to the MXU operand dtype.
    cdt = compute_dtype
    w1 = params["w1"].astype(cdt)                                 # (Cin, planes)
    w2 = params["w2"].reshape(9, planes, planes).astype(cdt)      # (dy*3+dx, ci, co)
    w3 = params["w3"].astype(cdt)                                 # (planes, Cout)

    kernel = functools.partial(
        _bottleneck_kernel, T_out=T_out, T_in=T_in, Wo=Wo, stride=stride,
        has_shortcut=has_shortcut, n_h=n_h, compute_dtype=cdt)

    in_specs = [
        # x row-band + single-row halos (clamped at the image edge; zeroed in-kernel)
        pl.BlockSpec((1, T_in, W, Cin), lambda n, h: (n, h, 0, 0)),
        pl.BlockSpec((1, 1, W, Cin),
                     lambda n, h: (n, jnp.maximum(h * T_in - 1, 0), 0, 0)),
        pl.BlockSpec((1, 1, W, Cin),
                     lambda n, h: (n, jnp.minimum((h + 1) * T_in, H - 1), 0, 0)),
        # bn1 / conv1 / bn2
        pl.BlockSpec((1, Cin), lambda n, h: (0, 0)),
        pl.BlockSpec((1, Cin), lambda n, h: (0, 0)),
        pl.BlockSpec((Cin, planes), lambda n, h: (0, 0)),
        pl.BlockSpec((1, planes), lambda n, h: (0, 0)),
        pl.BlockSpec((1, planes), lambda n, h: (0, 0)),
        # conv2 weight (tap-major), bn3, conv3
        pl.BlockSpec((9, planes, planes), lambda n, h: (0, 0, 0)),
        pl.BlockSpec((1, planes), lambda n, h: (0, 0)),
        pl.BlockSpec((1, planes), lambda n, h: (0, 0)),
        pl.BlockSpec((planes, Cout), lambda n, h: (0, 0)),
    ]
    args = [x, x, x,
            params["bn1_scale"], params["bn1_shift"], w1,
            params["bn2_scale"], params["bn2_shift"], w2,
            params["bn3_scale"], params["bn3_shift"], w3]
    if has_shortcut:
        in_specs.append(pl.BlockSpec((Cin, Cout), lambda n, h: (0, 0)))
        args.append(params["w_sc"].astype(cdt))

    out = pl.pallas_call(
        kernel,
        grid=(N, n_h),
        in_specs=in_specs,
        out_specs=pl.BlockSpec((1, T_out, Wo, Cout), lambda n, h: (n, h, 0, 0)),
        out_shape=jax.ShapeDtypeStruct((N, Ho, Wo, Cout), jnp.float32),
        scratch_shapes=[pltpu.VMEM((T_in + 2, W + 2, planes), jnp.float32)],
        compiler_params=pltpu.CompilerParams(
            dimension_semantics=("parallel", "parallel"),
            vmem_limit_bytes=vmem_limit_bytes),
    )(*args)
    return jnp.transpose(out, (0, 3, 1, 2))                              # -> NCHW


# ----------------------------- pure-JAX reference --------------------------- #

def _ref_forward(x_nchw, params, *, stride=1, expansion=4):
    x = jnp.transpose(x_nchw, (0, 2, 3, 1)).astype(jnp.float32)
    Cin = x.shape[-1]
    planes = params["w1"].shape[1]
    Cout = expansion * planes

    def bnr(v, s, b):
        return jnp.maximum(v * s.reshape(1, 1, 1, -1) + b.reshape(1, 1, 1, -1), 0.0)

    def conv(v, w_hwio, st, pad):
        return lax.conv_general_dilated(v, w_hwio, (st, st), [(pad, pad), (pad, pad)],
                                        dimension_numbers=("NHWC", "HWIO", "NHWC"))

    pre = bnr(x, params["bn1_scale"], params["bn1_shift"])
    has_shortcut = (stride != 1) or (Cin != Cout)
    sc = conv(pre, params["w_sc"].reshape(1, 1, Cin, Cout), stride, 0) if has_shortcut else x
    out = conv(pre, params["w1"].reshape(1, 1, Cin, planes), 1, 0)
    out = conv(bnr(out, params["bn2_scale"], params["bn2_shift"]), params["w2"], stride, 1)
    out = conv(bnr(out, params["bn3_scale"], params["bn3_shift"]),
               params["w3"].reshape(1, 1, planes, Cout), 1, 0)
    out = out + sc
    return jnp.transpose(out, (0, 3, 1, 2))


# ------------------------------ parameter init ------------------------------ #

def make_params(key, in_planes, planes, expansion):
    eps = 1e-5
    out_planes = expansion * planes
    ks = jax.random.split(key, 16)

    def bn_params(kg, kb, km, kv, c):
        gamma = 0.5 + jax.random.uniform(kg, (1, c), jnp.float32)
        beta = 0.1 * jax.random.normal(kb, (1, c), jnp.float32)
        mean = 0.1 * jax.random.normal(km, (1, c), jnp.float32)
        var = 0.5 + jax.random.uniform(kv, (1, c), jnp.float32)
        scale = gamma / jnp.sqrt(var + eps)
        shift = beta - mean * scale
        return scale, shift

    p = {}
    p["bn1_scale"], p["bn1_shift"] = bn_params(ks[0], ks[1], ks[2], ks[3], in_planes)
    p["bn2_scale"], p["bn2_shift"] = bn_params(ks[4], ks[5], ks[6], ks[7], planes)
    p["bn3_scale"], p["bn3_shift"] = bn_params(ks[8], ks[9], ks[10], ks[11], planes)
    # channels-last conv weights: w1 (Cin, planes), w2 (3,3,planes,planes) HWIO,
    # w3 (planes, expansion*planes), w_sc (Cin, expansion*planes)
    p["w1"] = 0.2 * jax.random.normal(ks[12], (in_planes, planes), jnp.float32)
    p["w2"] = 0.2 * jax.random.normal(ks[13], (3, 3, planes, planes), jnp.float32)
    p["w3"] = 0.2 * jax.random.normal(ks[14], (planes, out_planes), jnp.float32)
    p["w_sc"] = 0.2 * jax.random.normal(ks[15], (in_planes, out_planes), jnp.float32)
    return p


# ------------------------------------ main ----------------------------------- #

if __name__ == "__main__":
    key = jax.random.PRNGKey(0)

    # (N, in_planes, planes, H, W, stride, expansion)
    cfgs = [
        (2, 4, 4, 16, 16, 1, 4),    # projection shortcut (Cin != expansion*planes)
        (2, 16, 4, 16, 16, 1, 4),   # identity shortcut
    ]

    # f32-operand path: strict check against the lax.conv reference.
    for cfg in cfgs:
        N, in_planes, planes, H, W, stride, expansion = cfg
        key, kx, kp = jax.random.split(key, 3)
        x = jax.random.normal(kx, (N, in_planes, H, W), jnp.float32)
        params = make_params(kp, in_planes, planes, expansion)

        y = jax.block_until_ready(
            preact_bottleneck_forward(x, params, stride=stride, expansion=expansion,
                                      compute_dtype=jnp.float32))
        y_ref = _ref_forward(x, params, stride=stride, expansion=expansion)
        assert y.shape == y_ref.shape, (y.shape, y_ref.shape)
        if not jnp.allclose(y, y_ref, atol=1e-4, rtol=1e-4):
            raise AssertionError(
                f"Pallas f32 output mismatch for cfg={cfg}: "
                f"max abs err = {float(jnp.max(jnp.abs(y - y_ref)))}")

    # Default bf16 MXU-operand path (f32 accumulation) with a loose tolerance.
    N, in_planes, planes, H, W, stride, expansion = cfgs[0]
    key, kx, kp = jax.random.split(key, 3)
    x = jax.random.normal(kx, (N, in_planes, H, W), jnp.float32)
    params = make_params(kp, in_planes, planes, expansion)
    y_bf = jax.block_until_ready(
        preact_bottleneck_forward(x, params, stride=stride, expansion=expansion))
    y_ref = _ref_forward(x, params, stride=stride, expansion=expansion)
    if not jnp.allclose(y_bf, y_ref, atol=2e-1, rtol=2e-1):
        raise AssertionError(
            "Pallas bf16 output mismatch vs f32 reference: "
            f"max abs err = {float(jnp.max(jnp.abs(y_bf - y_ref)))}")

    print("KERNEL_OK")
</pallas_src>

<mosaic_0001>
module attributes {stable_mosaic.version = 11 : i64} {
  func.func @_bottleneck_kernel(%arg0: i32, %arg1: i32, %arg2: memref<1x16x16x4xf32, #tpu.memory_space<vmem>>, %arg3: memref<1x1x16x4xf32, #tpu.memory_space<vmem>>, %arg4: memref<1x1x16x4xf32, #tpu.memory_space<vmem>>, %arg5: memref<1x4xf32, #tpu.memory_space<vmem>>, %arg6: memref<1x4xf32, #tpu.memory_space<vmem>>, %arg7: memref<4x4xf32, #tpu.memory_space<vmem>>, %arg8: memref<1x4xf32, #tpu.memory_space<vmem>>, %arg9: memref<1x4xf32, #tpu.memory_space<vmem>>, %arg10: memref<9x4x4xf32, #tpu.memory_space<vmem>>, %arg11: memref<1x4xf32, #tpu.memory_space<vmem>>, %arg12: memref<1x4xf32, #tpu.memory_space<vmem>>, %arg13: memref<4x16xf32, #tpu.memory_space<vmem>>, %arg14: memref<4x16xf32, #tpu.memory_space<vmem>>, %arg15: memref<1x16x16x16xf32, #tpu.memory_space<vmem>>, %arg16: memref<18x18x4xf32, #tpu.memory_space<vmem>>) attributes {dimension_semantics = [#tpu.dimension_semantics<parallel>, #tpu.dimension_semantics<parallel>], iteration_bounds = array<i64: 2, 1>, scalar_prefetch = 0 : i64, scratch_operands = 1 : i64, tpu.core_type = #tpu.core_type<tc>, window_params = [{transform_indices = @transform_0, window_bounds = array<i64: 1, 16, 16, 4>}, {transform_indices = @transform_1, window_bounds = array<i64: 1, 1, 16, 4>}, {transform_indices = @transform_2, window_bounds = array<i64: 1, 1, 16, 4>}, {pipeline_mode = #tpu.pipeline_mode<synchronous>, transform_indices = @transform_3, window_bounds = array<i64: 1, 4>}, {pipeline_mode = #tpu.pipeline_mode<synchronous>, transform_indices = @transform_4, window_bounds = array<i64: 1, 4>}, {pipeline_mode = #tpu.pipeline_mode<synchronous>, transform_indices = @transform_5, window_bounds = array<i64: 4, 4>}, {pipeline_mode = #tpu.pipeline_mode<synchronous>, transform_indices = @transform_6, window_bounds = array<i64: 1, 4>}, {pipeline_mode = #tpu.pipeline_mode<synchronous>, transform_indices = @transform_7, window_bounds = array<i64: 1, 4>}, {pipeline_mode = #tpu.pipeline_mode<synchronous>, transform_indices = @transform_8, window_bounds = array<i64: 9, 4, 4>}, {pipeline_mode = #tpu.pipeline_mode<synchronous>, transform_indices = @transform_9, window_bounds = array<i64: 1, 4>}, {pipeline_mode = #tpu.pipeline_mode<synchronous>, transform_indices = @transform_10, window_bounds = array<i64: 1, 4>}, {pipeline_mode = #tpu.pipeline_mode<synchronous>, transform_indices = @transform_11, window_bounds = array<i64: 4, 16>}, {pipeline_mode = #tpu.pipeline_mode<synchronous>, transform_indices = @transform_12, window_bounds = array<i64: 4, 16>}, {transform_indices = @transform_13, window_bounds = array<i64: 1, 16, 16, 16>}]} {
    %cst = arith.constant 0.000000e+00 : f32
    %0 = vector.broadcast %cst : f32 to vector<18x1x4xf32>
    %c0 = arith.constant 0 : index
    %c0_0 = arith.constant 0 : index
    %c0_1 = arith.constant 0 : index
    %1 = vector.load %arg16[%c0, %c0_0, %c0_1] : memref<18x18x4xf32, #tpu.memory_space<vmem>>, vector<18x1x4xf32>
    tpu.vector_store %arg16[%c0, %c0_0, %c0_1], %0 {strides = array<i32>} : memref<18x18x4xf32, #tpu.memory_space<vmem>>, vector<18x1x4xf32>,
    %cst_2 = arith.constant 0.000000e+00 : f32
    %2 = vector.broadcast %cst_2 : f32 to vector<18x1x4xf32>
    %c0_3 = arith.constant 0 : index
    %c17 = arith.constant 17 : index
    %c0_4 = arith.constant 0 : index
    %3 = vector.load %arg16[%c0_3, %c17, %c0_4] : memref<18x18x4xf32, #tpu.memory_space<vmem>>, vector<18x1x4xf32>
    tpu.vector_store %arg16[%c0_3, %c17, %c0_4], %2 {strides = array<i32>} : memref<18x18x4xf32, #tpu.memory_space<vmem>>, vector<18x1x4xf32>,
    %c0_5 = arith.constant 0 : index
    %c0_6 = arith.constant 0 : index
    %c0_7 = arith.constant 0 : index
    %c0_8 = arith.constant 0 : index
    %4 = vector.load %arg2[%c0_5, %c0_6, %c0_7, %c0_8] : memref<1x16x16x4xf32, #tpu.memory_space<vmem>>, vector<1x16x16x4xf32>
    %5 = vector.shape_cast %4 : vector<1x16x16x4xf32> to vector<16x16x4xf32>
    %c0_9 = arith.constant 0 : index
    %c0_10 = arith.constant 0 : index
    %6 = vector.load %arg5[%c0_9, %c0_10] : memref<1x4xf32, #tpu.memory_space<vmem>>, vector<1x4xf32>
    %7 = vector.shape_cast %6 : vector<1x4xf32> to vector<1x1x4xf32>
    %8 = vector.broadcast %7 : vector<1x1x4xf32> to vector<16x16x4xf32>
    %9 = arith.mulf %5, %8 : vector<16x16x4xf32>
    %c0_11 = arith.constant 0 : index
    %c0_12 = arith.constant 0 : index
    %10 = vector.load %arg6[%c0_11, %c0_12] : memref<1x4xf32, #tpu.memory_space<vmem>>, vector<1x4xf32>
    %11 = vector.shape_cast %10 : vector<1x4xf32> to vector<1x1x4xf32>
    %12 = vector.broadcast %11 : vector<1x1x4xf32> to vector<16x16x4xf32>
    %13 = arith.addf %9, %12 : vector<16x16x4xf32>
    %cst_13 = arith.constant 0.000000e+00 : f32
    %14 = vector.broadcast %cst_13 : f32 to vector<16x16x4xf32>
    %15 = arith.maximumf %13, %14 : vector<16x16x4xf32>
    %16 = vector.shape_cast %15 : vector<16x16x4xf32> to vector<256x4xf32>
    %c0_14 = arith.constant 0 : index
    %c0_15 = arith.constant 0 : index
    %17 = vector.load %arg7[%c0_14, %c0_15] : memref<4x4xf32, #tpu.memory_space<vmem>>, vector<4x4xf32>
    %cst_16 = arith.constant dense<0.000000e+00> : vector<256x4xf32>
    %18 = tpu.matmul %16, %17, %cst_16 {dimension_numbers = #tpu.dot_dimension_numbers<[1], [0], [0], [1], [0, 0, 1, 1], [], []>} : vector<256x4xf32>, vector<4x4xf32>, vector<256x4xf32> -> vector<256x4xf32>
    %c0_17 = arith.constant 0 : index
    %c0_18 = arith.constant 0 : index
    %19 = vector.load %arg8[%c0_17, %c0_18] : memref<1x4xf32, #tpu.memory_space<vmem>>, vector<1x4xf32>
    %20 = vector.broadcast %19 : vector<1x4xf32> to vector<256x4xf32>
    %21 = arith.mulf %18, %20 : vector<256x4xf32>
    %c0_19 = arith.constant 0 : index
    %c0_20 = arith.constant 0 : index
    %22 = vector.load %arg9[%c0_19, %c0_20] : memref<1x4xf32, #tpu.memory_space<vmem>>, vector<1x4xf32>
    %23 = vector.broadcast %22 : vector<1x4xf32> to vector<256x4xf32>
    %24 = arith.addf %21, %23 : vector<256x4xf32>
    %cst_21 = arith.constant 0.000000e+00 : f32
    %25 = vector.broadcast %cst_21 : f32 to vector<256x4xf32>
    %26 = arith.maximumf %24, %25 : vector<256x4xf32>
    %27 = vector.shape_cast %26 : vector<256x4xf32> to vector<16x16x4xf32>
    %c1 = arith.constant 1 : index
    %c1_22 = arith.constant 1 : index
    %c0_23 = arith.constant 0 : index
    %28 = vector.load %arg16[%c1, %c1_22, %c0_23] : memref<18x18x4xf32, #tpu.memory_space<vmem>>, vector<16x16x4xf32>
    tpu.vector_store %arg16[%c1, %c1_22, %c0_23], %27 {strides = array<i32>} : memref<18x18x4xf32, #tpu.memory_space<vmem>>, vector<16x16x4xf32>,
    %c0_i32 = arith.constant 0 : i32
    %29 = arith.cmpi eq, %arg1, %c0_i32 : i32
    %c0_24 = arith.constant 0 : index
    %c0_25 = arith.constant 0 : index
    %c0_26 = arith.constant 0 : index
    %c0_27 = arith.constant 0 : index
    %30 = vector.load %arg3[%c0_24, %c0_25, %c0_26, %c0_27] : memref<1x1x16x4xf32, #tpu.memory_space<vmem>>, vector<1x1x16x4xf32>
    %31 = vector.shape_cast %30 : vector<1x1x16x4xf32> to vector<16x4xf32>
    %c0_28 = arith.constant 0 : index
    %c0_29 = arith.constant 0 : index
    %32 = vector.load %arg5[%c0_28, %c0_29] : memref<1x4xf32, #tpu.memory_space<vmem>>, vector<1x4xf32>
    %33 = vector.broadcast %32 : vector<1x4xf32> to vector<16x4xf32>
    %34 = arith.mulf %31, %33 : vector<16x4xf32>
    %c0_30 = arith.constant 0 : index
    %c0_31 = arith.constant 0 : index
    %35 = vector.load %arg6[%c0_30, %c0_31] : memref<1x4xf32, #tpu.memory_space<vmem>>, vector<1x4xf32>
    %36 = vector.broadcast %35 : vector<1x4xf32> to vector<16x4xf32>
    %37 = arith.addf %34, %36 : vector<16x4xf32>
    %cst_32 = arith.constant 0.000000e+00 : f32
    %38 = vector.broadcast %cst_32 : f32 to vector<16x4xf32>
    %39 = arith.maximumf %37, %38 : vector<16x4xf32>
    %c0_33 = arith.constant 0 : index
    %c0_34 = arith.constant 0 : index
    %40 = vector.load %arg7[%c0_33, %c0_34] : memref<4x4xf32, #tpu.memory_space<vmem>>, vector<4x4xf32>
    %cst_35 = arith.constant dense<0.000000e+00> : vector<16x4xf32>
    %41 = tpu.matmul %39, %40, %cst_35 {dimension_numbers = #tpu.dot_dimension_numbers<[1], [0], [0], [1], [0, 0, 1, 1], [], []>} : vector<16x4xf32>, vector<4x4xf32>, vector<16x4xf32> -> vector<16x4xf32>
    %c0_36 = arith.constant 0 : index
    %c0_37 = arith.constant 0 : index
    %42 = vector.load %arg8[%c0_36, %c0_37] : memref<1x4xf32, #tpu.memory_space<vmem>>, vector<1x4xf32>
    %43 = vector.broadcast %42 : vector<1x4xf32> to vector<16x4xf32>
    %44 = arith.mulf %41, %43 : vector<16x4xf32>
    %c0_38 = arith.constant 0 : index
    %c0_39 = arith.constant 0 : index
    %45 = vector.load %arg9[%c0_38, %c0_39] : memref<1x4xf32, #tpu.memory_space<vmem>>, vector<1x4xf32>
    %46 = vector.broadcast %45 : vector<1x4xf32> to vector<16x4xf32>
    %47 = arith.addf %44, %46 : vector<16x4xf32>
    %cst_40 = arith.constant 0.000000e+00 : f32
    %48 = vector.broadcast %cst_40 : f32 to vector<16x4xf32>
    %49 = arith.maximumf %47, %48 : vector<16x4xf32>
    %cst_41 = arith.constant 0.000000e+00 : f32
    %50 = vector.broadcast %cst_41 : f32 to vector<16x4xf32>
    %51 = arith.select %29, %50, %49 : vector<16x4xf32>
    %52 = vector.shape_cast %51 : vector<16x4xf32> to vector<1x16x4xf32>
    %c0_42 = arith.constant 0 : index
    %c1_43 = arith.constant 1 : index
    %c0_44 = arith.constant 0 : index
    %53 = vector.load %arg16[%c0_42, %c1_43, %c0_44] : memref<18x18x4xf32, #tpu.memory_space<vmem>>, vector<1x16x4xf32>
    tpu.vector_store %arg16[%c0_42, %c1_43, %c0_44], %52 {strides = array<i32>} : memref<18x18x4xf32, #tpu.memory_space<vmem>>, vector<1x16x4xf32>,
    %c0_i32_45 = arith.constant 0 : i32
    %54 = arith.cmpi eq, %arg1, %c0_i32_45 : i32
    %c0_46 = arith.constant 0 : index
    %c0_47 = arith.constant 0 : index
    %c0_48 = arith.constant 0 : index
    %c0_49 = arith.constant 0 : index
    %55 = vector.load %arg4[%c0_46, %c0_47, %c0_48, %c0_49] : memref<1x1x16x4xf32, #tpu.memory_space<vmem>>, vector<1x1x16x4xf32>
    %56 = vector.shape_cast %55 : vector<1x1x16x4xf32> to vector<16x4xf32>
    %c0_50 = arith.constant 0 : index
    %c0_51 = arith.constant 0 : index
    %57 = vector.load %arg5[%c0_50, %c0_51] : memref<1x4xf32, #tpu.memory_space<vmem>>, vector<1x4xf32>
    %58 = vector.broadcast %57 : vector<1x4xf32> to vector<16x4xf32>
    %59 = arith.mulf %56, %58 : vector<16x4xf32>
    %c0_52 = arith.constant 0 : index
    %c0_53 = arith.constant 0 : index
    %60 = vector.load %arg6[%c0_52, %c0_53] : memref<1x4xf32, #tpu.memory_space<vmem>>, vector<1x4xf32>
    %61 = vector.broadcast %60 : vector<1x4xf32> to vector<16x4xf32>
    %62 = arith.addf %59, %61 : vector<16x4xf32>
    %cst_54 = arith.constant 0.000000e+00 : f32
    %63 = vector.broadcast %cst_54 : f32 to vector<16x4xf32>
    %64 = arith.maximumf %62, %63 : vector<16x4xf32>
    %c0_55 = arith.constant 0 : index
    %c0_56 = arith.constant 0 : index
    %65 = vector.load %arg7[%c0_55, %c0_56] : memref<4x4xf32, #tpu.memory_space<vmem>>, vector<4x4xf32>
    %cst_57 = arith.constant dense<0.000000e+00> : vector<16x4xf32>
    %66 = tpu.matmul %64, %65, %cst_57 {dimension_numbers = #tpu.dot_dimension_numbers<[1], [0], [0], [1], [0, 0, 1, 1], [], []>} : vector<16x4xf32>, vector<4x4xf32>, vector<16x4xf32> -> vector<16x4xf32>
    %c0_58 = arith.constant 0 : index
    %c0_59 = arith.constant 0 : index
    %67 = vector.load %arg8[%c0_58, %c0_59] : memref<1x4xf32, #tpu.memory_space<vmem>>, vector<1x4xf32>
    %68 = vector.broadcast %67 : vector<1x4xf32> to vector<16x4xf32>
    %69 = arith.mulf %66, %68 : vector<16x4xf32>
    %c0_60 = arith.constant 0 : index
    %c0_61 = arith.constant 0 : index
    %70 = vector.load %arg9[%c0_60, %c0_61] : memref<1x4xf32, #tpu.memory_space<vmem>>, vector<1x4xf32>
    %71 = vector.broadcast %70 : vector<1x4xf32> to vector<16x4xf32>
    %72 = arith.addf %69, %71 : vector<16x4xf32>
    %cst_62 = arith.constant 0.000000e+00 : f32
    %73 = vector.broadcast %cst_62 : f32 to vector<16x4xf32>
    %74 = arith.maximumf %72, %73 : vector<16x4xf32>
    %cst_63 = arith.constant 0.000000e+00 : f32
    %75 = vector.broadcast %cst_63 : f32 to vector<16x4xf32>
    %76 = arith.select %54, %75, %74 : vector<16x4xf32>
    %77 = vector.shape_cast %76 : vector<16x4xf32> to vector<1x16x4xf32>
    %c17_64 = arith.constant 17 : index
    %c1_65 = arith.constant 1 : index
    %c0_66 = arith.constant 0 : index
    %78 = vector.load %arg16[%c17_64, %c1_65, %c0_66] : memref<18x18x4xf32, #tpu.memory_space<vmem>>, vector<1x16x4xf32>
    tpu.vector_store %arg16[%c17_64, %c1_65, %c0_66], %77 {strides = array<i32>} : memref<18x18x4xf32, #tpu.memory_space<vmem>>, vector<1x16x4xf32>,
    %c0_67 = arith.constant 0 : index
    %c0_68 = arith.constant 0 : index
    %c0_69 = arith.constant 0 : index
    %79 = vector.load %arg16[%c0_67, %c0_68, %c0_69] : memref<18x18x4xf32, #tpu.memory_space<vmem>>, vector<18x18x4xf32>
    %cst_70 = arith.constant 0.000000e+00 : f32
    %80 = vector.broadcast %cst_70 : f32 to vector<256x4xf32>
    %81 = vector.extract_strided_slice %79 {offsets = [0, 0, 0], sizes = [16, 16, 4], strides = [1, 1, 1]} : vector<18x18x4xf32> to vector<16x16x4xf32>
    %82 = vector.shape_cast %81 : vector<16x16x4xf32> to vector<256x4xf32>
    %c0_71 = arith.constant 0 : index
    %c0_72 = arith.constant 0 : index
    %c0_73 = arith.constant 0 : index
    %83 = vector.load %arg10[%c0_71, %c0_72, %c0_73] : memref<9x4x4xf32, #tpu.memory_space<vmem>>, vector<1x4x4xf32>
    %84 = vector.shape_cast %83 : vector<1x4x4xf32> to vector<4x4xf32>
    %cst_74 = arith.constant dense<0.000000e+00> : vector<256x4xf32>
    %85 = tpu.matmul %82, %84, %cst_74 {dimension_numbers = #tpu.dot_dimension_numbers<[1], [0], [0], [1], [0, 0, 1, 1], [], []>} : vector<256x4xf32>, vector<4x4xf32>, vector<256x4xf32> -> vector<256x4xf32>
    %86 = arith.addf %80, %85 : vector<256x4xf32>
    %87 = vector.extract_strided_slice %79 {offsets = [0, 1, 0], sizes = [16, 16, 4], strides = [1, 1, 1]} : vector<18x18x4xf32> to vector<16x16x4xf32>
    %88 = vector.shape_cast %87 : vector<16x16x4xf32> to vector<256x4xf32>
    %c1_75 = arith.constant 1 : index
    %c0_76 = arith.constant 0 : index
    %c0_77 = arith.constant 0 : index
    %89 = vector.load %arg10[%c1_75, %c0_76, %c0_77] : memref<9x4x4xf32, #tpu.memory_space<vmem>>, vector<1x4x4xf32>
    %90 = vector.shape_cast %89 : vector<1x4x4xf32> to vector<4x4xf32>
    %cst_78 = arith.constant dense<0.000000e+00> : vector<256x4xf32>
    %91 = tpu.matmul %88, %90, %cst_78 {dimension_numbers = #tpu.dot_dimension_numbers<[1], [0], [0], [1], [0, 0, 1, 1], [], []>} : vector<256x4xf32>, vector<4x4xf32>, vector<256x4xf32> -> vector<256x4xf32>
    %92 = arith.addf %86, %91 : vector<256x4xf32>
    %93 = vector.extract_strided_slice %79 {offsets = [0, 2, 0], sizes = [16, 16, 4], strides = [1, 1, 1]} : vector<18x18x4xf32> to vector<16x16x4xf32>
    %94 = vector.shape_cast %93 : vector<16x16x4xf32> to vector<256x4xf32>
    %c2 = arith.constant 2 : index
    %c0_79 = arith.constant 0 : index
    %c0_80 = arith.constant 0 : index
    %95 = vector.load %arg10[%c2, %c0_79, %c0_80] : memref<9x4x4xf32, #tpu.memory_space<vmem>>, vector<1x4x4xf32>
    %96 = vector.shape_cast %95 : vector<1x4x4xf32> to vector<4x4xf32>
    %cst_81 = arith.constant dense<0.000000e+00> : vector<256x4xf32>
    %97 = tpu.matmul %94, %96, %cst_81 {dimension_numbers = #tpu.dot_dimension_numbers<[1], [0], [0], [1], [0, 0, 1, 1], [], []>} : vector<256x4xf32>, vector<4x4xf32>, vector<256x4xf32> -> vector<256x4xf32>
    %98 = arith.addf %92, %97 : vector<256x4xf32>
    %99 = vector.extract_strided_slice %79 {offsets = [1, 0, 0], sizes = [16, 16, 4], strides = [1, 1, 1]} : vector<18x18x4xf32> to vector<16x16x4xf32>
    %100 = vector.shape_cast %99 : vector<16x16x4xf32> to vector<256x4xf32>
    %c3 = arith.constant 3 : index
    %c0_82 = arith.constant 0 : index
    %c0_83 = arith.constant 0 : index
    %101 = vector.load %arg10[%c3, %c0_82, %c0_83] : memref<9x4x4xf32, #tpu.memory_space<vmem>>, vector<1x4x4xf32>
    %102 = vector.shape_cast %101 : vector<1x4x4xf32> to vector<4x4xf32>
    %cst_84 = arith.constant dense<0.000000e+00> : vector<256x4xf32>
    %103 = tpu.matmul %100, %102, %cst_84 {dimension_numbers = #tpu.dot_dimension_numbers<[1], [0], [0], [1], [0, 0, 1, 1], [], []>} : vector<256x4xf32>, vector<4x4xf32>, vector<256x4xf32> -> vector<256x4xf32>
    %104 = arith.addf %98, %103 : vector<256x4xf32>
    %105 = vector.extract_strided_slice %79 {offsets = [1, 1, 0], sizes = [16, 16, 4], strides = [1, 1, 1]} : vector<18x18x4xf32> to vector<16x16x4xf32>
    %106 = vector.shape_cast %105 : vector<16x16x4xf32> to vector<256x4xf32>
    %c4 = arith.constant 4 : index
    %c0_85 = arith.constant 0 : index
    %c0_86 = arith.constant 0 : index
    %107 = vector.load %arg10[%c4, %c0_85, %c0_86] : memref<9x4x4xf32, #tpu.memory_space<vmem>>, vector<1x4x4xf32>
    %108 = vector.shape_cast %107 : vector<1x4x4xf32> to vector<4x4xf32>
    %cst_87 = arith.constant dense<0.000000e+00> : vector<256x4xf32>
    %109 = tpu.matmul %106, %108, %cst_87 {dimension_numbers = #tpu.dot_dimension_numbers<[1], [0], [0], [1], [0, 0, 1, 1], [], []>} : vector<256x4xf32>, vector<4x4xf32>, vector<256x4xf32> -> vector<256x4xf32>
    %110 = arith.addf %104, %109 : vector<256x4xf32>
    %111 = vector.extract_strided_slice %79 {offsets = [1, 2, 0], sizes = [16, 16, 4], strides = [1, 1, 1]} : vector<18x18x4xf32> to vector<16x16x4xf32>
    %112 = vector.shape_cast %111 : vector<16x16x4xf32> to vector<256x4xf32>
    %c5 = arith.constant 5 : index
    %c0_88 = arith.constant 0 : index
    %c0_89 = arith.constant 0 : index
    %113 = vector.load %arg10[%c5, %c0_88, %c0_89] : memref<9x4x4xf32, #tpu.memory_space<vmem>>, vector<1x4x4xf32>
    %114 = vector.shape_cast %113 : vector<1x4x4xf32> to vector<4x4xf32>
    %cst_90 = arith.constant dense<0.000000e+00> : vector<256x4xf32>
    %115 = tpu.matmul %112, %114, %cst_90 {dimension_numbers = #tpu.dot_dimension_numbers<[1], [0], [0], [1], [0, 0, 1, 1], [], []>} : vector<256x4xf32>, vector<4x4xf32>, vector<256x4xf32> -> vector<256x4xf32>
    %116 = arith.addf %110, %115 : vector<256x4xf32>
    %117 = vector.extract_strided_slice %79 {offsets = [2, 0, 0], sizes = [16, 16, 4], strides = [1, 1, 1]} : vector<18x18x4xf32> to vector<16x16x4xf32>
    %118 = vector.shape_cast %117 : vector<16x16x4xf32> to vector<256x4xf32>
    %c6 = arith.constant 6 : index
    %c0_91 = arith.constant 0 : index
    %c0_92 = arith.constant 0 : index
    %119 = vector.load %arg10[%c6, %c0_91, %c0_92] : memref<9x4x4xf32, #tpu.memory_space<vmem>>, vector<1x4x4xf32>
    %120 = vector.shape_cast %119 : vector<1x4x4xf32> to vector<4x4xf32>
    %cst_93 = arith.constant dense<0.000000e+00> : vector<256x4xf32>
    %121 = tpu.matmul %118, %120, %cst_93 {dimension_numbers = #tpu.dot_dimension_numbers<[1], [0], [0], [1], [0, 0, 1, 1], [], []>} : vector<256x4xf32>, vector<4x4xf32>, vector<256x4xf32> -> vector<256x4xf32>
    %122 = arith.addf %116, %121 : vector<256x4xf32>
    %123 = vector.extract_strided_slice %79 {offsets = [2, 1, 0], sizes = [16, 16, 4], strides = [1, 1, 1]} : vector<18x18x4xf32> to vector<16x16x4xf32>
    %124 = vector.shape_cast %123 : vector<16x16x4xf32> to vector<256x4xf32>
    %c7 = arith.constant 7 : index
    %c0_94 = arith.constant 0 : index
    %c0_95 = arith.constant 0 : index
    %125 = vector.load %arg10[%c7, %c0_94, %c0_95] : memref<9x4x4xf32, #tpu.memory_space<vmem>>, vector<1x4x4xf32>
    %126 = vector.shape_cast %125 : vector<1x4x4xf32> to vector<4x4xf32>
    %cst_96 = arith.constant dense<0.000000e+00> : vector<256x4xf32>
    %127 = tpu.matmul %124, %126, %cst_96 {dimension_numbers = #tpu.dot_dimension_numbers<[1], [0], [0], [1], [0, 0, 1, 1], [], []>} : vector<256x4xf32>, vector<4x4xf32>, vector<256x4xf32> -> vector<256x4xf32>
    %128 = arith.addf %122, %127 : vector<256x4xf32>
    %129 = vector.extract_strided_slice %79 {offsets = [2, 2, 0], sizes = [16, 16, 4], strides = [1, 1, 1]} : vector<18x18x4xf32> to vector<16x16x4xf32>
    %130 = vector.shape_cast %129 : vector<16x16x4xf32> to vector<256x4xf32>
    %c8 = arith.constant 8 : index
    %c0_97 = arith.constant 0 : index
    %c0_98 = arith.constant 0 : index
    %131 = vector.load %arg10[%c8, %c0_97, %c0_98] : memref<9x4x4xf32, #tpu.memory_space<vmem>>, vector<1x4x4xf32>
    %132 = vector.shape_cast %131 : vector<1x4x4xf32> to vector<4x4xf32>
    %cst_99 = arith.constant dense<0.000000e+00> : vector<256x4xf32>
    %133 = tpu.matmul %130, %132, %cst_99 {dimension_numbers = #tpu.dot_dimension_numbers<[1], [0], [0], [1], [0, 0, 1, 1], [], []>} : vector<256x4xf32>, vector<4x4xf32>, vector<256x4xf32> -> vector<256x4xf32>
    %134 = arith.addf %128, %133 : vector<256x4xf32>
    %c0_100 = arith.constant 0 : index
    %c0_101 = arith.constant 0 : index
    %135 = vector.load %arg11[%c0_100, %c0_101] : memref<1x4xf32, #tpu.memory_space<vmem>>, vector<1x4xf32>
    %136 = vector.broadcast %135 : vector<1x4xf32> to vector<256x4xf32>
    %137 = arith.mulf %134, %136 : vector<256x4xf32>
    %c0_102 = arith.constant 0 : index
    %c0_103 = arith.constant 0 : index
    %138 = vector.load %arg12[%c0_102, %c0_103] : memref<1x4xf32, #tpu.memory_space<vmem>>, vector<1x4xf32>
    %139 = vector.broadcast %138 : vector<1x4xf32> to vector<256x4xf32>
    %140 = arith.addf %137, %139 : vector<256x4xf32>
    %cst_104 = arith.constant 0.000000e+00 : f32
    %141 = vector.broadcast %cst_104 : f32 to vector<256x4xf32>
    %142 = arith.maximumf %140, %141 : vector<256x4xf32>
    %c0_105 = arith.constant 0 : index
    %c0_106 = arith.constant 0 : index
    %143 = vector.load %arg13[%c0_105, %c0_106] : memref<4x16xf32, #tpu.memory_space<vmem>>, vector<4x16xf32>
    %cst_107 = arith.constant dense<0.000000e+00> : vector<256x16xf32>
    %144 = tpu.matmul %142, %143, %cst_107 {dimension_numbers = #tpu.dot_dimension_numbers<[1], [0], [0], [1], [0, 0, 1, 1], [], []>} : vector<256x4xf32>, vector<4x16xf32>, vector<256x16xf32> -> vector<256x16xf32>
    %145 = vector.shape_cast %15 : vector<16x16x4xf32> to vector<256x4xf32>
    %c0_108 = arith.constant 0 : index
    %c0_109 = arith.constant 0 : index
    %146 = vector.load %arg14[%c0_108, %c0_109] : memref<4x16xf32, #tpu.memory_space<vmem>>, vector<4x16xf32>
    %cst_110 = arith.constant dense<0.000000e+00> : vector<256x16xf32>
    %147 = tpu.matmul %145, %146, %cst_110 {dimension_numbers = #tpu.dot_dimension_numbers<[1], [0], [0], [1], [0, 0, 1, 1], [], []>} : vector<256x4xf32>, vector<4x16xf32>, vector<256x16xf32> -> vector<256x16xf32>
    %148 = arith.addf %144, %147 : vector<256x16xf32>
    %149 = vector.shape_cast %148 : vector<256x16xf32> to vector<1x16x16x16xf32>
    %c0_111 = arith.constant 0 : index
    %c0_112 = arith.constant 0 : index
    %c0_113 = arith.constant 0 : index
    %c0_114 = arith.constant 0 : index
    %150 = vector.load %arg15[%c0_111, %c0_112, %c0_113, %c0_114] : memref<1x16x16x16xf32, #tpu.memory_space<vmem>>, vector<1x16x16x16xf32>
    tpu.vector_store %arg15[%c0_111, %c0_112, %c0_113, %c0_114], %149 {strides = array<i32>} : memref<1x16x16x16xf32, #tpu.memory_space<vmem>>, vector<1x16x16x16xf32>,
    return
  }
  func.func @transform_0(%arg0: i32, %arg1: i32) -> (i32, i32, i32, i32) {
    %c0_i32 = arith.constant 0 : i32
    %c0_i32_0 = arith.constant 0 : i32
    %c0_i32_1 = arith.constant 0 : i32
    return %arg0, %arg1, %c0_i32, %c0_i32_0 : i32, i32, i32, i32
  }
  func.func @transform_1(%arg0: i32, %arg1: i32) -> (i32, i32, i32, i32) {
    %c16_i32 = arith.constant 16 : i32
    %0 = arith.muli %arg1, %c16_i32 : i32
    %c1_i32 = arith.constant 1 : i32
    %1 = arith.subi %0, %c1_i32 : i32
    %c0_i32 = arith.constant 0 : i32
    %2 = arith.maxsi %1, %c0_i32 : i32
    %c0_i32_0 = arith.constant 0 : i32
    %c0_i32_1 = arith.constant 0 : i32
    %c0_i32_2 = arith.constant 0 : i32
    return %arg0, %2, %c0_i32_0, %c0_i32_1 : i32, i32, i32, i32
  }
  func.func @transform_2(%arg0: i32, %arg1: i32) -> (i32, i32, i32, i32) {
    %c1_i32 = arith.constant 1 : i32
    %0 = arith.addi %arg1, %c1_i32 : i32
    %c16_i32 = arith.constant 16 : i32
    %1 = arith.muli %0, %c16_i32 : i32
    %c15_i32 = arith.constant 15 : i32
    %2 = arith.minsi %1, %c15_i32 : i32
    %c0_i32 = arith.constant 0 : i32
    %c0_i32_0 = arith.constant 0 : i32
    %c0_i32_1 = arith.constant 0 : i32
    return %arg0, %2, %c0_i32, %c0_i32_0 : i32, i32, i32, i32
  }
  func.func @transform_3(%arg0: i32, %arg1: i32) -> (i32, i32) {
    %c0_i32 = arith.constant 0 : i32
    %c0_i32_0 = arith.constant 0 : i32
    %c0_i32_1 = arith.constant 0 : i32
    return %c0_i32, %c0_i32_0 : i32, i32
  }
  func.func @transform_4(%arg0: i32, %arg1: i32) -> (i32, i32) {
    %c0_i32 = arith.constant 0 : i32
    %c0_i32_0 = arith.constant 0 : i32
    %c0_i32_1 = arith.constant 0 : i32
    return %c0_i32, %c0_i32_0 : i32, i32
  }
  func.func @transform_5(%arg0: i32, %arg1: i32) -> (i32, i32) {
    %c0_i32 = arith.constant 0 : i32
    %c0_i32_0 = arith.constant 0 : i32
    %c0_i32_1 = arith.constant 0 : i32
    return %c0_i32, %c0_i32_0 : i32, i32
  }
  func.func @transform_6(%arg0: i32, %arg1: i32) -> (i32, i32) {
    %c0_i32 = arith.constant 0 : i32
    %c0_i32_0 = arith.constant 0 : i32
    %c0_i32_1 = arith.constant 0 : i32
    return %c0_i32, %c0_i32_0 : i32, i32
  }
  func.func @transform_7(%arg0: i32, %arg1: i32) -> (i32, i32) {
    %c0_i32 = arith.constant 0 : i32
    %c0_i32_0 = arith.constant 0 : i32
    %c0_i32_1 = arith.constant 0 : i32
    return %c0_i32, %c0_i32_0 : i32, i32
  }
  func.func @transform_8(%arg0: i32, %arg1: i32) -> (i32, i32, i32) {
    %c0_i32 = arith.constant 0 : i32
    %c0_i32_0 = arith.constant 0 : i32
    %c0_i32_1 = arith.constant 0 : i32
    %c0_i32_2 = arith.constant 0 : i32
    return %c0_i32, %c0_i32_0, %c0_i32_1 : i32, i32, i32
  }
  func.func @transform_9(%arg0: i32, %arg1: i32) -> (i32, i32) {
    %c0_i32 = arith.constant 0 : i32
    %c0_i32_0 = arith.constant 0 : i32
    %c0_i32_1 = arith.constant 0 : i32
    return %c0_i32, %c0_i32_0 : i32, i32
  }
  func.func @transform_10(%arg0: i32, %arg1: i32) -> (i32, i32) {
    %c0_i32 = arith.constant 0 : i32
    %c0_i32_0 = arith.constant 0 : i32
    %c0_i32_1 = arith.constant 0 : i32
    return %c0_i32, %c0_i32_0 : i32, i32
  }
  func.func @transform_11(%arg0: i32, %arg1: i32) -> (i32, i32) {
    %c0_i32 = arith.constant 0 : i32
    %c0_i32_0 = arith.constant 0 : i32
    %c0_i32_1 = arith.constant 0 : i32
    return %c0_i32, %c0_i32_0 : i32, i32
  }
  func.func @transform_12(%arg0: i32, %arg1: i32) -> (i32, i32) {
    %c0_i32 = arith.constant 0 : i32
    %c0_i32_0 = arith.constant 0 : i32
    %c0_i32_1 = arith.constant 0 : i32
    return %c0_i32, %c0_i32_0 : i32, i32
  }
  func.func @transform_13(%arg0: i32, %arg1: i32) -> (i32, i32, i32, i32) {
    %c0_i32 = arith.constant 0 : i32
    %c0_i32_0 = arith.constant 0 : i32
    %c0_i32_1 = arith.constant 0 : i32
    return %arg0, %arg1, %c0_i32, %c0_i32_0 : i32, i32, i32, i32
  }
}

</mosaic_0001>

<bundles_post_ra>
// kernel: tpu_custom_call.1
= control target key start
LH: loop header
LB: loop body
LE: loop exit
PB: predicated region body
PF: predicated region fallthrough
CT: control target
= control target key end

     0   :  { %s6579_s0 = inlined_call_operand.vmem [shape: f32[2,16,16,4], index: 0, kind: input, shape index: {}]   ;;  %s6580_s1 = inlined_call_operand.vmem [shape: f32[2,16,16,4], index: 1, kind: input, shape index: {}]   ;;  %s6581_s2 = inlined_call_operand.vmem [shape: f32[2,16,16,4], index: 2, kind: input, shape index: {}]   ;;  %s6582_s3 = inlined_call_operand.vmem [shape: f32[1,4], index: 3, kind: input, shape index: {}]   ;;  %s6583_s4 = inlined_call_operand.vmem [shape: f32[1,4], index: 4, kind: input, shape index: {}]   ;;  %s6584_s5 = inlined_call_operand.vmem [shape: f32[4,4], index: 5, kind: input, shape index: {}]   ;;  %s6585_s6 = inlined_call_operand.vmem [shape: f32[1,4], index: 6, kind: input, shape index: {}]   ;;  %s6586_s7 = inlined_call_operand.vmem [shape: f32[1,4], index: 7, kind: input, shape index: {}]   ;;  %s6587_s8 = inlined_call_operand.vmem [shape: f32[9,4,4], index: 8, kind: input, shape index: {}]   ;;  %s6588_s9 = inlined_call_operand.vmem [shape: f32[1,4], index: 9, kind: input, shape index: {}]   ;;  %s6589_s10 = inlined_call_operand.vmem [shape: f32[1,4], index: 10, kind: input, shape index: {}]   ;;  %s6590_s11 = inlined_call_operand.vmem [shape: f32[4,16], index: 11, kind: input, shape index: {}]   ;;  %s6591_s12 = inlined_call_operand.vmem [shape: f32[4,16], index: 12, kind: input, shape index: {}]   ;;  %s6592_s13 = inlined_call_operand.hbm [shape: f32[2,16,16,16], index: 13, kind: output, shape index: {}]  }
   0x1   :  { %6732 = sst [smem:[#allocation108_spill]] %s6579_s0 }
   0x2   :  { %6733 = sst [smem:[#allocation109_spill]] %s6580_s1 }
   0x3   :  { %18 = vsyncpa [#allocation4], 0 }
   0x4   :  { %20 = vsyncpa [#allocation4 + $0x1], 0  ;;  %s4328_s25 = smov 0   ;;  %s4330_s26 = smov 0  }
   0x5   :  { %s4332_s27 = smov 0   ;;  %s4334_s28 = smov 0  }
   0x6   :  { %s4336_s29 = smov 0   ;;  %s4338_s30 = smov 0  }
   0x7 LB: > { %6734 = sst [smem:[#allocation6_spill]] %s4249_s29  ;;  %s3662_s14 = sadd.s32 4294967295, %s4253_s30   ;;  %s4253_s30 = sphi %s4338_s30, %s26_s30   ;;  %s4249_s29 = sphi %s4336_s29, %s7013_s29   ;;  %s4245_s28 = sphi %s4334_s28, %s7012_s28   ;;  %s4241_s27 = sphi %s4332_s27, %s7016_s27   ;;  %s4237_s26 = sphi %s4330_s26, %s7015_s26   ;;  %s4233_s25 = sphi %s4328_s25, %s7014_s25  }
   0x8   : > { %s3663_s15 = sadd.s32 4294967294, %s4253_s30   ;;  %s38_s16 = sadd.s32 1, %s4249_s29 }
   0x9   : > { %s357_s17 = sadd.s32 1, %s4241_s27  ;;  %p40_p0 = scmp.ge.s32.totalorder %s38_s16, 2 }
   0xa   : > { %p367_p1 = scmp.ne.s32.totalorder %s4241_s27, %s4237_s26  ;;  %p368_p2 = scmp.eq.s32.totalorder %s3662_s14, 1 }
   0xb   : > { %p373_p3 = scmp.ne.s32.totalorder %s4237_s26, %s4233_s25  ;;  %s7018_s16 = smov (%p40_p0, %s38_s16), 0 }
   0xc   : > { %6735 = sst [smem:[#allocation7_spill]] %s7018_s16  ;;  %p4368_p4 = por %p368_p2, %p367_p1 }
   0xd   : > { %p374_p5 = scmp.eq.s32.totalorder %s3663_s15, 1  ;;  %s352_s19 = ssub.s32 %s4249_s29, %s7018_s16 }
   0xe   : > { %p3666_p6 = scmp.ge.s32.totalorder %s4253_s30, 1  ;;  %p355_p7 = scmp.eq.s32.totalorder %s352_s19, 0 }
   0xf   : > { %p4375_p8 = por %p374_p5, %p373_p3  ;;  %p476_p9 = scmp.lt.s32.totalorder %s4253_s30, 3 }
  0x10   : > { %s4381_s21 = scalar_select %p355_p7, %s4241_s27, %s357_s17  }
  0x11   : > { %p477_p10 = pnand %p3666_p6, %p476_p9 }
  0x13   : > { %480 = sbr.rel (%p477_p10) target bundleno = 1211 (0x4bb), region = 72 }
  0x18   : > { %v770_v0 = vld [vmem:[%s6584_s5] sm:$0xf]  ;;  %vm868_vm0 = vcmask 1043456   ;;  %p552_p11 = scmp.lt.s32.totalorder %s4245_s28, 1  ;;  %s6738_s0 = sld [smem:[#allocation108_spill]]  ;;  %vm771_vm1 = vcmask 31744  }
  0x19   : > { %3674 = vmatpush.msk.msra.mxu0 %vm868_vm0, %v770_v0  ;;  %v4391_v1 = vld [vmem:[%s6582_s3] ss:$0 sm:$0xff]  ;;  %s6750_s1 = sld [smem:[#allocation109_spill]]  ;;  %vm597_vm2 = vcmask 24576   ;;  %v4255_v63 = vmov 0.0   ;;  %vm1364_vm3 = vcmask 1046528  }
  0x1a   : > { %s553_s15 = scalar_select %p552_p11, %s4245_s28, 1  ;;  %v4405_v2 = vld [vmem:[%s6583_s4] ss:$0 sm:$0xff]  ;;  %598 = vst.msk [vmem:[#allocation2] sm:$0x1] %vm597_vm2, %v4255_v63  ;;  %vm1807_vm4 = vcmask 1045504  }
  0x1b   : > { %v4157_v49 = vld [vmem:[%s6582_s3] ss:$0 sm:$0xff]  ;;  %1191 = vst.msk [vmem:[#allocation2 + $0x1] sm:$0xff] %vm771_vm1, %v4255_v63  ;;  %vm3486_vm5 = vcmask 130048   ;;  %s4093_s19 = sshll.u32 %s4245_s28, 8  ;;  %s4195_s29 = scalar_lea.hbm %s6592_s13, 512 }
  0x1c   : > { %s4394_s17 = sshll.u32 %s553_s15, 8  ;;  %v4158_v52 = vld [vmem:[%s6583_s4] ss:$0 sm:$0xff]  ;;  %599 = vst.msk [vmem:[#allocation2 + $0x18] sm:$0x1] %vm597_vm2, %v4255_v63  ;;  %s3534_s16 = scalar_lea.hbm %s6592_s13, %s4093_s19 }
  0x1d   : > { %v1139_v54 = vld [vmem:[%s6584_s5] sm:$0xf]  ;;  %s4092_s14 = sadd.s32 240, %s4394_s17  ;;  %600 = vst.msk [vmem:[#allocation2 + $0x30] sm:$0x1] %vm597_vm2, %v4255_v63 }
  0x1e   : > { %s4400_s22 = scalar_lea.vmem %s6738_s0, %s4394_s17  ;;  %4095 = vmatpush.msk.msra.mxu1 %vm868_vm0, %v1139_v54  ;;  %3707 = vmatpush.msk.msrb.mxu0 %vm868_vm0, %v1139_v54  ;;  %v4161_v0 = vld [vmem:[%s6582_s3] ss:$0 sm:$0xff]  ;;  %601 = vst.msk [vmem:[#allocation2 + $0x48] sm:$0x1] %vm597_vm2, %v4255_v63 }
  0x1f   : > { %v634_v3 = vld [vmem:[%s4400_s22] sm:$0xff]  ;;  %v635_v4 = vld [vmem:[%s4400_s22 + $0x8] sm:$0xff]  ;;  %v636_v10 = vld [vmem:[%s4400_s22 + $0x10] sm:$0xff]  ;;  %s574_s24 = scalar_lea.vmem %s6750_s1, %s4394_s17  ;;  %s591_s17 = scalar_lea.vmem %s6581_s2, %s4092_s14  ;;  %602 = vst.msk [vmem:[#allocation2 + $0x60] sm:$0x1] %vm597_vm2, %v4255_v63 }
  0x20   : > { %v670_v5 = vmul.f32 %v4391_v1, %v634_v3  ;;  %v671_v7 = vmul.f32 %v4391_v1, %v635_v4  ;;  %v672_v12 = vmul.f32 %v4391_v1, %v636_v10  ;;  %v637_v14 = vld [vmem:[%s4400_s22 + $0x18] sm:$0xff]  ;;  %v638_v18 = vld [vmem:[%s4400_s22 + $0x20] sm:$0xff]  ;;  %v639_v22 = vld [vmem:[%s4400_s22 + $0x28] sm:$0xff]  ;;  %603 = vst.msk [vmem:[#allocation2 + $0x78] sm:$0x1] %vm597_vm2, %v4255_v63  ;;  %s3537_s14 = sshll.u32 %s3534_s16, 4  ;;  %s3538_s14 = int_to_ptr.hbm [resolvable:$true] %s3537_s14 }
  0x21   : > { %v673_v16 = vmul.f32 %v4391_v1, %v637_v14  ;;  %v674_v20 = vmul.f32 %v4391_v1, %v638_v18  ;;  %v675_v24 = vmul.f32 %v4391_v1, %v639_v22  ;;  %v640_v26 = vld [vmem:[%s4400_s22 + $0x30] sm:$0xff]  ;;  %v641_v30 = vld [vmem:[%s4400_s22 + $0x38] sm:$0xff]  ;;  %v642_v34 = vld [vmem:[%s4400_s22 + $0x40] sm:$0xff]  ;;  %604 = vst.msk [vmem:[#allocation2 + $0x90] sm:$0x1] %vm597_vm2, %v4255_v63 }
  0x22   : > { %v4411_v6 = vadd.f32 %v4405_v2, %v670_v5  ;;  %v4419_v9 = vadd.f32 %v4405_v2, %v671_v7  ;;  %v4428_v13 = vadd.f32 %v4405_v2, %v672_v12  ;;  %v676_v28 = vmul.f32 %v4391_v1, %v640_v26  ;;  %v643_v38 = vld [vmem:[%s4400_s22 + $0x48] sm:$0xff]  ;;  %v644_v42 = vld [vmem:[%s4400_s22 + $0x50] sm:$0xff]  ;;  %v645_v46 = vld [vmem:[%s4400_s22 + $0x58] sm:$0xff]  ;;  %605 = vst.msk [vmem:[#allocation2 + $0xa8] sm:$0x1] %vm597_vm2, %v4255_v63 }
  0x23   : > { %v4437_v17 = vadd.f32 %v4405_v2, %v673_v16  ;;  %v4446_v21 = vadd.f32 %v4405_v2, %v674_v20  ;;  %v4455_v25 = vadd.f32 %v4405_v2, %v675_v24  ;;  %v677_v32 = vmul.f32 %v4391_v1, %v641_v30  ;;  %v1124_v50 = vld [vmem:[%s574_s24 + $0x8] sm:$0xff]  ;;  %v1123_v55 = vld [vmem:[%s574_s24] sm:$0xff]  ;;  %606 = vst.msk [vmem:[#allocation2 + $0xc0] sm:$0x1] %vm597_vm2, %v4255_v63  ;;  %s548_s24 = sand.u32 1, %s4237_s26  }
  0x24   : > { %6739 = vst [vmem:[#allocation8_spill] sm:$0xff] %v4411_v6  ;;  %v6619_v8 = vmax.f32 %v4411_v6, 0.0  ;;  %v6618_v11 = vmax.f32 %v4419_v9, 0.0  ;;  %v6617_v15 = vmax.f32 %v4428_v13, 0.0  ;;  %v4464_v29 = vadd.f32 %v4405_v2, %v676_v28  ;;  %v646_v57 = vld [vmem:[%s4400_s22 + $0x60] sm:$0xff]  ;;  %v1194_v7 = vld [vmem:[%s591_s17 + $0x8] sm:$0xff] }
  0x25   : > { %6740 = vst [vmem:[#allocation9_spill] sm:$0xff] %v4419_v9  ;;  %v6616_v19 = vmax.f32 %v4437_v17, 0.0  ;;  %v6614_v23 = vmax.f32 %v4446_v21, 0.0  ;;  %v6612_v27 = vmax.f32 %v4455_v25, 0.0  ;;  %v4473_v33 = vadd.f32 %v4405_v2, %v677_v32  ;;  %v1315_v4 = vld [vmem:[%s6587_s8] sm:$0xf] }
  0x26   : > { %3675 = vmatmul.msk.f32.vlgmr.msra.gmra.mxu0 %vm771_vm1, %v6619_v8  ;;  %6741 = vst [vmem:[#allocation10_spill] sm:$0xff] %v4428_v13  ;;  %v6611_v31 = vmax.f32 %v4464_v29, 0.0  ;;  %v678_v36 = vmul.f32 %v4391_v1, %v642_v34  ;;  %v679_v40 = vmul.f32 %v4391_v1, %v643_v38  ;;  %v680_v44 = vmul.f32 %v4391_v1, %v644_v42  ;;  %v1193_v5 = vld [vmem:[%s591_s17] sm:$0xff]  ;;  %v647_v10 = vld [vmem:[%s4400_s22 + $0x68] sm:$0xff]  ;;  %s3667_s15 = sshll.u32 %s548_s24, 8  ;;  %s3520_s28 = scalar_lea.sflag [#allocation4], %s548_s24 }
  0x27   : > { %6742 = vst [vmem:[#allocation11_spill] sm:$0xff] %v4437_v17  ;;  %v6610_v35 = vmax.f32 %v4473_v33, 0.0  ;;  %v681_v48 = vmul.f32 %v4391_v1, %v645_v46  ;;  %v1130_v51 = vmul.f32 %v4157_v49, %v1124_v50  ;;  %v1129_v58 = vmul.f32 %v4157_v49, %v1123_v55  ;;  %3747 = vmatpush.msk.msrb.mxu1 %vm868_vm0, %v1315_v4  ;;  %v4162_v14 = vld [vmem:[%s6583_s4] ss:$0 sm:$0xff]  ;;  %v3713_v42 = vld [vmem:[%s6587_s8 + $0x4] sm:$0xf] }
  0x28   : > { %6743 = vst [vmem:[#allocation12_spill] sm:$0xff] %v4446_v21  ;;  %v4482_v37 = vadd.f32 %v4405_v2, %v678_v36  ;;  %v4491_v41 = vadd.f32 %v4405_v2, %v679_v40  ;;  %v4500_v45 = vadd.f32 %v4405_v2, %v680_v44  ;;  %v682_v62 = vmul.f32 %v4391_v1, %v646_v57  ;;  %v4571_v26 = vld [vmem:[#allocation2] sm:$0xff]  ;;  %v648_v36 = vld [vmem:[%s4400_s22 + $0x70] sm:$0xff]  ;;  %v3780_v44 = vld [vmem:[%s6587_s8 + $0x8] sm:$0xf]  ;;  %s6395_s17 = scalar_lea.vmem [#allocation3], %s3667_s15 }
  0x29   : > { %6744 = vst [vmem:[#allocation13_spill] sm:$0xff] %v4455_v25  ;;  %v4519_v53 = vadd.f32 %v4405_v2, %v681_v48  ;;  %v1136_v56 = vadd.f32 %v4158_v52, %v1130_v51  ;;  %v4528_v60 = vadd.f32 %v4158_v52, %v1129_v58  ;;  %v1199_v12 = vmul.f32 %v4161_v0, %v1193_v5  ;;  %v1209_v28 = vld [vmem:[%s6584_s5] sm:$0xf]  ;;  %v649_v48 = vld [vmem:[%s4400_s22 + $0x78] sm:$0xff]  ;;  %v3848_v51 = vld [vmem:[%s6587_s8 + $0x10] sm:$0xf] }
  0x2a   : > { %6745 = vst [vmem:[#allocation14_spill] sm:$0xff] %v4464_v29  ;;  %v6609_v39 = vmax.f32 %v4482_v37, 0.0  ;;  %v6608_v43 = vmax.f32 %v4491_v41, 0.0  ;;  %v6607_v47 = vmax.f32 %v4500_v45, 0.0  ;;  %v4551_v3 = vadd.f32 %v4405_v2, %v682_v62  ;;  %3710 = vmatpush.msk.msra.mxu2 %vm868_vm0, %v1209_v28  ;;  %4096 = vmatpush.msk.msra.mxu3 %vm868_vm0, %v1209_v28  ;;  %v650_v54 = vld [vmem:[%s4400_s22 + $0x80] sm:$0xff]  ;;  %v651_v58 = vld [vmem:[%s4400_s22 + $0x88] sm:$0xff] }
  0x2b   : > { %6746 = vst [vmem:[#allocation15_spill] sm:$0xff] %v4473_v33  ;;  %v1138_v59 = vmax.f32 %v1136_v56, 0.0  ;;  %v6606_v61 = vmax.f32 %v4519_v53, 0.0  ;;  %v1200_v16 = vmul.f32 %v4161_v0, %v1194_v7  ;;  %v1205_v18 = vadd.f32 %v4162_v14, %v1199_v12  ;;  %v4700_v62 = vld [vmem:[%s6586_s7] ss:$0 sm:$0xff]  ;;  %s4189_s15 = sshra.s32 %s3538_s14, 4  ;;  %s4190_s15 = int_to_ptr.hbm [resolvable:$true] %s4189_s15 }
  0x2c   : > { %6747 = vst [vmem:[#allocation16_spill] sm:$0xff] %v4482_v37  ;;  %v6604_v22 = vmax.f32 %v4551_v3, 0.0  ;;  %v683_v24 = vmul.f32 %v4391_v1, %v647_v10  ;;  %v684_v40 = vmul.f32 %v4391_v1, %v648_v36  ;;  %3714 = vmatpush.msk.msrb.mxu3 %vm868_vm0, %v3713_v42  ;;  %3781 = vmatpush.msk.msrb.mxu2 %vm868_vm0, %v3780_v44  ;;  %v1365_v10 = vrot.slane %v4571_v26, 1  ;;  %s4191_s0 = scalar_lea.hbm %s4190_s15, 256  ;;  %p4196_p1 = scmp.lt.s32.totalorder %s4190_s15, %s6592_s13 }
  0x2d   : > { %6748 = vst [vmem:[#allocation17_spill] sm:$0xff] %v4491_v41  ;;  %3709 = vmatmul.msk.f32.vlgmr.msra.gmra.mxu1 %vm771_vm1, %v1138_v59  ;;  %v1206_v20 = vadd.f32 %v4162_v14, %v1200_v16  ;;  %v1207_v30 = vmax.f32 %v1205_v18, 0.0  ;;  %v685_v50 = vmul.f32 %v4391_v1, %v649_v48  ;;  %v686_v56 = vmul.f32 %v4391_v1, %v650_v54  ;;  %v4693_v59 = vld [vmem:[%s6585_s6] ss:$0 sm:$0xff]  ;;  %p4192_p12 = scmp.ne.s32.totalorder %s4190_s15, %s4191_s0  ;;  %p4197_p2 = scmp.lt.s32.totalorder %s4195_s29, %s4191_s0 }
  0x2e   : > { %3676 = vmatmul.msk.f32.gmra.mxu0 %vm771_vm1, %v6618_v11  ;;  %6749 = vst [vmem:[#allocation18_spill] sm:$0xff] %v4500_v45  ;;  %v4592_v34 = vadd.f32 %v4405_v2, %v683_v24  ;;  %v4627_v46 = vadd.f32 %v4405_v2, %v684_v40  ;;  %v687_v4 = vmul.f32 %v4391_v1, %v651_v58  ;;  %v1808_v12 = vrot.slane %v4571_v26, 2  ;;  %v652_v24 = vld [vmem:[%s4400_s22 + $0x90] sm:$0xff] }
  0x2f   : > { %6751 = vst [vmem:[#allocation19_spill] sm:$0xff] %v4519_v53  ;;  %v1208_v32 = vmax.f32 %v1206_v20, 0.0  ;;  %3711 = vmatmul.msk.f32.vlgmr.msra.gmra.mxu2 %vm771_vm1, %v1207_v30  ;;  %v4656_v52 = vadd.f32 %v4405_v2, %v685_v50  ;;  %v4683_v57 = vadd.f32 %v4405_v2, %v686_v56  ;;  %v688_v40 = vmul.f32 %v4391_v1, %v652_v24  ;;  %v653_v56 = vld [vmem:[%s4400_s22 + $0x98] sm:$0xff]  ;;  %v654_v24 = vld [vmem:[%s4400_s22 + $0xa0] sm:$0xff]  ;;  %p4193_p13 = pnand %p4192_p12, %p4368_p4  ;;  %p4198_p3 = por %p4197_p2, %p4196_p1 }
  0x30   : > { %6752 = vst [vmem:[#allocation20_spill] sm:$0xff] %v4551_v3  ;;  %v6602_v38 = vmax.f32 %v4592_v34, 0.0  ;;  %v6601_v49 = vmax.f32 %v4627_v46, 0.0  ;;  %v4712_v16 = vadd.f32 %v4405_v2, %v687_v4 }
  0x31   : > { %607 = vst.msk [vmem:[#allocation2 + $0xd8] sm:$0x1] %vm597_vm2, %v4255_v63  ;;  %3712 = vmatmul.msk.f32.vlgmr.msra.gmra.mxu3 %vm771_vm1, %v1208_v32  ;;  %v6600_v55 = vmax.f32 %v4656_v52, 0.0  ;;  %v6599_v0 = vmax.f32 %v4683_v57, 0.0  ;;  %v4729_v54 = vadd.f32 %v4405_v2, %v688_v40  ;;  %p4194_p0 = pneg %p4193_p13 }
  0x32   : > { %608 = vst.msk [vmem:[#allocation2 + $0xf0] sm:$0x1] %vm597_vm2, %v4255_v63  ;;  %3849 = vmatpush.msk.msra.mxu3 %vm868_vm0, %v3848_v51  ;;  %v6598_v36 = vmax.f32 %v4712_v16, 0.0 }
  0x33   : > { %6753 = vst [vmem:[#allocation21_spill] sm:$0xff] %v4592_v34  ;;  %p4199_p5 = pnand %p4198_p3, %p4194_p0 }
  0x34   : > { %609 = vst.msk [vmem:[#allocation2 + $0x108] sm:$0x1] %vm597_vm2, %v4255_v63 }
  0x35   : > { %3748 = vmatmul.msk.f32.vlgmr.msrb.gmra.mxu1 %vm771_vm1, %v4571_v26  ;;  %610 = vst.msk [vmem:[#allocation2 + $0x120] sm:$0x1] %vm597_vm2, %v4255_v63 }
  0x36   : > { %3677 = vmatmul.msk.f32.gmra.mxu0 %vm771_vm1, %v6617_v15  ;;  %611 = vst.msk [vmem:[#allocation2 + $0x138] sm:$0x1] %vm597_vm2, %v4255_v63 }
  0x37   : > { %612 = vst.msk [vmem:[#allocation2 + $0x150] sm:$0x1] %vm597_vm2, %v4255_v63 }
  0x38   : > { %613 = vst.msk [vmem:[#allocation2 + $0x168] sm:$0x1] %vm597_vm2, %v4255_v63 }
  0x39   : > { %614 = vst.msk [vmem:[#allocation2 + $0x180] sm:$0x1] %vm597_vm2, %v4255_v63 }
  0x3a   : > { %615 = vst.msk [vmem:[#allocation2 + $0x198] sm:$0x1] %vm597_vm2, %v4255_v63 }
  0x3b   : > { %616 = vst.msk [vmem:[#allocation2 + $0x11] sm:$0x1] %vm597_vm2, %v4255_v63 }
  0x3c   : > { %6754 = vst [vmem:[#allocation22_spill] sm:$0xff] %v4627_v46 }
  0x3d   : > { %617 = vst.msk [vmem:[#allocation2 + $0x29] sm:$0x1] %vm597_vm2, %v4255_v63 }
  0x3e   : > { %3678 = vmatmul.msk.f32.gmra.mxu0 %vm771_vm1, %v6616_v19  ;;  %618 = vst.msk [vmem:[#allocation2 + $0x41] sm:$0x1] %vm597_vm2, %v4255_v63 }
  0x3f   : > { %619 = vst.msk [vmem:[#allocation2 + $0x59] sm:$0x1] %vm597_vm2, %v4255_v63 }
  0x40   : > { %620 = vst.msk [vmem:[#allocation2 + $0x71] sm:$0x1] %vm597_vm2, %v4255_v63 }
  0x41   : > { %621 = vst.msk [vmem:[#allocation2 + $0x89] sm:$0x1] %vm597_vm2, %v4255_v63 }
  0x42   : > { %622 = vst.msk [vmem:[#allocation2 + $0xa1] sm:$0x1] %vm597_vm2, %v4255_v63 }
  0x43   : > { %623 = vst.msk [vmem:[#allocation2 + $0xb9] sm:$0x1] %vm597_vm2, %v4255_v63 }
  0x44   : > { %624 = vst.msk [vmem:[#allocation2 + $0xd1] sm:$0x1] %vm597_vm2, %v4255_v63 }
  0x45   : > { %6755 = vst [vmem:[#allocation23_spill] sm:$0xff] %v4656_v52 }
  0x46   : > { %3679 = vmatmul.msk.f32.gmra.mxu0 %vm771_vm1, %v6614_v23  ;;  %625 = vst.msk [vmem:[#allocation2 + $0xe9] sm:$0x1] %vm597_vm2, %v4255_v63 }
  0x47   : > { %626 = vst.msk [vmem:[#allocation2 + $0x101] sm:$0x1] %vm597_vm2, %v4255_v63 }
  0x48   : > { %627 = vst.msk [vmem:[#allocation2 + $0x119] sm:$0x1] %vm597_vm2, %v4255_v63 }
  0x49   : > { %628 = vst.msk [vmem:[#allocation2 + $0x131] sm:$0x1] %vm597_vm2, %v4255_v63 }
  0x4a   : > { %629 = vst.msk [vmem:[#allocation2 + $0x149] sm:$0x1] %vm597_vm2, %v4255_v63 }
  0x4b   : > { %630 = vst.msk [vmem:[#allocation2 + $0x161] sm:$0x1] %vm597_vm2, %v4255_v63 }
  0x4c   : > { %631 = vst.msk [vmem:[#allocation2 + $0x179] sm:$0x1] %vm597_vm2, %v4255_v63 }
  0x4d   : > { %632 = vst.msk [vmem:[#allocation2 + $0x191] sm:$0x1] %vm597_vm2, %v4255_v63 }
  0x4e   : > { %3680 = vmatmul.msk.f32.gmra.mxu0 %vm771_vm1, %v6612_v27  ;;  %633 = vst.msk [vmem:[#allocation2 + $0x1a9] sm:$0x1] %vm597_vm2, %v4255_v63 }
  0x4f   : > { %6756 = vst [vmem:[#allocation24_spill] sm:$0xff] %v4683_v57 }
  0x50   : > { %1192 = vst.msk [vmem:[#allocation2 + $0x9] sm:$0xff] %vm771_vm1, %v4255_v63 }
  0x51   : > { %1259 = vst.msk [vmem:[#allocation2 + $0x199] sm:$0xff] %vm771_vm1, %v4255_v63 }
  0x52   : > { %1260 = vst.msk [vmem:[#allocation2 + $0x1a1] sm:$0xff] %vm771_vm1, %v4255_v63 }
  0x53   : > { %6757 = vst [vmem:[#allocation25_spill] sm:$0xff] %v4712_v16 }
  0x54   : > { %6758 = vst [vmem:[#allocation26_spill] sm:$0xff] %v4729_v54 }
  0x56   : > { %3681 = vmatmul.msk.f32.gmra.mxu0 %vm771_vm1, %v6611_v31 }
  0x57   : > { %v1262_v63 = vld [vmem:[#allocation2 + $0x8] sm:$0xff]  ;;  %v1263_v26 = vld [vmem:[#allocation2 + $0x10] sm:$0x3] }
  0x58   : > { %v1366_v18 = vrot.slane %v1262_v63, 1  ;;  %3749 = vmatmul.msk.f32.gmra.mxu1 %vm771_vm1, %v1262_v63  ;;  %v1809_v20 = vrot.slane %v1262_v63, 2  ;;  %v1368_v44 = vrot.slane %v1263_v26, 1  ;;  %v1811_v50 = vrot.slane %v1263_v26, 2 }
  0x5a   : > { %v1367_v30 = vsel %vm1364_vm3, %v1365_v10, %v1366_v18  ;;  %v1810_v32 = vsel %vm1807_vm4, %v1808_v12, %v1809_v20  ;;  %v1369_v58 = vsel %vm1364_vm3, %v1366_v18, %v1368_v44  ;;  %v689_v10 = vmul.f32 %v4391_v1, %v653_v56 }
  0x5b   : > { %3715 = vmatmul.msk.f32.vlgmr.msrb.gmra.mxu3 %vm771_vm1, %v1367_v30  ;;  %3782 = vmatmul.msk.f32.vlgmr.msrb.gmra.mxu2 %vm771_vm1, %v1810_v32  ;;  %v6597_v12 = vmax.f32 %v4729_v54, 0.0  ;;  %v690_v32 = vmul.f32 %v4391_v1, %v654_v24 }
  0x5c   : > { %v4745_v18 = vadd.f32 %v4405_v2, %v689_v10 }
  0x5d   : > { %v4779_v10 = vadd.f32 %v4405_v2, %v690_v32 }
  0x5e   : > { %3682 = vmatmul.msk.f32.gmra.mxu0 %vm771_vm1, %v6610_v35  ;;  %6759 = vst [vmem:[#allocation27_spill] sm:$0xff] %v4745_v18  ;;  %v6596_v30 = vmax.f32 %v4745_v18, 0.0 }
  0x5f   : > { %6760 = vst [vmem:[#allocation28_spill] sm:$0xff] %v4779_v10 }
  0x63   : > { %3716 = vmatmul.msk.f32.gmra.mxu3 %vm771_vm1, %v1369_v58 }
  0x66   : > { %3683 = vmatmul.msk.f32.gmra.mxu0 %vm771_vm1, %v6609_v39 }
  0x6e   : > { %3684 = vmatmul.msk.f32.gmra.mxu0 %vm771_vm1, %v6608_v43 }
  0x76   : > { %3685 = vmatmul.msk.f32.gmra.mxu0 %vm771_vm1, %v6607_v47 }
  0x7e   : > { %3686 = vmatmul.msk.f32.gmra.mxu0 %vm771_vm1, %v6606_v61 }
  0x86   : > { %3687 = vmatmul.msk.f32.gmra.mxu0 %vm771_vm1, %v6604_v22 }
  0x8e   : > { %3688 = vmatmul.msk.f32.gmra.mxu0 %vm771_vm1, %v6602_v38 }
  0x96   : > { %3689 = vmatmul.msk.f32.gmra.mxu0 %vm771_vm1, %v6601_v49 }
  0x9e   : > { %3690 = vmatmul.msk.f32.gmra.mxu0 %vm771_vm1, %v6600_v55 }
  0xa3   : > { %v889_v5 = vpop.f32.mrf.mxu0 }
  0xa4   : > { %v989_v7 = vmul.f32 %v4693_v59, %v889_v5  ;;  %v1812_v5 = vsel %vm1807_vm4, %v1809_v20, %v1811_v50 }
  0xa5   : > { %3783 = vmatmul.msk.f32.gmra.mxu2 %vm771_vm1, %v1812_v5 }
  0xa6   : > { %v1025_v14 = vadd.f32 %v4700_v62, %v989_v7  ;;  %3691 = vmatmul.msk.f32.gmra.mxu0 %vm771_vm1, %v6599_v0 }
  0xa8   : > { %v1057_v28 = vmax.f32 %v1025_v14, 0.0 }
  0xaa   : > { %1090 = vst.msk [vmem:[#allocation2 + $0x19] sm:$0xff] %vm771_vm1, %v1057_v28 }
  0xab   : > { %v892_v42 = vpop.f32.mrf.mxu0 }
  0xac   : > { %v990_v48 = vmul.f32 %v4693_v59, %v892_v42 }
  0xae   : > { %v1026_v51 = vadd.f32 %v4700_v62, %v990_v48  ;;  %3692 = vmatmul.msk.f32.gmra.mxu0 %vm771_vm1, %v6598_v36 }
  0xb0   : > { %v1058_v4 = vmax.f32 %v1026_v51, 0.0 }
  0xb1   : > { %v4734_v7 = vld [vmem:[#allocation2 + $0x18] sm:$0xff] }
  0xb2   : > { %1091 = vst.msk [vmem:[#allocation2 + $0x21] sm:$0xff] %vm771_vm1, %v1058_v4  ;;  %3750 = vmatmul.msk.f32.gmra.mxu1 %vm771_vm1, %v4734_v7  ;;  %v1370_v40 = vrot.slane %v4734_v7, 1  ;;  %v1813_v44 = vrot.slane %v4734_v7, 2 }
  0xb3   : > { %v895_v14 = vpop.f32.mrf.mxu0 }
  0xb4   : > { %v991_v63 = vmul.f32 %v4693_v59, %v895_v14  ;;  %v655_v14 = vld [vmem:[%s4400_s22 + $0xa8] sm:$0xff] }
  0xb6   : > { %v1027_v20 = vadd.f32 %v4700_v62, %v991_v63  ;;  %3693 = vmatmul.msk.f32.gmra.mxu0 %vm771_vm1, %v6597_v12 }
  0xb8   : > { %v1059_v28 = vmax.f32 %v1027_v20, 0.0 }
  0xb9   : > { %v4752_v26 = vld [vmem:[#allocation2 + $0x20] sm:$0xff]  ;;  %v1266_v4 = vld [vmem:[#allocation2 + $0x28] sm:$0x3] }
  0xba   : > { %1092 = vst.msk [vmem:[#allocation2 + $0x31] sm:$0xff] %vm771_vm1, %v1059_v28  ;;  %3751 = vmatmul.msk.f32.gmra.mxu1 %vm771_vm1, %v4752_v26  ;;  %v1371_v42 = vrot.slane %v4752_v26, 1  ;;  %v1814_v48 = vrot.slane %v4752_v26, 2  ;;  %v1373_v20 = vrot.slane %v1266_v4, 1  ;;  %v1816_v24 = vrot.slane %v1266_v4, 2 }
  0xbb   : > { %v898_v50 = vpop.f32.mrf.mxu0 }
  0xbc   : > { %v992_v51 = vmul.f32 %v4693_v59, %v898_v50  ;;  %v4765_v56 = vsel %vm1364_vm3, %v1370_v40, %v1371_v42  ;;  %v4768_v58 = vsel %vm1807_vm4, %v1813_v44, %v1814_v48  ;;  %v691_v40 = vmul.f32 %v4391_v1, %v655_v14 }
  0xbd   : > { %3717 = vmatmul.msk.f32.gmra.mxu3 %vm771_vm1, %v4765_v56  ;;  %3784 = vmatmul.msk.f32.gmra.mxu2 %vm771_vm1, %v4768_v58  ;;  %v6595_v44 = vmax.f32 %v4779_v10, 0.0 }
  0xbe   : > { %v1028_v5 = vadd.f32 %v4700_v62, %v992_v51  ;;  %3694 = vmatmul.msk.f32.gmra.mxu0 %vm771_vm1, %v6596_v30  ;;  %v4791_v51 = vsel %vm1364_vm3, %v1371_v42, %v1373_v20  ;;  %v4801_v4 = vadd.f32 %v4405_v2, %v691_v40  ;;  %v656_v42 = vld [vmem:[%s4400_s22 + $0xb0] sm:$0xff] }
  0xc0   : > { %v1060_v63 = vmax.f32 %v1028_v5, 0.0  ;;  %v4794_v5 = vsel %vm1807_vm4, %v1814_v48, %v1816_v24  ;;  %6761 = vst [vmem:[#allocation29_spill] sm:$0xff] %v4801_v4  ;;  %v6603_v48 = vmax.f32 %v4801_v4, 0.0  ;;  %v692_v24 = vmul.f32 %v4391_v1, %v656_v42 }
  0xc1   : > { %v4782_v28 = vld [vmem:[#allocation2 + $0x30] sm:$0xff] }
  0xc2   : > { %1093 = vst.msk [vmem:[#allocation2 + $0x39] sm:$0xff] %vm771_vm1, %v1060_v63  ;;  %3752 = vmatmul.msk.f32.gmra.mxu1 %vm771_vm1, %v4782_v28  ;;  %v1375_v40 = vrot.slane %v4782_v28, 1 }
  0xc3   : > { %v901_v50 = vpop.f32.mrf.mxu0 }
  0xc4   : > { %v993_v32 = vmul.f32 %v4693_v59, %v901_v50 }
  0xc5   : > { %3718 = vmatmul.msk.f32.gmra.mxu3 %vm771_vm1, %v4791_v51  ;;  %3785 = vmatmul.msk.f32.gmra.mxu2 %vm771_vm1, %v4794_v5 }
  0xc6   : > { %v1029_v14 = vadd.f32 %v4700_v62, %v993_v32  ;;  %3695 = vmatmul.msk.f32.gmra.mxu0 %vm771_vm1, %v6595_v44  ;;  %v1818_v32 = vrot.slane %v4782_v28, 2 }
  0xc8   : > { %v1061_v63 = vmax.f32 %v1029_v14, 0.0 }
  0xc9   : > { %v4808_v20 = vld [vmem:[#allocation2 + $0x38] sm:$0xff] }
  0xca   : > { %1094 = vst.msk [vmem:[#allocation2 + $0x49] sm:$0xff] %vm771_vm1, %v1061_v63  ;;  %3753 = vmatmul.msk.f32.gmra.mxu1 %vm771_vm1, %v4808_v20  ;;  %v1376_v50 = vrot.slane %v4808_v20, 1  ;;  %v1819_v14 = vrot.slane %v4808_v20, 2  ;;  %v1269_v63 = vld [vmem:[#allocation2 + $0x40] sm:$0x3] }
  0xcb   : > { %v904_v44 = vpop.f32.mrf.mxu0  ;;  %v1821_v55 = vrot.slane %v1269_v63, 2 }
  0xcc   : > { %v994_v30 = vmul.f32 %v4693_v59, %v904_v44  ;;  %v4821_v12 = vsel %vm1364_vm3, %v1375_v40, %v1376_v50  ;;  %v4824_v42 = vsel %vm1807_vm4, %v1818_v32, %v1819_v14  ;;  %v4835_v44 = vadd.f32 %v4405_v2, %v692_v24  ;;  %v657_v40 = vld [vmem:[%s4400_s22 + $0xb8] sm:$0xff] }
  0xcd   : > { %3719 = vmatmul.msk.f32.gmra.mxu3 %vm771_vm1, %v4821_v12  ;;  %3786 = vmatmul.msk.f32.gmra.mxu2 %vm771_vm1, %v4824_v42  ;;  %v1378_v32 = vrot.slane %v1269_v63, 1  ;;  %v693_v38 = vmul.f32 %v4391_v1, %v657_v40 }
  0xce   : > { %v1030_v36 = vadd.f32 %v4700_v62, %v994_v30  ;;  %3696 = vmatmul.msk.f32.gmra.mxu0 %vm771_vm1, %v6603_v48  ;;  %6762 = vst [vmem:[#allocation30_spill] sm:$0xff] %v4835_v44  ;;  %v6605_v30 = vmax.f32 %v4835_v44, 0.0 }
  0xcf   : > { %v4847_v22 = vsel %vm1364_vm3, %v1376_v50, %v1378_v32 }
  0xd0   : > { %v1062_v0 = vmax.f32 %v1030_v36, 0.0  ;;  %v4850_v36 = vsel %vm1807_vm4, %v1819_v14, %v1821_v55 }
  0xd1   : > { %v4838_v49 = vld [vmem:[#allocation2 + $0x48] sm:$0xff]  ;;  %6763 = vst [vmem:[#allocation31_spill] sm:$0xff] %v4850_v36 }
  0xd2   : > { %1095 = vst.msk [vmem:[#allocation2 + $0x51] sm:$0xff] %vm771_vm1, %v1062_v0  ;;  %3754 = vmatmul.msk.f32.gmra.mxu1 %vm771_vm1, %v4838_v49  ;;  %v4857_v0 = vadd.f32 %v4405_v2, %v693_v38  ;;  %v1380_v38 = vrot.slane %v4838_v49, 1 }
  0xd3   : > { %v907_v48 = vpop.f32.mrf.mxu0 }
  0xd4   : > { %v995_v24 = vmul.f32 %v4693_v59, %v907_v48  ;;  %6764 = vst [vmem:[#allocation32_spill] sm:$0xff] %v4857_v0  ;;  %v658_v48 = vld [vmem:[%s4400_s22 + $0xc0] sm:$0xff]  ;;  %v6613_v55 = vmax.f32 %v4857_v0, 0.0 }
  0xd5   : > { %3720 = vmatmul.msk.f32.gmra.mxu3 %vm771_vm1, %v4847_v22  ;;  %3787 = vmatmul.msk.f32.gmra.mxu2 %vm771_vm1, %v4850_v36  ;;  %v694_v14 = vmul.f32 %v4391_v1, %v658_v48 }
  0xd6   : > { %v1031_v63 = vadd.f32 %v4700_v62, %v995_v24  ;;  %3697 = vmatmul.msk.f32.gmra.mxu0 %vm771_vm1, %v6605_v30  ;;  %v1823_v24 = vrot.slane %v4838_v49, 2 }
  0xd8   : > { %v1063_v50 = vmax.f32 %v1031_v63, 0.0 }
  0xd9   : > { %v4864_v40 = vld [vmem:[#allocation2 + $0x50] sm:$0xff] }
  0xda   : > { %1096 = vst.msk [vmem:[#allocation2 + $0x61] sm:$0xff] %vm771_vm1, %v1063_v50  ;;  %3755 = vmatmul.msk.f32.gmra.mxu1 %vm771_vm1, %v4864_v40  ;;  %v1381_v32 = vrot.slane %v4864_v40, 1  ;;  %v1824_v63 = vrot.slane %v4864_v40, 2  ;;  %v1272_v50 = vld [vmem:[#allocation2 + $0x58] sm:$0x3] }
  0xdb   : > { %v910_v30 = vpop.f32.mrf.mxu0  ;;  %v1826_v35 = vrot.slane %v1272_v50, 2 }
  0xdc   : > { %v996_v61 = vmul.f32 %v4693_v59, %v910_v30  ;;  %v4877_v47 = vsel %vm1364_vm3, %v1380_v38, %v1381_v32  ;;  %v4880_v48 = vsel %vm1807_vm4, %v1823_v24, %v1824_v63  ;;  %v4891_v30 = vadd.f32 %v4405_v2, %v694_v14  ;;  %v659_v38 = vld [vmem:[%s4400_s22 + $0xc8] sm:$0xff] }
  0xdd   : > { %6765 = vst [vmem:[#allocation33_spill] sm:$0xff] %v4880_v48  ;;  %3721 = vmatmul.msk.f32.gmra.mxu3 %vm771_vm1, %v4877_v47  ;;  %3788 = vmatmul.msk.f32.gmra.mxu2 %vm771_vm1, %v4880_v48  ;;  %v1383_v24 = vrot.slane %v1272_v50, 1  ;;  %v695_v27 = vmul.f32 %v4391_v1, %v659_v38 }
  0xde   : > { %v1032_v43 = vadd.f32 %v4700_v62, %v996_v61  ;;  %3698 = vmatmul.msk.f32.gmra.mxu0 %vm771_vm1, %v6613_v55  ;;  %6766 = vst [vmem:[#allocation34_spill] sm:$0xff] %v4891_v30  ;;  %v6615_v61 = vmax.f32 %v4891_v30, 0.0 }
  0xdf   : > { %v4903_v23 = vsel %vm1364_vm3, %v1381_v32, %v1383_v24 }
  0xe0   : > { %v1064_v39 = vmax.f32 %v1032_v43, 0.0  ;;  %v4906_v43 = vsel %vm1807_vm4, %v1824_v63, %v1826_v35 }
  0xe1   : > { %v4894_v31 = vld [vmem:[#allocation2 + $0x60] sm:$0xff]  ;;  %6767 = vst [vmem:[#allocation35_spill] sm:$0xff] %v4906_v43 }
  0xe2   : > { %1097 = vst.msk [vmem:[#allocation2 + $0x69] sm:$0xff] %vm771_vm1, %v1064_v39  ;;  %3756 = vmatmul.msk.f32.gmra.mxu1 %vm771_vm1, %v4894_v31  ;;  %v4913_v39 = vadd.f32 %v4405_v2, %v695_v27  ;;  %v1385_v27 = vrot.slane %v4894_v31, 1 }
  0xe3   : > { %v913_v55 = vpop.f32.mrf.mxu0 }
  0xe4   : > { %v997_v14 = vmul.f32 %v4693_v59, %v913_v55  ;;  %6768 = vst [vmem:[#allocation36_spill] sm:$0xff] %v4913_v39  ;;  %v660_v55 = vld [vmem:[%s4400_s22 + $0xd0] sm:$0xff]  ;;  %v6623_v35 = vmax.f32 %v4913_v39, 0.0 }
  0xe5   : > { %3722 = vmatmul.msk.f32.gmra.mxu3 %vm771_vm1, %v4903_v23  ;;  %3789 = vmatmul.msk.f32.gmra.mxu2 %vm771_vm1, %v4906_v43  ;;  %v696_v63 = vmul.f32 %v4391_v1, %v660_v55 }
  0xe6   : > { %v1033_v50 = vadd.f32 %v4700_v62, %v997_v14  ;;  %3699 = vmatmul.msk.f32.gmra.mxu0 %vm771_vm1, %v6615_v61  ;;  %v1828_v14 = vrot.slane %v4894_v31, 2 }
  0xe8   : > { %v1065_v32 = vmax.f32 %v1033_v50, 0.0 }
  0xe9   : > { %v4920_v38 = vld [vmem:[#allocation2 + $0x68] sm:$0xff] }
  0xea   : > { %1098 = vst.msk [vmem:[#allocation2 + $0x79] sm:$0xff] %vm771_vm1, %v1065_v32  ;;  %3757 = vmatmul.msk.f32.gmra.mxu1 %vm771_vm1, %v4920_v38  ;;  %v1386_v24 = vrot.slane %v4920_v38, 1  ;;  %v1829_v50 = vrot.slane %v4920_v38, 2  ;;  %v1275_v32 = vld [vmem:[#allocation2 + $0x70] sm:$0x3] }
  0xeb   : > { %v916_v61 = vpop.f32.mrf.mxu0  ;;  %v1831_v30 = vrot.slane %v1275_v32, 2 }
  0xec   : > { %v998_v19 = vmul.f32 %v4693_v59, %v916_v61  ;;  %v4933_v15 = vsel %vm1364_vm3, %v1385_v27, %v1386_v24  ;;  %v4936_v55 = vsel %vm1807_vm4, %v1828_v14, %v1829_v50  ;;  %v4947_v61 = vadd.f32 %v4405_v2, %v696_v63  ;;  %v661_v27 = vld [vmem:[%s4400_s22 + $0xd8] sm:$0xff] }
  0xed   : > { %6769 = vst [vmem:[#allocation37_spill] sm:$0xff] %v4936_v55  ;;  %3723 = vmatmul.msk.f32.gmra.mxu3 %vm771_vm1, %v4933_v15  ;;  %3790 = vmatmul.msk.f32.gmra.mxu2 %vm771_vm1, %v4936_v55  ;;  %v1388_v14 = vrot.slane %v1275_v32, 1  ;;  %v697_v44 = vmul.f32 %v4391_v1, %v661_v27 }
  0xee   : > { %v1034_v11 = vadd.f32 %v4700_v62, %v998_v19  ;;  %3700 = vmatmul.msk.f32.gmra.mxu0 %vm771_vm1, %v6623_v35  ;;  %6770 = vst [vmem:[#allocation38_spill] sm:$0xff] %v4947_v61  ;;  %v6625_v19 = vmax.f32 %v4947_v61, 0.0 }
  0xef   : > { %v4959_v39 = vsel %vm1364_vm3, %v1386_v24, %v1388_v14  ;;  %v1169_v24 = vpop.f32.mrf.mxu1 }
  0xf0   : > { %v1066_v8 = vmax.f32 %v1034_v11, 0.0  ;;  %v4962_v11 = vsel %vm1807_vm4, %v1829_v50, %v1831_v30 }
  0xf1   : > { %v4950_v0 = vld [vmem:[#allocation2 + $0x78] sm:$0xff]  ;;  %6771 = vst [vmem:[#allocation39_spill] sm:$0xff] %v4962_v11 }
  0xf2   : > { %1099 = vst.msk [vmem:[#allocation2 + $0x81] sm:$0xff] %vm771_vm1, %v1066_v8  ;;  %3758 = vmatmul.msk.f32.gmra.mxu1 %vm771_vm1, %v4950_v0  ;;  %v4969_v8 = vadd.f32 %v4405_v2, %v697_v44  ;;  %v1390_v44 = vrot.slane %v4950_v0, 1 }
  0xf3   : > { %v919_v35 = vpop.f32.mrf.mxu0 }
  0xf4   : > { %v999_v63 = vmul.f32 %v4693_v59, %v919_v35  ;;  %6772 = vst [vmem:[#allocation40_spill] sm:$0xff] %v4969_v8  ;;  %v662_v35 = vld [vmem:[%s4400_s22 + $0xe0] sm:$0xff]  ;;  %v6774_v10 = vmax.f32 %v4969_v8, 0.0 }
  0xf5   : > { %3724 = vmatmul.msk.f32.gmra.mxu3 %vm771_vm1, %v4959_v39  ;;  %3791 = vmatmul.msk.f32.gmra.mxu2 %vm771_vm1, %v4962_v11  ;;  %v698_v14 = vmul.f32 %v4391_v1, %v662_v35 }
  0xf6   : > { %v1035_v32 = vadd.f32 %v4700_v62, %v999_v63  ;;  %3701 = vmatmul.msk.f32.gmra.mxu0 %vm771_vm1, %v6625_v19  ;;  %v1833_v19 = vrot.slane %v4950_v0, 2 }
  0xf8   : > { %v1067_v27 = vmax.f32 %v1035_v32, 0.0 }
  0xf9   : > { %v4976_v30 = vld [vmem:[#allocation2 + $0x80] sm:$0xff] }
  0xfa   : > { %1100 = vst.msk [vmem:[#allocation2 + $0x91] sm:$0xff] %vm771_vm1, %v1067_v27  ;;  %3759 = vmatmul.msk.f32.gmra.mxu1 %vm771_vm1, %v4976_v30  ;;  %v1391_v63 = vrot.slane %v4976_v30, 1  ;;  %v1834_v32 = vrot.slane %v4976_v30, 2  ;;  %v1278_v27 = vld [vmem:[#allocation2 + $0x88] sm:$0x3] }
  0xfb   : > { %v922_v24 = vpop.f32.mrf.mxu0  ;;  %v1836_v54 = vrot.slane %v1278_v27, 2 }
  0xfc   : > { %v1000_v61 = vmul.f32 %v4693_v59, %v922_v24  ;;  %v4989_v50 = vsel %vm1364_vm3, %v1390_v44, %v1391_v63  ;;  %v4992_v35 = vsel %vm1807_vm4, %v1833_v19, %v1834_v32  ;;  %v5003_v24 = vadd.f32 %v4405_v2, %v698_v14  ;;  %v663_v44 = vld [vmem:[%s4400_s22 + $0xe8] sm:$0xff] }
  0xfd   : > { %6773 = vst [vmem:[#allocation41_spill] sm:$0xff] %v4992_v35  ;;  %3725 = vmatmul.msk.f32.gmra.mxu3 %vm771_vm1, %v4989_v50  ;;  %3792 = vmatmul.msk.f32.gmra.mxu2 %vm771_vm1, %v4992_v35  ;;  %v1393_v19 = vrot.slane %v1278_v27, 1  ;;  %v699_v57 = vmul.f32 %v4391_v1, %v663_v44 }
  0xfe   : > { %v1036_v4 = vadd.f32 %v4700_v62, %v1000_v61  ;;  %3702 = vmatmul.msk.f32.gmra.mxu0 %vm771_vm1, %v6774_v10  ;;  %6775 = vst [vmem:[#allocation42_spill] sm:$0xff] %v5003_v24  ;;  %v6634_v61 = vmax.f32 %v5003_v24, 0.0  ;;  %v1239_v24 = vpop.f32.mrf.mxu3 }
  0xff   : > { %v5015_v8 = vsel %vm1364_vm3, %v1391_v63, %v1393_v19  ;;  %v664_v63 = vld [vmem:[%s4400_s22 + $0xf0] sm:$0xff]  ;;  %v3814_v24 = vld [vmem:[%s6587_s8 + $0xc] sm:$0xf] }
 0x100   : > { %v1068_v18 = vmax.f32 %v1036_v4, 0.0  ;;  %v5018_v4 = vsel %vm1807_vm4, %v1834_v32, %v1836_v54  ;;  %v700_v32 = vmul.f32 %v4391_v1, %v664_v63  ;;  %3815 = vmatpush.msk.msra.mxu0 %vm868_vm0, %v3814_v24 }
 0x101   : > { %v5006_v16 = vld [vmem:[#allocation2 + $0x90] sm:$0xff]  ;;  %6776 = vst [vmem:[#allocation43_spill] sm:$0xff] %v5018_v4 }
 0x102   : > { %1101 = vst.msk [vmem:[#allocation2 + $0x99] sm:$0xff] %vm771_vm1, %v1068_v18  ;;  %3760 = vmatmul.msk.f32.gmra.mxu1 %vm771_vm1, %v5006_v16  ;;  %v5025_v18 = vadd.f32 %v4405_v2, %v699_v57  ;;  %v1395_v57 = vrot.slane %v5006_v16, 1 }
 0x103   : > { %v925_v10 = vpop.f32.mrf.mxu0 }
 0x104   : > { %v1001_v14 = vmul.f32 %v4693_v59, %v925_v10  ;;  %6777 = vst [vmem:[#allocation44_spill] sm:$0xff] %v5025_v18  ;;  %v1236_v10 = vpop.f32.mrf.mxu2 }
 0x105   : > { %3726 = vmatmul.msk.f32.gmra.mxu3 %vm771_vm1, %v5015_v8  ;;  %3793 = vmatmul.msk.f32.gmra.mxu2 %vm771_vm1, %v5018_v4 }
 0x106   : > { %v1037_v27 = vadd.f32 %v4700_v62, %v1001_v14  ;;  %3703 = vmatmul.msk.f32.gmra.mxu0 %vm771_vm1, %v6634_v61  ;;  %v1838_v61 = vrot.slane %v5006_v16, 2 }
 0x108   : > { %v1069_v44 = vmax.f32 %v1037_v27, 0.0 }
 0x109   : > { %v5032_v19 = vld [vmem:[#allocation2 + $0x98] sm:$0xff]  ;;  %v1281_v10 = vld [vmem:[#allocation2 + $0xa0] sm:$0x3] }
 0x10a   : > { %1102 = vst.msk [vmem:[#allocation2 + $0xa9] sm:$0xff] %vm771_vm1, %v1069_v44  ;;  %3761 = vmatmul.msk.f32.gmra.mxu1 %vm771_vm1, %v5032_v19  ;;  %v1396_v14 = vrot.slane %v5032_v19, 1  ;;  %v1839_v27 = vrot.slane %v5032_v19, 2  ;;  %v1398_v3 = vrot.slane %v1281_v10, 1  ;;  %v1841_v53 = vrot.slane %v1281_v10, 2 }
 0x10b   : > { %v928_v52 = vpop.f32.mrf.mxu0 }
 0x10c   : > { %v1002_v54 = vmul.f32 %v4693_v59, %v928_v52  ;;  %v5045_v63 = vsel %vm1364_vm3, %v1395_v57, %v1396_v14  ;;  %v5048_v44 = vsel %vm1807_vm4, %v1838_v61, %v1839_v27  ;;  %v6779_v52 = vmax.f32 %v5025_v18, 0.0  ;;  %v665_v57 = vld [vmem:[%s4400_s22 + $0xf8] sm:$0xff]  ;;  %v1974_v29 = vpop.f32.mrf.mxu2  ;;  %s3535_s22 = sshll.u32 %s6395_s17, 4  ;;  %s3536_s22 = int_to_ptr.vmem [resolvable:$true] %s3535_s22 }
 0x10d   : > { %6778 = vst [vmem:[#allocation45_spill] sm:$0xff] %v5048_v44  ;;  %3727 = vmatmul.msk.f32.gmra.mxu3 %vm771_vm1, %v5045_v63  ;;  %3794 = vmatmul.msk.f32.gmra.mxu2 %vm771_vm1, %v5048_v44  ;;  %v5062_v61 = vadd.f32 %v4405_v2, %v700_v32  ;;  %v701_v41 = vmul.f32 %v4391_v1, %v665_v57  ;;  %v1711_v57 = vpop.f32.mrf.mxu1 }
 0x10e   : > { %v1038_v46 = vadd.f32 %v4700_v62, %v1002_v54  ;;  %3704 = vmatmul.msk.f32.gmra.mxu0 %vm771_vm1, %v6779_v52  ;;  %v5075_v18 = vsel %vm1364_vm3, %v1396_v14, %v1398_v3 }
 0x10f   : > { %6780 = vst [vmem:[#allocation46_spill] sm:$0xff] %v5062_v61  ;;  %v6644_v54 = vmax.f32 %v5062_v61, 0.0  ;;  %v5085_v1 = vadd.f32 %v4405_v2, %v701_v41 }
 0x110   : > { %v1070_v34 = vmax.f32 %v1038_v46, 0.0  ;;  %v5078_v46 = vsel %vm1807_vm4, %v1839_v27, %v1841_v53 }
 0x111   : > { %v5066_v45 = vld [vmem:[#allocation2 + $0xa8] sm:$0xff]  ;;  %6781 = vst [vmem:[#allocation47_spill] sm:$0xff] %v5078_v46  ;;  %v6785_v61 = vmax.f32 %v5085_v1, 0.0 }
 0x112   : > { %1103 = vst.msk [vmem:[#allocation2 + $0xb1] sm:$0xff] %vm771_vm1, %v1070_v34  ;;  %3762 = vmatmul.msk.f32.gmra.mxu1 %vm771_vm1, %v5066_v45  ;;  %v1400_v27 = vrot.slane %v5066_v45, 1  ;;  %v1843_v41 = vrot.slane %v5066_v45, 2 }
 0x113   : > { %v931_v52 = vpop.f32.mrf.mxu0  ;;  %6782 = vst [vmem:[#allocation48_spill] sm:$0xff] %v5085_v1 }
 0x114   : > { %v1003_v32 = vmul.f32 %v4693_v59, %v931_v52  ;;  %v3916_v52 = vld [vmem:[%s6587_s8 + $0x18] sm:$0xf] }
 0x115   : > { %3728 = vmatmul.msk.f32.gmra.mxu3 %vm771_vm1, %v5075_v18  ;;  %3795 = vmatmul.msk.f32.gmra.mxu2 %vm771_vm1, %v5078_v46 }
 0x116   : > { %v1039_v34 = vadd.f32 %v4700_v62, %v1003_v32  ;;  %3705 = vmatmul.msk.f32.gmra.mxu0 %vm771_vm1, %v6644_v54  ;;  %3917 = vmatpush.msk.msra.mxu2 %vm868_vm0, %v3916_v52  ;;  %v1137_v52 = vmax.f32 %v4528_v60, 0.0  ;;  %v1714_v60 = vpop.f32.mrf.mxu1 }
 0x118   : > { %v1071_v3 = vmax.f32 %v1039_v34, 0.0 }
 0x119   : > { %v5091_v14 = vld [vmem:[#allocation2 + $0xb0] sm:$0xff]  ;;  %v1284_v54 = vld [vmem:[#allocation2 + $0xb8] sm:$0x3] }
 0x11a   : > { %1104 = vst.msk [vmem:[#allocation2 + $0xc1] sm:$0xff] %vm771_vm1, %v1071_v3  ;;  %3763 = vmatmul.msk.f32.gmra.mxu1 %vm771_vm1, %v5091_v14  ;;  %v1401_v2 = vrot.slane %v5091_v14, 1  ;;  %v1844_v10 = vrot.slane %v5091_v14, 2  ;;  %v1846_v37 = vrot.slane %v1284_v54, 2 }
 0x11b   : > { %v934_v24 = vpop.f32.mrf.mxu0 }
 0x11c   : > { %v1004_v32 = vmul.f32 %v4693_v59, %v934_v24  ;;  %v5106_v34 = vsel %vm1364_vm3, %v1400_v27, %v1401_v2  ;;  %v5109_v3 = vsel %vm1807_vm4, %v1843_v41, %v1844_v10  ;;  %v1403_v24 = vrot.slane %v1284_v54, 1 }
 0x11d   : > { %6783 = vst [vmem:[#allocation49_spill] sm:$0xff] %v5106_v34  ;;  %3729 = vmatmul.msk.f32.gmra.mxu3 %vm771_vm1, %v5106_v34  ;;  %3796 = vmatmul.msk.f32.gmra.mxu2 %vm771_vm1, %v5109_v3 }
 0x11e   : > { %6784 = vst [vmem:[#allocation50_spill] sm:$0xff] %v5109_v3  ;;  %v1040_v53 = vadd.f32 %v4700_v62, %v1004_v32  ;;  %3706 = vmatmul.msk.f32.gmra.mxu0 %vm771_vm1, %v6785_v61  ;;  %v3882_v32 = vld [vmem:[%s6587_s8 + $0x14] sm:$0xf]  ;;  %v5132_v54 = vsel %vm1364_vm3, %v1401_v2, %v1403_v24 }
 0x11f   : > { %3883 = vmatpush.msk.msra.mxu1 %vm868_vm0, %v3882_v32  ;;  %6786 = vst [vmem:[#allocation51_spill] sm:$0xff] %v5132_v54 }
 0x120   : > { %v1072_v27 = vmax.f32 %v1040_v53, 0.0  ;;  %v5135_v53 = vsel %vm1807_vm4, %v1844_v10, %v1846_v37 }
 0x121   : > { %v5120_v41 = vld [vmem:[#allocation2 + $0xc0] sm:$0xff]  ;;  %6787 = vst [vmem:[#allocation52_spill] sm:$0xff] %v5135_v53 }
 0x122   : > { %1105 = vst.msk [vmem:[#allocation2 + $0xc9] sm:$0xff] %vm771_vm1, %v1072_v27  ;;  %3764 = vmatmul.msk.f32.gmra.mxu1 %vm771_vm1, %v5120_v41  ;;  %v1848_v2 = vrot.slane %v5120_v41, 2 }
 0x123   : > { %v937_v33 = vpop.f32.mrf.mxu0 }
 0x124   : > { %v1005_v61 = vmul.f32 %v4693_v59, %v937_v33  ;;  %v1405_v33 = vrot.slane %v5120_v41, 1 }
 0x125   : > { %3730 = vmatmul.msk.f32.gmra.mxu3 %vm771_vm1, %v5132_v54  ;;  %3797 = vmatmul.msk.f32.gmra.mxu2 %vm771_vm1, %v5135_v53 }
 0x126   : > { %v1041_v27 = vadd.f32 %v4700_v62, %v1005_v61  ;;  %3708 = vmatmul.msk.f32.vlgmr.msrb.gmra.mxu0 %vm771_vm1, %v1137_v52 }
 0x128   : > { %v1073_v32 = vmax.f32 %v1041_v27, 0.0 }
 0x129   : > { %v5143_v1 = vld [vmem:[#allocation2 + $0xc8] sm:$0xff]  ;;  %v1287_v25 = vld [vmem:[#allocation2 + $0xd0] sm:$0x3] }
 0x12a   : > { %1106 = vst.msk [vmem:[#allocation2 + $0xd9] sm:$0xff] %vm771_vm1, %v1073_v32  ;;  %3765 = vmatmul.msk.f32.gmra.mxu1 %vm771_vm1, %v5143_v1  ;;  %v1406_v37 = vrot.slane %v5143_v1, 1  ;;  %v1849_v10 = vrot.slane %v5143_v1, 2  ;;  %v1531_v32 = vpop.f32.mrf.mxu3  ;;  %v1851_v9 = vrot.slane %v1287_v25, 2 }
 0x12b   : > { %v940_v24 = vpop.f32.mrf.mxu0 }
 0x12c   : > { %v1006_v61 = vmul.f32 %v4693_v59, %v940_v24  ;;  %v5154_v52 = vsel %vm1364_vm3, %v1405_v33, %v1406_v37  ;;  %v5157_v27 = vsel %vm1807_vm4, %v1848_v2, %v1849_v10  ;;  %v1712_v24 = vadd.f32 %v1711_v57, %v1531_v32 }
 0x12d   : > { %6788 = vst [vmem:[#allocation53_spill] sm:$0xff] %v5154_v52  ;;  %3731 = vmatmul.msk.f32.gmra.mxu3 %vm771_vm1, %v5154_v52  ;;  %3798 = vmatmul.msk.f32.gmra.mxu2 %vm771_vm1, %v5157_v27  ;;  %v1408_v2 = vrot.slane %v1287_v25, 1 }
 0x12e   : > { %6789 = vst [vmem:[#allocation54_spill] sm:$0xff] %v5157_v27  ;;  %v1042_v21 = vadd.f32 %v4700_v62, %v1006_v61  ;;  %3816 = vmatmul.msk.f32.vlgmr.msra.gmra.mxu0 %vm771_vm1, %v4734_v7  ;;  %v5166_v13 = vadd.f32 %v1974_v29, %v1712_v24  ;;  %v5178_v7 = vsel %vm1807_vm4, %v1849_v10, %v1851_v9  ;;  %v1977_v29 = vpop.f32.mrf.mxu2 }
 0x12f   : > { %v1717_v33 = vpop.f32.mrf.mxu1  ;;  %v5175_v54 = vsel %vm1364_vm3, %v1406_v37, %v1408_v2  ;;  %6792 = vst [vmem:[#allocation57_spill] sm:$0xff] %v5178_v7 }
 0x130   : > { %v1074_v17 = vmax.f32 %v1042_v21, 0.0  ;;  %6790 = vst [vmem:[#allocation55_spill] sm:$0xff] %v5166_v13 }
 0x131   : > { %v5168_v6 = vld [vmem:[#allocation2 + $0xd8] sm:$0xff]  ;;  %6791 = vst [vmem:[#allocation56_spill] sm:$0xff] %v5175_v54 }
 0x132   : > { %1107 = vst.msk [vmem:[#allocation2 + $0xe1] sm:$0xff] %vm771_vm1, %v1074_v17  ;;  %3766 = vmatmul.msk.f32.gmra.mxu1 %vm771_vm1, %v5168_v6  ;;  %v1534_v21 = vpop.f32.mrf.mxu3  ;;  %v1410_v10 = vrot.slane %v5168_v6, 1  ;;  %v1853_v24 = vrot.slane %v5168_v6, 2 }
 0x133   : > { %v943_v52 = vpop.f32.mrf.mxu0  ;;  %v1715_v25 = vadd.f32 %v1714_v60, %v1534_v21 }
 0x134   : > { %v1007_v61 = vmul.f32 %v4693_v59, %v943_v52 }
 0x135   : > { %3732 = vmatmul.msk.f32.gmra.mxu3 %vm771_vm1, %v5175_v54  ;;  %3799 = vmatmul.msk.f32.gmra.mxu2 %vm771_vm1, %v5178_v7  ;;  %v5187_v52 = vadd.f32 %v1977_v29, %v1715_v25 }
 0x136   : > { %v1043_v17 = vadd.f32 %v4700_v62, %v1007_v61  ;;  %3817 = vmatmul.msk.f32.gmra.mxu0 %vm771_vm1, %v4752_v26 }
 0x137   : > { %v1720_v57 = vpop.f32.mrf.mxu1  ;;  %6793 = vst [vmem:[#allocation58_spill] sm:$0xff] %v5187_v52 }
 0x138   : > { %v1075_v37 = vmax.f32 %v1043_v17, 0.0 }
 0x139   : > { %v5189_v9 = vld [vmem:[#allocation2 + $0xe0] sm:$0xff]  ;;  %v1290_v17 = vld [vmem:[#allocation2 + $0xe8] sm:$0x3] }
 0x13a   : > { %1108 = vst.msk [vmem:[#allocation2 + $0xf1] sm:$0xff] %vm771_vm1, %v1075_v37  ;;  %3767 = vmatmul.msk.f32.gmra.mxu1 %vm771_vm1, %v5189_v9  ;;  %v1411_v32 = vrot.slane %v5189_v9, 1  ;;  %v1854_v26 = vrot.slane %v5189_v9, 2  ;;  %v1413_v52 = vrot.slane %v1290_v17, 1  ;;  %v1856_v13 = vrot.slane %v1290_v17, 2 }
 0x13b   : > { %v946_v60 = vpop.f32.mrf.mxu0 }
 0x13c   : > { %v1008_v2 = vmul.f32 %v4693_v59, %v946_v60  ;;  %v5200_v61 = vsel %vm1364_vm3, %v1410_v10, %v1411_v32  ;;  %v5203_v21 = vsel %vm1807_vm4, %v1853_v24, %v1854_v26 }
 0x13d   : > { %6794 = vst [vmem:[#allocation59_spill] sm:$0xff] %v5200_v61  ;;  %3733 = vmatmul.msk.f32.gmra.mxu3 %vm771_vm1, %v5200_v61  ;;  %3800 = vmatmul.msk.f32.gmra.mxu2 %vm771_vm1, %v5203_v21 }
 0x13e   : > { %6795 = vst [vmem:[#allocation60_spill] sm:$0xff] %v5203_v21  ;;  %v1044_v25 = vadd.f32 %v4700_v62, %v1008_v2  ;;  %3818 = vmatmul.msk.f32.gmra.mxu0 %vm771_vm1, %v4782_v28  ;;  %v5221_v28 = vsel %vm1364_vm3, %v1411_v32, %v1413_v52 }
 0x13f   : > { %v1723_v29 = vpop.f32.mrf.mxu1  ;;  %6797 = vst [vmem:[#allocation62_spill] sm:$0xff] %v5221_v28 }
 0x140   : > { %v1076_v37 = vmax.f32 %v1044_v25, 0.0  ;;  %v1537_v60 = vpop.f32.mrf.mxu3  ;;  %v1980_v10 = vpop.f32.mrf.mxu2  ;;  %v5224_v25 = vsel %vm1807_vm4, %v1854_v26, %v1856_v13 }
 0x141   : > { %v1718_v24 = vadd.f32 %v1717_v33, %v1537_v60  ;;  %v5212_v54 = vld [vmem:[#allocation2 + $0xf0] sm:$0xff]  ;;  %6798 = vst [vmem:[#allocation63_spill] sm:$0xff] %v5224_v25 }
 0x142   : > { %1109 = vst.msk [vmem:[#allocation2 + $0xf9] sm:$0xff] %vm771_vm1, %v1076_v37  ;;  %3768 = vmatmul.msk.f32.gmra.mxu1 %vm771_vm1, %v5212_v54  ;;  %v1415_v13 = vrot.slane %v5212_v54, 1 }
 0x143   : > { %v5217_v61 = vadd.f32 %v1980_v10, %v1718_v24  ;;  %v949_v2 = vpop.f32.mrf.mxu0 }
 0x144   : > { %v1009_v21 = vmul.f32 %v4693_v59, %v949_v2 }
 0x145   : > { %6796 = vst [vmem:[#allocation61_spill] sm:$0xff] %v5217_v61  ;;  %3734 = vmatmul.msk.f32.gmra.mxu3 %vm771_vm1, %v5221_v28  ;;  %3801 = vmatmul.msk.f32.gmra.mxu2 %vm771_vm1, %v5224_v25 }
 0x146   : > { %v1045_v33 = vadd.f32 %v4700_v62, %v1009_v21  ;;  %3819 = vmatmul.msk.f32.gmra.mxu0 %vm771_vm1, %v4808_v20  ;;  %v1858_v21 = vrot.slane %v5212_v54, 2 }
 0x147   : > { %v1726_v17 = vpop.f32.mrf.mxu1 }
 0x148   : > { %v1077_v37 = vmax.f32 %v1045_v33, 0.0  ;;  %v1540_v60 = vpop.f32.mrf.mxu3  ;;  %v1983_v10 = vpop.f32.mrf.mxu2 }
 0x149   : > { %v1721_v52 = vadd.f32 %v1720_v57, %v1540_v60  ;;  %v5233_v32 = vld [vmem:[#allocation2 + $0xf8] sm:$0xff]  ;;  %v1293_v60 = vld [vmem:[#allocation2 + $0x100] sm:$0x3] }
 0x14a   : > { %1110 = vst.msk [vmem:[#allocation2 + $0x109] sm:$0xff] %vm771_vm1, %v1077_v37  ;;  %3769 = vmatmul.msk.f32.gmra.mxu1 %vm771_vm1, %v5233_v32  ;;  %v1416_v26 = vrot.slane %v5233_v32, 1  ;;  %v1859_v20 = vrot.slane %v5233_v32, 2  ;;  %v1861_v28 = vrot.slane %v1293_v60, 2 }
 0x14b   : > { %v5242_v24 = vadd.f32 %v1983_v10, %v1721_v52  ;;  %v952_v2 = vpop.f32.mrf.mxu0 }
 0x14c   : > { %v1010_v57 = vmul.f32 %v4693_v59, %v952_v2  ;;  %v5246_v33 = vsel %vm1364_vm3, %v1415_v13, %v1416_v26  ;;  %v5249_v37 = vsel %vm1807_vm4, %v1858_v21, %v1859_v20 }
 0x14d   : > { %6799 = vst [vmem:[#allocation64_spill] sm:$0xff] %v5242_v24  ;;  %3735 = vmatmul.msk.f32.gmra.mxu3 %vm771_vm1, %v5246_v33  ;;  %3802 = vmatmul.msk.f32.gmra.mxu2 %vm771_vm1, %v5249_v37  ;;  %v1418_v24 = vrot.slane %v1293_v60, 1 }
 0x14e   : > { %6800 = vst [vmem:[#allocation65_spill] sm:$0xff] %v5246_v33  ;;  %v1046_v61 = vadd.f32 %v4700_v62, %v1010_v57  ;;  %3820 = vmatmul.msk.f32.gmra.mxu0 %vm771_vm1, %v4838_v49 }
 0x14f   : > { %6801 = vst [vmem:[#allocation66_spill] sm:$0xff] %v5249_v37  ;;  %v1729_v10 = vpop.f32.mrf.mxu1  ;;  %v5267_v49 = vsel %vm1364_vm3, %v1416_v26, %v1418_v24 }
 0x150   : > { %v1078_v52 = vmax.f32 %v1046_v61, 0.0  ;;  %v1543_v2 = vpop.f32.mrf.mxu3  ;;  %v1986_v13 = vpop.f32.mrf.mxu2  ;;  %6803 = vst [vmem:[#allocation68_spill] sm:$0xff] %v5267_v49  ;;  %v5270_v61 = vsel %vm1807_vm4, %v1859_v20, %v1861_v28 }
 0x151   : > { %v1724_v21 = vadd.f32 %v1723_v29, %v1543_v2  ;;  %v5258_v25 = vld [vmem:[#allocation2 + $0x108] sm:$0xff]  ;;  %6804 = vst [vmem:[#allocation69_spill] sm:$0xff] %v5270_v61 }
 0x152   : > { %1111 = vst.msk [vmem:[#allocation2 + $0x111] sm:$0xff] %vm771_vm1, %v1078_v52  ;;  %3770 = vmatmul.msk.f32.gmra.mxu1 %vm771_vm1, %v5258_v25  ;;  %v1420_v28 = vrot.slane %v5258_v25, 1 }
 0x153   : > { %v5263_v33 = vadd.f32 %v1986_v13, %v1724_v21  ;;  %v955_v57 = vpop.f32.mrf.mxu0 }
 0x154   : > { %v1011_v37 = vmul.f32 %v4693_v59, %v955_v57 }
 0x155   : > { %6802 = vst [vmem:[#allocation67_spill] sm:$0xff] %v5263_v33  ;;  %3736 = vmatmul.msk.f32.gmra.mxu3 %vm771_vm1, %v5267_v49  ;;  %3803 = vmatmul.msk.f32.gmra.mxu2 %vm771_vm1, %v5270_v61 }
 0x156   : > { %v1047_v29 = vadd.f32 %v4700_v62, %v1011_v37  ;;  %3821 = vmatmul.msk.f32.gmra.mxu0 %vm771_vm1, %v4864_v40  ;;  %v1863_v37 = vrot.slane %v5258_v25, 2 }
 0x157   : > { %v1732_v60 = vpop.f32.mrf.mxu1 }
 0x158   : > { %v1079_v52 = vmax.f32 %v1047_v29, 0.0  ;;  %v1546_v2 = vpop.f32.mrf.mxu3  ;;  %v1989_v13 = vpop.f32.mrf.mxu2 }
 0x159   : > { %v1727_v26 = vadd.f32 %v1726_v17, %v1546_v2  ;;  %v5279_v24 = vld [vmem:[#allocation2 + $0x110] sm:$0xff]  ;;  %v1296_v2 = vld [vmem:[#allocation2 + $0x118] sm:$0x3] }
 0x15a   : > { %1112 = vst.msk [vmem:[#allocation2 + $0x121] sm:$0xff] %vm771_vm1, %v1079_v52  ;;  %3771 = vmatmul.msk.f32.gmra.mxu1 %vm771_vm1, %v5279_v24  ;;  %v1421_v20 = vrot.slane %v5279_v24, 1  ;;  %v1864_v40 = vrot.slane %v5279_v24, 2  ;;  %v1866_v49 = vrot.slane %v1296_v2, 2 }
 0x15b   : > { %v5288_v21 = vadd.f32 %v1989_v13, %v1727_v26  ;;  %v958_v57 = vpop.f32.mrf.mxu0 }
 0x15c   : > { %v1012_v17 = vmul.f32 %v4693_v59, %v958_v57  ;;  %v5292_v29 = vsel %vm1364_vm3, %v1420_v28, %v1421_v20  ;;  %v5295_v52 = vsel %vm1807_vm4, %v1863_v37, %v1864_v40 }
 0x15d   : > { %6805 = vst [vmem:[#allocation70_spill] sm:$0xff] %v5288_v21  ;;  %3737 = vmatmul.msk.f32.gmra.mxu3 %vm771_vm1, %v5292_v29  ;;  %3804 = vmatmul.msk.f32.gmra.mxu2 %vm771_vm1, %v5295_v52  ;;  %v1423_v21 = vrot.slane %v1296_v2, 1 }
 0x15e   : > { %6806 = vst [vmem:[#allocation71_spill] sm:$0xff] %v5292_v29  ;;  %v1048_v33 = vadd.f32 %v4700_v62, %v1012_v17  ;;  %3822 = vmatmul.msk.f32.gmra.mxu0 %vm771_vm1, %v4894_v31 }
 0x15f   : > { %6807 = vst [vmem:[#allocation72_spill] sm:$0xff] %v5295_v52  ;;  %v1735_v13 = vpop.f32.mrf.mxu1  ;;  %v5313_v31 = vsel %vm1364_vm3, %v1421_v20, %v1423_v21 }
 0x160   : > { %v1080_v26 = vmax.f32 %v1048_v33, 0.0  ;;  %v1549_v57 = vpop.f32.mrf.mxu3  ;;  %v1992_v28 = vpop.f32.mrf.mxu2  ;;  %6809 = vst [vmem:[#allocation74_spill] sm:$0xff] %v5313_v31  ;;  %v5316_v33 = vsel %vm1807_vm4, %v1864_v40, %v1866_v49 }
 0x161   : > { %v1730_v37 = vadd.f32 %v1729_v10, %v1549_v57  ;;  %v5304_v61 = vld [vmem:[#allocation2 + $0x120] sm:$0xff]  ;;  %6810 = vst [vmem:[#allocation75_spill] sm:$0xff] %v5316_v33 }
 0x162   : > { %1113 = vst.msk [vmem:[#allocation2 + $0x129] sm:$0xff] %vm771_vm1, %v1080_v26  ;;  %3772 = vmatmul.msk.f32.gmra.mxu1 %vm771_vm1, %v5304_v61  ;;  %v1425_v49 = vrot.slane %v5304_v61, 1 }
 0x163   : > { %v5309_v29 = vadd.f32 %v1992_v28, %v1730_v37  ;;  %v961_v17 = vpop.f32.mrf.mxu0 }
 0x164   : > { %v1013_v52 = vmul.f32 %v4693_v59, %v961_v17 }
 0x165   : > { %6808 = vst [vmem:[#allocation73_spill] sm:$0xff] %v5309_v29  ;;  %3738 = vmatmul.msk.f32.gmra.mxu3 %vm771_vm1, %v5313_v31  ;;  %3805 = vmatmul.msk.f32.gmra.mxu2 %vm771_vm1, %v5316_v33 }
 0x166   : > { %v1049_v10 = vadd.f32 %v4700_v62, %v1013_v52  ;;  %3823 = vmatmul.msk.f32.gmra.mxu0 %vm771_vm1, %v4920_v38  ;;  %v1868_v52 = vrot.slane %v5304_v61, 2 }
 0x167   : > { %v1738_v2 = vpop.f32.mrf.mxu1 }
 0x168   : > { %v1081_v26 = vmax.f32 %v1049_v10, 0.0  ;;  %v1552_v57 = vpop.f32.mrf.mxu3  ;;  %v1995_v28 = vpop.f32.mrf.mxu2 }
 0x169   : > { %v1733_v20 = vadd.f32 %v1732_v60, %v1552_v57  ;;  %v5325_v21 = vld [vmem:[#allocation2 + $0x128] sm:$0xff]  ;;  %v1299_v57 = vld [vmem:[#allocation2 + $0x130] sm:$0x3] }
 0x16a   : > { %1114 = vst.msk [vmem:[#allocation2 + $0x139] sm:$0xff] %vm771_vm1, %v1081_v26  ;;  %3773 = vmatmul.msk.f32.gmra.mxu1 %vm771_vm1, %v5325_v21  ;;  %v1426_v40 = vrot.slane %v5325_v21, 1  ;;  %v1869_v38 = vrot.slane %v5325_v21, 2 }
 0x16b   : > { %v5334_v37 = vadd.f32 %v1995_v28, %v1733_v20  ;;  %v964_v17 = vpop.f32.mrf.mxu0 }
 0x16c   : > { %v1014_v60 = vmul.f32 %v4693_v59, %v964_v17  ;;  %v5338_v10 = vsel %vm1364_vm3, %v1425_v49, %v1426_v40  ;;  %v5341_v26 = vsel %vm1807_vm4, %v1868_v52, %v1869_v38  ;;  %v1428_v17 = vrot.slane %v1299_v57, 1 }
 0x16d   : > { %6811 = vst [vmem:[#allocation76_spill] sm:$0xff] %v5334_v37  ;;  %3739 = vmatmul.msk.f32.gmra.mxu3 %vm771_vm1, %v5338_v10  ;;  %3806 = vmatmul.msk.f32.gmra.mxu2 %vm771_vm1, %v5341_v26  ;;  %v1871_v37 = vrot.slane %v1299_v57, 2  ;;  %v5376_v57 = vld [vmem:[%s6586_s7] ss:$0 sm:$0xff] }
 0x16e   : > { %6812 = vst [vmem:[#allocation77_spill] sm:$0xff] %v5338_v10  ;;  %v1050_v29 = vadd.f32 %v4700_v62, %v1014_v60  ;;  %3824 = vmatmul.msk.f32.gmra.mxu0 %vm771_vm1, %v4950_v0  ;;  %v5360_v0 = vld [vmem:[%s6585_s6] ss:$0 sm:$0xff]  ;;  %v5364_v60 = vsel %vm1364_vm3, %v1426_v40, %v1428_v17 }
 0x16f   : > { %6813 = vst [vmem:[#allocation78_spill] sm:$0xff] %v5341_v26  ;;  %v1741_v28 = vpop.f32.mrf.mxu1 }
 0x170   : > { %v1082_v59 = vmax.f32 %v1050_v29, 0.0  ;;  %v1555_v20 = vpop.f32.mrf.mxu3  ;;  %v1998_v49 = vpop.f32.mrf.mxu2  ;;  %6815 = vst [vmem:[#allocation80_spill] sm:$0xff] %v5364_v60 }
 0x171   : > { %v1736_v52 = vadd.f32 %v1735_v13, %v1555_v20  ;;  %v5350_v31 = vld [vmem:[#allocation2 + $0x138] sm:$0xff]  ;;  %v5367_v13 = vsel %vm1807_vm4, %v1869_v38, %v1871_v37 }
 0x172   : > { %1115 = vst.msk [vmem:[#allocation2 + $0x141] sm:$0xff] %vm771_vm1, %v1082_v59  ;;  %3774 = vmatmul.msk.f32.gmra.mxu1 %vm771_vm1, %v5350_v31 }
 0x173   : > { %v5355_v10 = vadd.f32 %v1998_v49, %v1736_v52  ;;  %v967_v62 = vpop.f32.mrf.mxu0  ;;  %6816 = vst [vmem:[#allocation81_spill] sm:$0xff] %v5367_v13  ;;  %v1430_v52 = vrot.slane %v5350_v31, 1 }
 0x174   : > { %v1015_v29 = vmul.f32 %v5360_v0, %v967_v62 }
 0x175   : > { %6814 = vst [vmem:[#allocation79_spill] sm:$0xff] %v5355_v10  ;;  %3740 = vmatmul.msk.f32.gmra.mxu3 %vm771_vm1, %v5364_v60  ;;  %3807 = vmatmul.msk.f32.gmra.mxu2 %vm771_vm1, %v5367_v13 }
 0x176   : > { %v1051_v59 = vadd.f32 %v5376_v57, %v1015_v29  ;;  %3825 = vmatmul.msk.f32.gmra.mxu0 %vm771_vm1, %v4976_v30  ;;  %v1873_v29 = vrot.slane %v5350_v31, 2 }
 0x177   : > { %v1744_v40 = vpop.f32.mrf.mxu1 }
 0x178   : > { %v1083_v20 = vmax.f32 %v1051_v59, 0.0  ;;  %v1558_v38 = vpop.f32.mrf.mxu3  ;;  %v2001_v37 = vpop.f32.mrf.mxu2 }
 0x179   : > { %v1739_v49 = vadd.f32 %v1738_v2, %v1558_v38  ;;  %v5381_v17 = vld [vmem:[#allocation2 + $0x140] sm:$0xff]  ;;  %v1302_v60 = vld [vmem:[#allocation2 + $0x148] sm:$0x3] }
 0x17a   : > { %1116 = vst.msk [vmem:[#allocation2 + $0x151] sm:$0xff] %vm771_vm1, %v1083_v20  ;;  %3775 = vmatmul.msk.f32.gmra.mxu1 %vm771_vm1, %v5381_v17  ;;  %v1431_v62 = vrot.slane %v5381_v17, 1  ;;  %v1874_v30 = vrot.slane %v5381_v17, 2  ;;  %v1876_v26 = vrot.slane %v1302_v60, 2 }
 0x17b   : > { %v5390_v10 = vadd.f32 %v2001_v37, %v1739_v49  ;;  %v970_v59 = vpop.f32.mrf.mxu0 }
 0x17c   : > { %v1016_v2 = vmul.f32 %v5360_v0, %v970_v59  ;;  %v5394_v38 = vsel %vm1364_vm3, %v1430_v52, %v1431_v62  ;;  %v5397_v20 = vsel %vm1807_vm4, %v1873_v29, %v1874_v30 }
 0x17d   : > { %6817 = vst [vmem:[#allocation82_spill] sm:$0xff] %v5390_v10  ;;  %3741 = vmatmul.msk.f32.gmra.mxu3 %vm771_vm1, %v5394_v38  ;;  %3808 = vmatmul.msk.f32.gmra.mxu2 %vm771_vm1, %v5397_v20  ;;  %v1433_v10 = vrot.slane %v1302_v60, 1 }
 0x17e   : > { %6818 = vst [vmem:[#allocation83_spill] sm:$0xff] %v5394_v38  ;;  %v1052_v13 = vadd.f32 %v5376_v57, %v1016_v2  ;;  %3826 = vmatmul.msk.f32.gmra.mxu0 %vm771_vm1, %v5006_v16 }
 0x17f   : > { %6819 = vst [vmem:[#allocation84_spill] sm:$0xff] %v5397_v20  ;;  %v1747_v37 = vpop.f32.mrf.mxu1  ;;  %v5415_v7 = vsel %vm1364_vm3, %v1431_v62, %v1433_v10 }
 0x180   : > { %v1084_v49 = vmax.f32 %v1052_v13, 0.0  ;;  %v1561_v59 = vpop.f32.mrf.mxu3  ;;  %v2004_v52 = vpop.f32.mrf.mxu2  ;;  %6821 = vst [vmem:[#allocation86_spill] sm:$0xff] %v5415_v7  ;;  %v5418_v13 = vsel %vm1807_vm4, %v1874_v30, %v1876_v26 }
 0x181   : > { %v1742_v29 = vadd.f32 %v1741_v28, %v1561_v59  ;;  %v5406_v33 = vld [vmem:[#allocation2 + $0x150] sm:$0xff]  ;;  %6822 = vst [vmem:[#allocation87_spill] sm:$0xff] %v5418_v13 }
 0x182   : > { %1117 = vst.msk [vmem:[#allocation2 + $0x159] sm:$0xff] %vm771_vm1, %v1084_v49  ;;  %3776 = vmatmul.msk.f32.gmra.mxu1 %vm771_vm1, %v5406_v33  ;;  %v1435_v26 = vrot.slane %v5406_v33, 1 }
 0x183   : > { %v5411_v38 = vadd.f32 %v2004_v52, %v1742_v29  ;;  %v973_v2 = vpop.f32.mrf.mxu0 }
 0x184   : > { %v1017_v20 = vmul.f32 %v5360_v0, %v973_v2 }
 0x185   : > { %6820 = vst [vmem:[#allocation85_spill] sm:$0xff] %v5411_v38  ;;  %3742 = vmatmul.msk.f32.gmra.mxu3 %vm771_vm1, %v5415_v7  ;;  %3809 = vmatmul.msk.f32.gmra.mxu2 %vm771_vm1, %v5418_v13 }
 0x186   : > { %v1053_v28 = vadd.f32 %v5376_v57, %v1017_v20  ;;  %3827 = vmatmul.msk.f32.gmra.mxu0 %vm771_vm1, %v5032_v19  ;;  %v1878_v20 = vrot.slane %v5406_v33, 2 }
 0x187   : > { %v1750_v60 = vpop.f32.mrf.mxu1 }
 0x188   : > { %v1085_v49 = vmax.f32 %v1053_v28, 0.0  ;;  %v1564_v59 = vpop.f32.mrf.mxu3  ;;  %v2007_v52 = vpop.f32.mrf.mxu2 }
 0x189   : > { %v1745_v10 = vadd.f32 %v1744_v40, %v1564_v59  ;;  %v5427_v62 = vld [vmem:[#allocation2 + $0x158] sm:$0xff]  ;;  %v1305_v38 = vld [vmem:[#allocation2 + $0x160] sm:$0x3] }
 0x18a   : > { %1118 = vst.msk [vmem:[#allocation2 + $0x169] sm:$0xff] %vm771_vm1, %v1085_v49  ;;  %3777 = vmatmul.msk.f32.gmra.mxu1 %vm771_vm1, %v5427_v62  ;;  %v1436_v30 = vrot.slane %v5427_v62, 1  ;;  %v1879_v29 = vrot.slane %v5427_v62, 2  ;;  %v1881_v7 = vrot.slane %v1305_v38, 2 }
 0x18b   : > { %v5436_v2 = vadd.f32 %v2007_v52, %v1745_v10  ;;  %v976_v28 = vpop.f32.mrf.mxu0  ;;  %v3984_v52 = vld [vmem:[%s6587_s8 + $0x20] sm:$0xf] }
 0x18c   : > { %v1018_v40 = vmul.f32 %v5360_v0, %v976_v28  ;;  %v5440_v59 = vsel %vm1364_vm3, %v1435_v26, %v1436_v30  ;;  %v5443_v49 = vsel %vm1807_vm4, %v1878_v20, %v1879_v29  ;;  %3985 = vmatpush.msk.msrb.mxu3 %vm868_vm0, %v3984_v52  ;;  %v3950_v52 = vld [vmem:[%s6587_s8 + $0x1c] sm:$0xf] }
 0x18d   : > { %6823 = vst [vmem:[#allocation88_spill] sm:$0xff] %v5436_v2  ;;  %3743 = vmatmul.msk.f32.gmra.mxu3 %vm771_vm1, %v5440_v59  ;;  %3810 = vmatmul.msk.f32.gmra.mxu2 %vm771_vm1, %v5443_v49 }
 0x18e   : > { %6824 = vst [vmem:[#allocation89_spill] sm:$0xff] %v5440_v59  ;;  %v1054_v10 = vadd.f32 %v5376_v57, %v1018_v40  ;;  %3828 = vmatmul.msk.f32.gmra.mxu0 %vm771_vm1, %v5066_v45  ;;  %v1438_v59 = vrot.slane %v1305_v38, 1  ;;  %v5471_v38 = vsel %vm1807_vm4, %v1879_v29, %v1881_v7 }
 0x18f   : > { %6825 = vst [vmem:[#allocation90_spill] sm:$0xff] %v5443_v49  ;;  %v1753_v26 = vpop.f32.mrf.mxu1  ;;  %3951 = vmatpush.msk.msrb.mxu0 %vm868_vm0, %v3950_v52 }
 0x190   : > { %v1086_v20 = vmax.f32 %v1054_v10, 0.0  ;;  %v1567_v28 = vpop.f32.mrf.mxu3  ;;  %v2010_v2 = vpop.f32.mrf.mxu2  ;;  %v5468_v34 = vsel %vm1364_vm3, %v1436_v30, %v1438_v59 }
 0x191   : > { %v1748_v13 = vadd.f32 %v1747_v37, %v1567_v28  ;;  %v5456_v49 = vld [vmem:[#allocation2 + $0x168] sm:$0xff]  ;;  %6827 = vst [vmem:[#allocation92_spill] sm:$0xff] %v5468_v34 }
 0x192   : > { %1119 = vst.msk [vmem:[#allocation2 + $0x171] sm:$0xff] %vm771_vm1, %v1086_v20  ;;  %3778 = vmatmul.msk.f32.gmra.mxu1 %vm771_vm1, %v5456_v49  ;;  %v1440_v29 = vrot.slane %v5456_v49, 1  ;;  %v1883_v28 = vrot.slane %v5456_v49, 2 }
 0x193   : > { %v5461_v40 = vadd.f32 %v2010_v2, %v1748_v13  ;;  %v979_v27 = vpop.f32.mrf.mxu0 }
 0x194   : > { %v1019_v10 = vmul.f32 %v5360_v0, %v979_v27 }
 0x195   : > { %6826 = vst [vmem:[#allocation91_spill] sm:$0xff] %v5461_v40  ;;  %3744 = vmatmul.msk.f32.gmra.mxu3 %vm771_vm1, %v5468_v34  ;;  %3811 = vmatmul.msk.f32.gmra.mxu2 %vm771_vm1, %v5471_v38 }
 0x196   : > { %v1055_v37 = vadd.f32 %v5376_v57, %v1019_v10  ;;  %3829 = vmatmul.msk.f32.gmra.mxu0 %vm771_vm1, %v5091_v14 }
 0x197   : > { %v1756_v27 = vpop.f32.mrf.mxu1 }
 0x198   : > { %v1087_v13 = vmax.f32 %v1055_v37, 0.0  ;;  %v1570_v30 = vpop.f32.mrf.mxu3  ;;  %v2013_v2 = vpop.f32.mrf.mxu2 }
 0x199   : > { %v1751_v59 = vadd.f32 %v1750_v60, %v1570_v30  ;;  %v5481_v7 = vld [vmem:[#allocation2 + $0x170] sm:$0xff]  ;;  %v1308_v40 = vld [vmem:[#allocation2 + $0x178] sm:$0x3] }
 0x19a   : > { %1120 = vst.msk [vmem:[#allocation2 + $0x181] sm:$0xff] %vm771_vm1, %v1087_v13  ;;  %3779 = vmatmul.msk.f32.gmra.mxu1 %vm771_vm1, %v5481_v7  ;;  %v1441_v20 = vrot.slane %v5481_v7, 1  ;;  %v1884_v52 = vrot.slane %v5481_v7, 2 }
 0x19b   : > { %v5490_v10 = vadd.f32 %v2013_v2, %v1751_v59  ;;  %v982_v37 = vpop.f32.mrf.mxu0 }
 0x19c   : > { %v1020_v60 = vmul.f32 %v5360_v0, %v982_v37  ;;  %v5494_v30 = vsel %vm1364_vm3, %v1440_v29, %v1441_v20  ;;  %v5497_v13 = vsel %vm1807_vm4, %v1883_v28, %v1884_v52  ;;  %v1443_v37 = vrot.slane %v1308_v40, 1 }
 0x19d   : > { %6828 = vst [vmem:[#allocation93_spill] sm:$0xff] %v5490_v10  ;;  %3745 = vmatmul.msk.f32.gmra.mxu3 %vm771_vm1, %v5494_v30  ;;  %3812 = vmatmul.msk.f32.gmra.mxu2 %vm771_vm1, %v5497_v13  ;;  %v1886_v10 = vrot.slane %v1308_v40, 2 }
 0x19e   : > { %6829 = vst [vmem:[#allocation94_spill] sm:$0xff] %v5494_v30  ;;  %v1056_v34 = vadd.f32 %v5376_v57, %v1020_v60  ;;  %3830 = vmatmul.msk.f32.gmra.mxu0 %vm771_vm1, %v5120_v41  ;;  %v5512_v57 = vsel %vm1364_vm3, %v1441_v20, %v1443_v37 }
 0x19f   : > { %6830 = vst [vmem:[#allocation95_spill] sm:$0xff] %v5497_v13  ;;  %v1759_v2 = vpop.f32.mrf.mxu1  ;;  %v5515_v60 = vsel %vm1807_vm4, %v1884_v52, %v1886_v10  ;;  %v4167_v10 = vld [vmem:[#allocation2 + $0x30] sm:$0xff] }
 0x1a0   : > { %v1088_v0 = vmax.f32 %v1056_v34, 0.0  ;;  %v1573_v59 = vpop.f32.mrf.mxu3  ;;  %v2016_v29 = vpop.f32.mrf.mxu2  ;;  %6831 = vst [vmem:[#allocation96_spill] sm:$0xff] %v5515_v60 }
 0x1a1   : > { %v1754_v28 = vadd.f32 %v1753_v26, %v1573_v59 }
 0x1a2   : > { %1121 = vst.msk [vmem:[#allocation2 + $0x189] sm:$0xff] %vm771_vm1, %v1088_v0  ;;  %3884 = vmatmul.msk.f32.vlgmr.msra.gmra.mxu1 %vm771_vm1, %v4768_v58 }
 0x1a3   : > { %v5509_v30 = vadd.f32 %v2016_v29, %v1754_v28  ;;  %v1166_v13 = vpop.f32.mrf.mxu0 }
 0x1a5   : > { %3746 = vmatmul.msk.f32.gmra.mxu3 %vm771_vm1, %v5512_v57  ;;  %3813 = vmatmul.msk.f32.gmra.mxu2 %vm771_vm1, %v5515_v60 }
 0x1a6   : > { %3831 = vmatmul.msk.f32.gmra.mxu0 %vm771_vm1, %v5143_v1 }
 0x1a7   : > { %v1762_v34 = vpop.f32.mrf.mxu1 }
 0x1a8   : > { %v1576_v58 = vpop.f32.mrf.mxu3  ;;  %v2019_v26 = vpop.f32.mrf.mxu2 }
 0x1a9   : > { %v1757_v40 = vadd.f32 %v1756_v27, %v1576_v58 }
 0x1aa   : > { %3885 = vmatmul.msk.f32.gmra.mxu1 %vm771_vm1, %v4794_v5 }
 0x1ab   : > { %v5525_v20 = vadd.f32 %v2019_v26, %v1757_v40  ;;  %v5527_v52 = vpop.f32.mrf.mxu0 }
 0x1ad   : > { %3850 = vmatmul.msk.f32.vlgmr.msra.gmra.mxu3 %vm771_vm1, %v4765_v56  ;;  %3918 = vmatmul.msk.f32.vlgmr.msra.gmra.mxu2 %vm771_vm1, %v4167_v10  ;;  %v4168_v56 = vld [vmem:[#allocation2 + $0x38] sm:$0xff] }
 0x1ae   : > { %3832 = vmatmul.msk.f32.gmra.mxu0 %vm771_vm1, %v5168_v6 }
 0x1af   : > { %v1765_v13 = vpop.f32.mrf.mxu1 }
 0x1b0   : > { %v1579_v0 = vpop.f32.mrf.mxu3  ;;  %v2022_v59 = vpop.f32.mrf.mxu2 }
 0x1b1   : > { %v1760_v27 = vadd.f32 %v1759_v2, %v1579_v0 }
 0x1b2   : > { %3886 = vmatmul.msk.f32.gmra.mxu1 %vm771_vm1, %v4824_v42 }
 0x1b3   : > { %v5536_v5 = vadd.f32 %v2022_v59, %v1760_v27  ;;  %v5538_v29 = vpop.f32.mrf.mxu0 }
 0x1b5   : > { %3851 = vmatmul.msk.f32.gmra.mxu3 %vm771_vm1, %v4791_v51  ;;  %3919 = vmatmul.msk.f32.gmra.mxu2 %vm771_vm1, %v4168_v56  ;;  %v4169_v51 = vld [vmem:[#allocation2 + $0x48] sm:$0xff] }
 0x1b6   : > { %3833 = vmatmul.msk.f32.gmra.mxu0 %vm771_vm1, %v5189_v9 }
 0x1b7   : > { %v1768_v37 = vpop.f32.mrf.mxu1 }
 0x1b8   : > { %v1582_v28 = vpop.f32.mrf.mxu3  ;;  %v2025_v58 = vpop.f32.mrf.mxu2 }
 0x1b9   : > { %v1763_v2 = vadd.f32 %v1762_v34, %v1582_v28  ;;  %v4170_v28 = vld [vmem:[#allocation2 + $0x50] sm:$0xff] }
 0x1ba   : > { %3887 = vmatmul.msk.f32.gmra.mxu1 %vm771_vm1, %v4850_v36  ;;  %v6858_v36 = vld [vmem:[#allocation62_spill] sm:$0xff] }
 0x1bb   : > { %v5547_v26 = vadd.f32 %v2025_v58, %v1763_v2  ;;  %v5549_v40 = vpop.f32.mrf.mxu0 }
 0x1bd   : > { %6832 = vst [vmem:[#allocation97_spill] sm:$0xff] %v5547_v26  ;;  %3852 = vmatmul.msk.f32.gmra.mxu3 %vm771_vm1, %v4821_v12  ;;  %3920 = vmatmul.msk.f32.gmra.mxu2 %vm771_vm1, %v4169_v51  ;;  %v6857_v26 = vld [vmem:[#allocation66_spill] sm:$0xff] }
 0x1be   : > { %3834 = vmatmul.msk.f32.gmra.mxu0 %vm771_vm1, %v5212_v54 }
 0x1bf   : > { %v1771_v10 = vpop.f32.mrf.mxu1 }
 0x1c0   : > { %v1585_v0 = vpop.f32.mrf.mxu3  ;;  %v2028_v59 = vpop.f32.mrf.mxu2 }
 0x1c1   : > { %v1766_v34 = vadd.f32 %v1765_v13, %v1585_v0 }
 0x1c2   : > { %3888 = vmatmul.msk.f32.gmra.mxu1 %vm771_vm1, %v4880_v48 }
 0x1c3   : > { %v5558_v27 = vadd.f32 %v2028_v59, %v1766_v34  ;;  %v5560_v56 = vpop.f32.mrf.mxu0  ;;  %v4171_v34 = vld [vmem:[#allocation2 + $0x60] sm:$0xff] }
 0x1c5   : > { %6833 = vst [vmem:[#allocation98_spill] sm:$0xff] %v5558_v27  ;;  %3853 = vmatmul.msk.f32.gmra.mxu3 %vm771_vm1, %v4847_v22  ;;  %3921 = vmatmul.msk.f32.gmra.mxu2 %vm771_vm1, %v4170_v28 }
 0x1c6   : > { %3835 = vmatmul.msk.f32.gmra.mxu0 %vm771_vm1, %v5233_v32 }
 0x1c7   : > { %v1774_v58 = vpop.f32.mrf.mxu1 }
 0x1c8   : > { %v1588_v2 = vpop.f32.mrf.mxu3  ;;  %v2031_v51 = vpop.f32.mrf.mxu2 }
 0x1c9   : > { %v1769_v13 = vadd.f32 %v1768_v37, %v1588_v2 }
 0x1ca   : > { %3889 = vmatmul.msk.f32.gmra.mxu1 %vm771_vm1, %v4906_v43 }
 0x1cb   : > { %v5569_v0 = vadd.f32 %v2031_v51, %v1769_v13  ;;  %v5571_v59 = vpop.f32.mrf.mxu0  ;;  %v4172_v13 = vld [vmem:[#allocation2 + $0x68] sm:$0xff] }
 0x1cd   : > { %6834 = vst [vmem:[#allocation99_spill] sm:$0xff] %v5569_v0  ;;  %3854 = vmatmul.msk.f32.gmra.mxu3 %vm771_vm1, %v4877_v47  ;;  %3922 = vmatmul.msk.f32.gmra.mxu2 %vm771_vm1, %v4171_v34 }
 0x1ce   : > { %3836 = vmatmul.msk.f32.gmra.mxu0 %vm771_vm1, %v5258_v25 }
 0x1cf   : > { %v1777_v28 = vpop.f32.mrf.mxu1 }
 0x1d0   : > { %v1591_v27 = vpop.f32.mrf.mxu3  ;;  %v2034_v48 = vpop.f32.mrf.mxu2 }
 0x1d1   : > { %v1772_v37 = vadd.f32 %v1771_v10, %v1591_v27 }
 0x1d2   : > { %3890 = vmatmul.msk.f32.gmra.mxu1 %vm771_vm1, %v4936_v55 }
 0x1d3   : > { %v5580_v2 = vadd.f32 %v2034_v48, %v1772_v37  ;;  %v5582_v51 = vpop.f32.mrf.mxu0  ;;  %v4173_v37 = vld [vmem:[#allocation2 + $0x78] sm:$0xff] }
 0x1d5   : > { %6835 = vst [vmem:[#allocation100_spill] sm:$0xff] %v5580_v2  ;;  %3855 = vmatmul.msk.f32.gmra.mxu3 %vm771_vm1, %v4903_v23  ;;  %3923 = vmatmul.msk.f32.gmra.mxu2 %vm771_vm1, %v4172_v13 }
 0x1d6   : > { %3837 = vmatmul.msk.f32.gmra.mxu0 %vm771_vm1, %v5279_v24 }
 0x1d7   : > { %v1780_v34 = vpop.f32.mrf.mxu1 }
 0x1d8   : > { %v1594_v0 = vpop.f32.mrf.mxu3  ;;  %v2037_v43 = vpop.f32.mrf.mxu2 }
 0x1d9   : > { %v1775_v10 = vadd.f32 %v1774_v58, %v1594_v0 }
 0x1da   : > { %3891 = vmatmul.msk.f32.gmra.mxu1 %vm771_vm1, %v4962_v11 }
 0x1db   : > { %v5591_v48 = vadd.f32 %v2037_v43, %v1775_v10  ;;  %v5593_v27 = vpop.f32.mrf.mxu0  ;;  %v4174_v10 = vld [vmem:[#allocation2 + $0x80] sm:$0xff] }
 0x1dd   : > { %6836 = vst [vmem:[#allocation101_spill] sm:$0xff] %v5591_v48  ;;  %3856 = vmatmul.msk.f32.gmra.mxu3 %vm771_vm1, %v4933_v15  ;;  %3924 = vmatmul.msk.f32.gmra.mxu2 %vm771_vm1, %v4173_v37 }
 0x1de   : > { %3838 = vmatmul.msk.f32.gmra.mxu0 %vm771_vm1, %v5304_v61 }
 0x1df   : > { %v1783_v13 = vpop.f32.mrf.mxu1 }
 0x1e0   : > { %v1597_v2 = vpop.f32.mrf.mxu3  ;;  %v2040_v55 = vpop.f32.mrf.mxu2 }
 0x1e1   : > { %v1778_v58 = vadd.f32 %v1777_v28, %v1597_v2 }
 0x1e2   : > { %3892 = vmatmul.msk.f32.gmra.mxu1 %vm771_vm1, %v4992_v35 }
 0x1e3   : > { %v5602_v43 = vadd.f32 %v2040_v55, %v1778_v58  ;;  %v5604_v0 = vpop.f32.mrf.mxu0 }
 0x1e5   : > { %6837 = vst [vmem:[#allocation102_spill] sm:$0xff] %v5602_v43  ;;  %3857 = vmatmul.msk.f32.gmra.mxu3 %vm771_vm1, %v4959_v39  ;;  %3925 = vmatmul.msk.f32.gmra.mxu2 %vm771_vm1, %v4174_v10 }
 0x1e6   : > { %3839 = vmatmul.msk.f32.gmra.mxu0 %vm771_vm1, %v5325_v21 }
 0x1e7   : > { %v1786_v37 = vpop.f32.mrf.mxu1 }
 0x1e8   : > { %v1600_v48 = vpop.f32.mrf.mxu3  ;;  %v2043_v11 = vpop.f32.mrf.mxu2 }
 0x1e9   : > { %v1781_v28 = vadd.f32 %v1780_v34, %v1600_v48 }
 0x1ea   : > { %3893 = vmatmul.msk.f32.gmra.mxu1 %vm771_vm1, %v5018_v4 }
 0x1eb   : > { %v5613_v55 = vadd.f32 %v2043_v11, %v1781_v28  ;;  %v5621_v2 = vpop.f32.mrf.mxu0 }
 0x1ed   : > { %6838 = vst [vmem:[#allocation103_spill] sm:$0xff] %v5613_v55  ;;  %3858 = vmatmul.msk.f32.gmra.mxu3 %vm771_vm1, %v4989_v50  ;;  %3926 = vmatmul.msk.f32.gmra.mxu2 %vm771_vm1, %v5006_v16 }
 0x1ee   : > { %3840 = vmatmul.msk.f32.gmra.mxu0 %vm771_vm1, %v5350_v31 }
 0x1ef   : > { %v1789_v58 = vpop.f32.mrf.mxu1 }
 0x1f0   : > { %v1603_v10 = vpop.f32.mrf.mxu3  ;;  %v2046_v43 = vpop.f32.mrf.mxu2 }
 0x1f1   : > { %v1784_v34 = vadd.f32 %v1783_v13, %v1603_v10 }
 0x1f2   : > { %3894 = vmatmul.msk.f32.gmra.mxu1 %vm771_vm1, %v5048_v44 }
 0x1f3   : > { %v5625_v11 = vadd.f32 %v2046_v43, %v1784_v34  ;;  %v5633_v55 = vpop.f32.mrf.mxu0 }
 0x1f5   : > { %6839 = vst [vmem:[#allocation104_spill] sm:$0xff] %v5625_v11  ;;  %3859 = vmatmul.msk.f32.gmra.mxu3 %vm771_vm1, %v5015_v8  ;;  %3927 = vmatmul.msk.f32.gmra.mxu2 %vm771_vm1, %v5032_v19 }
 0x1f6   : > { %3841 = vmatmul.msk.f32.gmra.mxu0 %vm771_vm1, %v5381_v17 }
 0x1f7   : > { %v1792_v16 = vpop.f32.mrf.mxu1 }
 0x1f8   : > { %v1606_v48 = vpop.f32.mrf.mxu3  ;;  %v2049_v28 = vpop.f32.mrf.mxu2 }
 0x1f9   : > { %v1787_v13 = vadd.f32 %v1786_v37, %v1606_v48 }
 0x1fa   : > { %3895 = vmatmul.msk.f32.gmra.mxu1 %vm771_vm1, %v5078_v46  ;;  %v5707_v46 = vld [vmem:[#allocation2 + $0x188] sm:$0xff] }
 0x1fb   : > { %v5637_v43 = vadd.f32 %v2049_v28, %v1787_v13  ;;  %v5647_v37 = vpop.f32.mrf.mxu0 }
 0x1fd   : > { %6840 = vst [vmem:[#allocation105_spill] sm:$0xff] %v5637_v43  ;;  %3860 = vmatmul.msk.f32.gmra.mxu3 %vm771_vm1, %v5045_v63  ;;  %3928 = vmatmul.msk.f32.gmra.mxu2 %vm771_vm1, %v5066_v45 }
 0x1fe   : > { %3842 = vmatmul.msk.f32.gmra.mxu0 %vm771_vm1, %v5406_v33 }
 0x1ff   : > { %v1795_v19 = vpop.f32.mrf.mxu1 }
 0x200   : > { %v1609_v10 = vpop.f32.mrf.mxu3  ;;  %v2052_v34 = vpop.f32.mrf.mxu2 }
 0x201   : > { %v1790_v11 = vadd.f32 %v1789_v58, %v1609_v10 }
 0x202   : > { %3896 = vmatmul.msk.f32.gmra.mxu1 %vm771_vm1, %v5109_v3 }
 0x203   : > { %v5649_v48 = vadd.f32 %v2052_v34, %v1790_v11  ;;  %v5661_v11 = vpop.f32.mrf.mxu0  ;;  %v6843_v34 = vld [vmem:[#allocation49_spill] sm:$0xff] }
 0x205   : > { %6841 = vst [vmem:[#allocation106_spill] sm:$0xff] %v5649_v48  ;;  %3861 = vmatmul.msk.f32.gmra.mxu3 %vm771_vm1, %v5075_v18  ;;  %3929 = vmatmul.msk.f32.gmra.mxu2 %vm771_vm1, %v5091_v14 }
 0x206   : > { %3843 = vmatmul.msk.f32.gmra.mxu0 %vm771_vm1, %v5427_v62 }
 0x207   : > { %v1798_v45 = vpop.f32.mrf.mxu1 }
 0x208   : > { %v1612_v28 = vpop.f32.mrf.mxu3  ;;  %v2055_v13 = vpop.f32.mrf.mxu2 }
 0x209   : > { %v1793_v58 = vadd.f32 %v1792_v16, %v1612_v28  ;;  %v6844_v28 = vld [vmem:[#allocation54_spill] sm:$0xff] }
 0x20a   : > { %3897 = vmatmul.msk.f32.gmra.mxu1 %vm771_vm1, %v5135_v53 }
 0x20b   : > { %v5659_v10 = vadd.f32 %v2055_v13, %v1793_v58  ;;  %v6846_v58 = vld [vmem:[#allocation51_spill] sm:$0xff] }
 0x20d   : > { %6842 = vst [vmem:[#allocation107_spill] sm:$0xff] %v5659_v10  ;;  %3862 = vmatmul.msk.f32.gmra.mxu3 %vm771_vm1, %v6843_v34  ;;  %3930 = vmatmul.msk.f32.gmra.mxu2 %vm771_vm1, %v5120_v41  ;;  %v5679_v41 = vpop.f32.mrf.mxu0 }
 0x20e   : > { %3844 = vmatmul.msk.f32.gmra.mxu0 %vm771_vm1, %v5456_v49 }
 0x20f   : > { %v1801_v14 = vpop.f32.mrf.mxu1 }
 0x210   : > { %v1615_v48 = vpop.f32.mrf.mxu3  ;;  %v2058_v3 = vpop.f32.mrf.mxu2 }
 0x211   : > { %v1796_v16 = vadd.f32 %v1795_v19, %v1615_v48  ;;  %v6847_v48 = vld [vmem:[#allocation57_spill] sm:$0xff] }
 0x212   : > { %3898 = vmatmul.msk.f32.gmra.mxu1 %vm771_vm1, %v6844_v28 }
 0x213   : > { %v5671_v13 = vadd.f32 %v2058_v3, %v1796_v16  ;;  %v5685_v16 = vld [vmem:[#allocation2 + $0x180] sm:$0xff] }
 0x215   : > { %6845 = vst [vmem:[#allocation49_spill] sm:$0xff] %v5671_v13  ;;  %3863 = vmatmul.msk.f32.gmra.mxu3 %vm771_vm1, %v6846_v58  ;;  %3931 = vmatmul.msk.f32.gmra.mxu2 %vm771_vm1, %v5143_v1  ;;  %v6849_v13 = vld [vmem:[#allocation53_spill] sm:$0xff]  ;;  %v3156_v1 = vld [vmem:[%s6590_s11] sm:$0xf] }
 0x216   : > { %3845 = vmatmul.msk.f32.gmra.mxu0 %vm771_vm1, %v5481_v7  ;;  %4051 = vmatpush.msk.msrb.mxu2 %vm868_vm0, %v3156_v1  ;;  %v6852_v1 = vld [vmem:[#allocation56_spill] sm:$0xff] }
 0x217   : > { %v1804_v10 = vpop.f32.mrf.mxu1 }
 0x218   : > { %v1618_v53 = vpop.f32.mrf.mxu3  ;;  %v2061_v43 = vpop.f32.mrf.mxu2 }
 0x219   : > { %v1799_v19 = vadd.f32 %v1798_v45, %v1618_v53 }
 0x21a   : > { %3899 = vmatmul.msk.f32.gmra.mxu1 %vm771_vm1, %v6847_v48  ;;  %v6850_v48 = vld [vmem:[#allocation60_spill] sm:$0xff] }
 0x21b   : > { %v5683_v3 = vadd.f32 %v2061_v43, %v1799_v19  ;;  %v3157_v43 = vld [vmem:[%s6591_s12] sm:$0xf] }
 0x21c   : > { %4018 = vmatpush.msk.msrb.mxu1 %vm868_vm0, %v3157_v43 }
 0x21d   : > { %6848 = vst [vmem:[#allocation51_spill] sm:$0xff] %v5683_v3  ;;  %3864 = vmatmul.msk.f32.gmra.mxu3 %vm771_vm1, %v6849_v13  ;;  %3932 = vmatmul.msk.f32.gmra.mxu2 %vm771_vm1, %v5168_v6  ;;  %v5701_v3 = vpop.f32.mrf.mxu0 }
 0x21e   : > { %3846 = vmatmul.msk.f32.gmra.mxu0 %vm771_vm1, %v5685_v16 }
 0x21f   : > { %v2449_v53 = vpop.f32.mrf.mxu1 }
 0x220   : > { %v1621_v45 = vpop.f32.mrf.mxu3  ;;  %v2064_v19 = vpop.f32.mrf.mxu2 }
 0x221   : > { %v1802_v6 = vadd.f32 %v1801_v14, %v1621_v45  ;;  %v6853_v45 = vld [vmem:[#allocation63_spill] sm:$0xff] }
 0x222   : > { %3900 = vmatmul.msk.f32.gmra.mxu1 %vm771_vm1, %v6850_v48 }
 0x223   : > { %v5705_v28 = vadd.f32 %v2064_v19, %v1802_v6 }
 0x225   : > { %6851 = vst [vmem:[#allocation53_spill] sm:$0xff] %v5705_v28  ;;  %3865 = vmatmul.msk.f32.gmra.mxu3 %vm771_vm1, %v6852_v1  ;;  %3933 = vmatmul.msk.f32.gmra.mxu2 %vm771_vm1, %v5189_v9  ;;  %v5717_v19 = vpop.f32.mrf.mxu0  ;;  %v6855_v28 = vld [vmem:[#allocation59_spill] sm:$0xff] }
 0x226   : > { %3847 = vmatmul.msk.f32.gmra.mxu0 %vm771_vm1, %v5707_v46  ;;  %v6856_v9 = vld [vmem:[#allocation55_spill] sm:$0xff] }
 0x227   : > { %v2452_v43 = vpop.f32.mrf.mxu1  ;;  %v2226_v48 = vadd.f32 %v5527_v52, %v6856_v9 }
 0x228   : > { %v1624_v44 = vpop.f32.mrf.mxu3  ;;  %v2067_v4 = vpop.f32.mrf.mxu2 }
 0x229   : > { %v1805_v14 = vadd.f32 %v1804_v10, %v1624_v44 }
 0x22a   : > { %3901 = vmatmul.msk.f32.gmra.mxu1 %vm771_vm1, %v6853_v45 }
 0x22b   : > { %v5719_v6 = vadd.f32 %v2067_v4, %v1805_v14 }
 0x22d   : > { %6854 = vst [vmem:[#allocation56_spill] sm:$0xff] %v5719_v6  ;;  %3866 = vmatmul.msk.f32.gmra.mxu3 %vm771_vm1, %v6855_v28  ;;  %3934 = vmatmul.msk.f32.gmra.mxu2 %vm771_vm1, %v5212_v54  ;;  %v5731_v14 = vpop.f32.mrf.mxu0 }
 0x22e   : > { %3952 = vmatmul.msk.f32.vlgmr.msrb.gmra.mxu0 %vm771_vm1, %v4821_v12  ;;  %v6859_v12 = vld [vmem:[#allocation58_spill] sm:$0xff] }
 0x22f   : > { %v2455_v44 = vpop.f32.mrf.mxu1  ;;  %v2227_v54 = vadd.f32 %v5538_v29, %v6859_v12 }
 0x230   : > { %v2290_v10 = vpop.f32.mrf.mxu3  ;;  %v2605_v35 = vpop.f32.mrf.mxu2 }
 0x231   : > { %v2386_v45 = vadd.f32 %v2290_v10, %v2226_v48 }
 0x232   : > { %3902 = vmatmul.msk.f32.gmra.mxu1 %vm771_vm1, %v6857_v26 }
 0x233   : > { %v2545_v4 = vadd.f32 %v2449_v53, %v2386_v45  ;;  %v6860_v45 = vld [vmem:[#allocation69_spill] sm:$0xff] }
 0x235   : > { %v5733_v6 = vadd.f32 %v2605_v35, %v2545_v4  ;;  %3867 = vmatmul.msk.f32.gmra.mxu3 %vm771_vm1, %v6858_v36  ;;  %3935 = vmatmul.msk.f32.gmra.mxu2 %vm771_vm1, %v5233_v32  ;;  %v6862_v4 = vld [vmem:[#allocation65_spill] sm:$0xff]  ;;  %v5755_v29 = vpop.f32.mrf.mxu0 }
 0x236   : > { %3953 = vmatmul.msk.f32.gmra.mxu0 %vm771_vm1, %v4847_v22  ;;  %v6863_v22 = vld [vmem:[#allocation61_spill] sm:$0xff] }
 0x237   : > { %v2458_v52 = vpop.f32.mrf.mxu1  ;;  %v2228_v32 = vadd.f32 %v5549_v40, %v6863_v22 }
 0x238   : > { %v2293_v48 = vpop.f32.mrf.mxu3  ;;  %v2608_v9 = vpop.f32.mrf.mxu2 }
 0x239   : > { %v2387_v53 = vadd.f32 %v2293_v48, %v2227_v54 }
 0x23a   : > { %3903 = vmatmul.msk.f32.gmra.mxu1 %vm771_vm1, %v6860_v45 }
 0x23b   : > { %v2546_v35 = vadd.f32 %v2452_v43, %v2387_v53 }
 0x23d   : > { %v5745_v10 = vadd.f32 %v2608_v9, %v2546_v35  ;;  %3868 = vmatmul.msk.f32.gmra.mxu3 %vm771_vm1, %v6862_v4  ;;  %3936 = vmatmul.msk.f32.gmra.mxu2 %vm771_vm1, %v5258_v25  ;;  %v6864_v9 = vld [vmem:[#allocation72_spill] sm:$0xff] }
 0x23e   : > { %3954 = vmatmul.msk.f32.gmra.mxu0 %vm771_vm1, %v4877_v47  ;;  %v6866_v47 = vld [vmem:[#allocation64_spill] sm:$0xff] }
 0x23f   : > { %6861 = vst [vmem:[#allocation59_spill] sm:$0xff] %v5745_v10  ;;  %v2461_v12 = vpop.f32.mrf.mxu1  ;;  %v6865_v10 = vld [vmem:[#allocation68_spill] sm:$0xff]  ;;  %v2229_v25 = vadd.f32 %v5560_v56, %v6866_v47 }
 0x240   : > { %v2296_v54 = vpop.f32.mrf.mxu3  ;;  %v2611_v48 = vpop.f32.mrf.mxu2 }
 0x241   : > { %v2388_v43 = vadd.f32 %v2296_v54, %v2228_v32 }
 0x242   : > { %3904 = vmatmul.msk.f32.gmra.mxu1 %vm771_vm1, %v6864_v9  ;;  %v5769_v9 = vpop.f32.mrf.mxu0 }
 0x243   : > { %v2547_v53 = vadd.f32 %v2455_v44, %v2388_v43  ;;  %v6867_v44 = vld [vmem:[#allocation75_spill] sm:$0xff] }
 0x245   : > { %v5759_v35 = vadd.f32 %v2611_v48, %v2547_v53  ;;  %3869 = vmatmul.msk.f32.gmra.mxu3 %vm771_vm1, %v6865_v10  ;;  %3937 = vmatmul.msk.f32.gmra.mxu2 %vm771_vm1, %v5279_v24  ;;  %v6868_v53 = vld [vmem:[#allocation71_spill] sm:$0xff] }
 0x246   : > { %3955 = vmatmul.msk.f32.gmra.mxu0 %vm771_vm1, %v4903_v23  ;;  %v6869_v23 = vld [vmem:[#allocation67_spill] sm:$0xff] }
 0x247   : > { %v2464_v40 = vpop.f32.mrf.mxu1  ;;  %v2230_v24 = vadd.f32 %v5571_v59, %v6869_v23 }
 0x248   : > { %v2299_v22 = vpop.f32.mrf.mxu3  ;;  %v2614_v32 = vpop.f32.mrf.mxu2 }
 0x249   : > { %v2389_v54 = vadd.f32 %v2299_v22, %v2229_v25 }
 0x24a   : > { %3905 = vmatmul.msk.f32.gmra.mxu1 %vm771_vm1, %v6867_v44  ;;  %v6870_v44 = vld [vmem:[#allocation78_spill] sm:$0xff] }
 0x24b   : > { %v2548_v48 = vadd.f32 %v2458_v52, %v2389_v54 }
 0x24d   : > { %v5773_v43 = vadd.f32 %v2614_v32, %v2548_v48  ;;  %3870 = vmatmul.msk.f32.gmra.mxu3 %vm771_vm1, %v6868_v53  ;;  %3938 = vmatmul.msk.f32.gmra.mxu2 %vm771_vm1, %v5304_v61  ;;  %v5785_v32 = vpop.f32.mrf.mxu0  ;;  %v6871_v48 = vld [vmem:[#allocation74_spill] sm:$0xff] }
 0x24e   : > { %3956 = vmatmul.msk.f32.gmra.mxu0 %vm771_vm1, %v4933_v15  ;;  %v6872_v15 = vld [vmem:[#allocation70_spill] sm:$0xff] }
 0x24f   : > { %v2467_v56 = vpop.f32.mrf.mxu1  ;;  %v2231_v61 = vadd.f32 %v5582_v51, %v6872_v15 }
 0x250   : > { %v2302_v47 = vpop.f32.mrf.mxu3  ;;  %v2617_v25 = vpop.f32.mrf.mxu2 }
 0x251   : > { %v2390_v22 = vadd.f32 %v2302_v47, %v2230_v24  ;;  %v6873_v47 = vld [vmem:[#allocation81_spill] sm:$0xff] }
 0x252   : > { %3906 = vmatmul.msk.f32.gmra.mxu1 %vm771_vm1, %v6870_v44 }
 0x253   : > { %v2549_v52 = vadd.f32 %v2461_v12, %v2390_v22 }
 0x255   : > { %v5787_v54 = vadd.f32 %v2617_v25, %v2549_v52  ;;  %3871 = vmatmul.msk.f32.gmra.mxu3 %vm771_vm1, %v6871_v48  ;;  %3939 = vmatmul.msk.f32.gmra.mxu2 %vm771_vm1, %v5325_v21  ;;  %v6875_v52 = vld [vmem:[#allocation77_spill] sm:$0xff] }
 0x256   : > { %3957 = vmatmul.msk.f32.gmra.mxu0 %vm771_vm1, %v4959_v39  ;;  %v5805_v39 = vpop.f32.mrf.mxu0  ;;  %v6876_v21 = vld [vmem:[#allocation73_spill] sm:$0xff] }
 0x257   : > { %v2470_v59 = vpop.f32.mrf.mxu1  ;;  %v2232_v51 = vadd.f32 %v5593_v27, %v6876_v21 }
 0x258   : > { %v2305_v23 = vpop.f32.mrf.mxu3  ;;  %v2620_v24 = vpop.f32.mrf.mxu2 }
 0x259   : > { %v2391_v12 = vadd.f32 %v2305_v23, %v2231_v61 }
 0x25a   : > { %3907 = vmatmul.msk.f32.gmra.mxu1 %vm771_vm1, %v6873_v47 }
 0x25b   : > { %v2550_v25 = vadd.f32 %v2464_v40, %v2391_v12 }
 0x25d   : > { %v5799_v22 = vadd.f32 %v2620_v24, %v2550_v25  ;;  %3872 = vmatmul.msk.f32.gmra.mxu3 %vm771_vm1, %v6875_v52  ;;  %3940 = vmatmul.msk.f32.gmra.mxu2 %vm771_vm1, %v5350_v31  ;;  %v6877_v24 = vld [vmem:[#allocation84_spill] sm:$0xff] }
 0x25e   : > { %3958 = vmatmul.msk.f32.gmra.mxu0 %vm771_vm1, %v4989_v50  ;;  %v6880_v50 = vld [vmem:[#allocation76_spill] sm:$0xff]  ;;  %v5823_v21 = vpop.f32.mrf.mxu0 }
 0x25f   : > { %6874 = vst [vmem:[#allocation55_spill] sm:$0xff] %v5799_v22  ;;  %v2473_v15 = vpop.f32.mrf.mxu1  ;;  %v6879_v22 = vld [vmem:[#allocation80_spill] sm:$0xff]  ;;  %v2233_v31 = vadd.f32 %v5604_v0, %v6880_v50 }
 0x260   : > { %v2308_v61 = vpop.f32.mrf.mxu3  ;;  %v2623_v40 = vpop.f32.mrf.mxu2 }
 0x261   : > { %v2392_v23 = vadd.f32 %v2308_v61, %v2232_v51 }
 0x262   : > { %3908 = vmatmul.msk.f32.gmra.mxu1 %vm771_vm1, %v6877_v24 }
 0x263   : > { %v2551_v12 = vadd.f32 %v2467_v56, %v2392_v23  ;;  %v6881_v56 = vld [vmem:[#allocation87_spill] sm:$0xff] }
 0x265   : > { %v5813_v25 = vadd.f32 %v2623_v40, %v2551_v12  ;;  %3873 = vmatmul.msk.f32.gmra.mxu3 %vm771_vm1, %v6879_v22  ;;  %3941 = vmatmul.msk.f32.gmra.mxu2 %vm771_vm1, %v5381_v17 }
 0x266   : > { %3959 = vmatmul.msk.f32.gmra.mxu0 %vm771_vm1, %v5015_v8  ;;  %v6883_v8 = vld [vmem:[#allocation79_spill] sm:$0xff] }
 0x267   : > { %6878 = vst [vmem:[#allocation66_spill] sm:$0xff] %v5813_v25  ;;  %v2476_v27 = vpop.f32.mrf.mxu1  ;;  %v6882_v25 = vld [vmem:[#allocation83_spill] sm:$0xff]  ;;  %v2234_v17 = vadd.f32 %v5621_v2, %v6883_v8 }
 0x268   : > { %v2311_v51 = vpop.f32.mrf.mxu3  ;;  %v2626_v40 = vpop.f32.mrf.mxu2 }
 0x269   : > { %v2393_v61 = vadd.f32 %v2311_v51, %v2233_v31  ;;  %v5837_v51 = vpop.f32.mrf.mxu0 }
 0x26a   : > { %3909 = vmatmul.msk.f32.gmra.mxu1 %vm771_vm1, %v6881_v56 }
 0x26b   : > { %v2552_v23 = vadd.f32 %v2470_v59, %v2393_v61  ;;  %v6884_v59 = vld [vmem:[#allocation90_spill] sm:$0xff] }
 0x26d   : > { %v5827_v12 = vadd.f32 %v2626_v40, %v2552_v23  ;;  %3874 = vmatmul.msk.f32.gmra.mxu3 %vm771_vm1, %v6882_v25  ;;  %3942 = vmatmul.msk.f32.gmra.mxu2 %vm771_vm1, %v5406_v33  ;;  %v6885_v23 = vld [vmem:[#allocation86_spill] sm:$0xff] }
 0x26e   : > { %3960 = vmatmul.msk.f32.gmra.mxu0 %vm771_vm1, %v5045_v63  ;;  %v6886_v63 = vld [vmem:[#allocation82_spill] sm:$0xff] }
 0x26f   : > { %v2479_v0 = vpop.f32.mrf.mxu1  ;;  %v2235_v33 = vadd.f32 %v5633_v55, %v6886_v63 }
 0x270   : > { %v2314_v50 = vpop.f32.mrf.mxu3 }
 0x271   : > { %v2394_v31 = vadd.f32 %v2314_v50, %v2234_v17  ;;  %v5855_v17 = vpop.f32.mrf.mxu0  ;;  %v6887_v50 = vld [vmem:[#allocation89_spill] sm:$0xff] }
 0x272   : > { %3910 = vmatmul.msk.f32.gmra.mxu1 %vm771_vm1, %v6884_v59 }
 0x273   : > { %v5841_v61 = vadd.f32 %v2473_v15, %v2394_v31 }
 0x275   : > { %3875 = vmatmul.msk.f32.gmra.mxu3 %vm771_vm1, %v6885_v23  ;;  %3943 = vmatmul.msk.f32.gmra.mxu2 %vm771_vm1, %v5427_v62 }
 0x276   : > { %3961 = vmatmul.msk.f32.gmra.mxu0 %vm771_vm1, %v5075_v18  ;;  %v6888_v18 = vld [vmem:[#allocation85_spill] sm:$0xff] }
 0x277   : > { %v2482_v2 = vpop.f32.mrf.mxu1  ;;  %v2236_v62 = vadd.f32 %v5647_v37, %v6888_v18  ;;  %v6891_v37 = vld [vmem:[#allocation88_spill] sm:$0xff] }
 0x278   : > { %v2317_v40 = vpop.f32.mrf.mxu3 }
 0x279   : > { %v2395_v8 = vadd.f32 %v2317_v40, %v2235_v33  ;;  %v6889_v33 = vld [vmem:[#allocation95_spill] sm:$0xff]  ;;  %v6890_v40 = vld [vmem:[#allocation92_spill] sm:$0xff] }
 0x27a   : > { %3911 = vmatmul.msk.f32.gmra.mxu1 %vm771_vm1, %v5471_v38 }
 0x27b   : > { %v5853_v15 = vadd.f32 %v2476_v27, %v2395_v8 }
 0x27d   : > { %3876 = vmatmul.msk.f32.gmra.mxu3 %vm771_vm1, %v6887_v50  ;;  %3944 = vmatmul.msk.f32.gmra.mxu2 %vm771_vm1, %v5456_v49  ;;  %v5873_v49 = vpop.f32.mrf.mxu0 }
 0x27e   : > { %3962 = vmatmul.msk.f32.gmra.mxu0 %vm771_vm1, %v6843_v34  ;;  %v2237_v34 = vadd.f32 %v5661_v11, %v6891_v37  ;;  %v6894_v11 = vld [vmem:[#allocation91_spill] sm:$0xff] }
 0x27f   : > { %v2485_v55 = vpop.f32.mrf.mxu1 }
 0x280   : > { %v2320_v31 = vpop.f32.mrf.mxu3 }
 0x281   : > { %v2396_v63 = vadd.f32 %v2320_v31, %v2236_v62  ;;  %v2418_v31 = vrot.slane %v5685_v16, 2 }
 0x282   : > { %3912 = vmatmul.msk.f32.gmra.mxu1 %vm771_vm1, %v6889_v33  ;;  %v5919_v33 = vld [vmem:[#allocation2 + $0x198] sm:$0xff] }
 0x283   : > { %v5867_v27 = vadd.f32 %v2479_v0, %v2396_v63  ;;  %v6893_v63 = vld [vmem:[#allocation94_spill] sm:$0xff] }
 0x285   : > { %3877 = vmatmul.msk.f32.gmra.mxu3 %vm771_vm1, %v6890_v40  ;;  %3945 = vmatmul.msk.f32.gmra.mxu2 %vm771_vm1, %v5481_v7  ;;  %v2419_v7 = vrot.slane %v5707_v46, 2 }
 0x286   : > { %3963 = vmatmul.msk.f32.gmra.mxu0 %vm771_vm1, %v6846_v58  ;;  %v2238_v58 = vadd.f32 %v5679_v41, %v6894_v11  ;;  %v6897_v41 = vld [vmem:[#allocation93_spill] sm:$0xff] }
 0x287   : > { %v2488_v8 = vpop.f32.mrf.mxu1 }
 0x288   : > { %v2323_v18 = vpop.f32.mrf.mxu3 }
 0x289   : > { %v2397_v62 = vadd.f32 %v2323_v18, %v2237_v34  ;;  %v5893_v34 = vpop.f32.mrf.mxu0 }
 0x28a   : > { %3913 = vmatmul.msk.f32.gmra.mxu1 %vm771_vm1, %v5515_v60  ;;  %v1311_v60 = vld [vmem:[#allocation2 + $0x190] sm:$0x3] }
 0x28b   : > { %v5881_v0 = vadd.f32 %v2482_v2, %v2397_v62  ;;  %v5896_v62 = vsel %vm1807_vm4, %v2418_v31, %v2419_v7  ;;  %v2239_v31 = vadd.f32 %v5701_v3, %v6897_v41  ;;  %v5934_v41 = vld [vmem:[#allocation2 + $0x1a0] sm:$0xff] }
 0x28c   : > { %6895 = vst [vmem:[#allocation58_spill] sm:$0xff] %v5896_v62 }
 0x28d   : > { %6892 = vst [vmem:[#allocation62_spill] sm:$0xff] %v5881_v0  ;;  %3878 = vmatmul.msk.f32.gmra.mxu3 %vm771_vm1, %v6893_v63  ;;  %3946 = vmatmul.msk.f32.gmra.mxu2 %vm771_vm1, %v5685_v16 }
 0x28e   : > { %3964 = vmatmul.msk.f32.gmra.mxu0 %vm771_vm1, %v6849_v13  ;;  %v2421_v13 = vrot.slane %v1311_v60, 2 }
 0x28f   : > { %v2491_v37 = vpop.f32.mrf.mxu1 }
 0x290   : > { %v2326_v2 = vpop.f32.mrf.mxu3 }
 0x291   : > { %v2398_v18 = vadd.f32 %v2326_v2, %v2238_v58  ;;  %v2259_v58 = vrot.slane %v5685_v16, 1  ;;  %v2260_v2 = vrot.slane %v5707_v46, 1 }
 0x292   : > { %3914 = vmatmul.msk.f32.gmra.mxu1 %vm771_vm1, %v5896_v62  ;;  %v5913_v62 = vsel %vm1807_vm4, %v2419_v7, %v2421_v13  ;;  %v2262_v13 = vrot.slane %v1311_v60, 1 }
 0x293   : > { %v5900_v0 = vadd.f32 %v2485_v55, %v2398_v18  ;;  %6898 = vst [vmem:[#allocation65_spill] sm:$0xff] %v5913_v62  ;;  %v5924_v3 = vsel %vm1364_vm3, %v2259_v58, %v2260_v2 }
 0x295   : > { %6896 = vst [vmem:[#allocation69_spill] sm:$0xff] %v5900_v0  ;;  %3879 = vmatmul.msk.f32.gmra.mxu3 %vm771_vm1, %v5512_v57  ;;  %3947 = vmatmul.msk.f32.gmra.mxu2 %vm771_vm1, %v5707_v46  ;;  %v5915_v0 = vpop.f32.mrf.mxu0  ;;  %v2240_v46 = vadd.f32 %v5717_v19, %v5509_v30  ;;  %v2241_v30 = vadd.f32 %v5731_v14, %v5525_v20 }
 0x296   : > { %3965 = vmatmul.msk.f32.gmra.mxu0 %vm771_vm1, %v6852_v1 }
 0x297   : > { %v2494_v11 = vpop.f32.mrf.mxu1 }
 0x298   : > { %v2329_v55 = vpop.f32.mrf.mxu3 }
 0x299   : > { %v2399_v18 = vadd.f32 %v2329_v55, %v2239_v31  ;;  %v6899_v31 = vld [vmem:[#allocation8_spill] sm:$0xff] }
 0x29a   : > { %3915 = vmatmul.msk.f32.gmra.mxu1 %vm771_vm1, %v5913_v62  ;;  %v6900_v58 = vmax.f32 %v6899_v31, 0.0  ;;  %v5944_v62 = vsel %vm1364_vm3, %v2260_v2, %v2262_v13 }
 0x29b   : > { %v5921_v1 = vadd.f32 %v2488_v8, %v2399_v18 }
 0x29d   : > { %3880 = vmatmul.msk.f32.gmra.mxu3 %vm771_vm1, %v5924_v3  ;;  %3948 = vmatmul.msk.f32.gmra.mxu2 %vm771_vm1, %v5919_v33  ;;  %v5941_v18 = vpop.f32.mrf.mxu0 }
 0x29e   : > { %3966 = vmatmul.msk.f32.gmra.mxu0 %vm771_vm1, %v6855_v28 }
 0x29f   : > { %v2497_v16 = vpop.f32.mrf.mxu1 }
 0x2a0   : > { %v2332_v7 = vpop.f32.mrf.mxu3 }
 0x2a1   : > { %v2400_v8 = vadd.f32 %v2332_v7, %v2240_v46 }
 0x2a2   : > { %4019 = vmatmul.msk.f32.vlgmr.msrb.gmra.mxu1 %vm771_vm1, %v6900_v58  ;;  %v6905_v58 = vld [vmem:[#allocation31_spill] sm:$0xff] }
 0x2a3   : > { %v5939_v55 = vadd.f32 %v2491_v37, %v2400_v8  ;;  %v6901_v37 = vld [vmem:[#allocation9_spill] sm:$0xff]  ;;  %v6903_v8 = vld [vmem:[#allocation10_spill] sm:$0xff] }
 0x2a4   : > { %v6902_v46 = vmax.f32 %v6901_v37, 0.0  ;;  %v6904_v31 = vmax.f32 %v6903_v8, 0.0 }
 0x2a5   : > { %3881 = vmatmul.msk.f32.gmra.mxu3 %vm771_vm1, %v5944_v62  ;;  %3949 = vmatmul.msk.f32.gmra.mxu2 %vm771_vm1, %v5934_v41  ;;  %v5961_v7 = vpop.f32.mrf.mxu0 }
 0x2a6   : > { %3967 = vmatmul.msk.f32.gmra.mxu0 %vm771_vm1, %v6858_v36  ;;  %v2242_v36 = vadd.f32 %v5755_v29, %v5536_v5 }
 0x2a7   : > { %v2500_v60 = vpop.f32.mrf.mxu1 }
 0x2a8   : > { %v2335_v28 = vpop.f32.mrf.mxu3 }
 0x2a9   : > { %v2401_v19 = vadd.f32 %v2335_v28, %v2241_v30 }
 0x2aa   : > { %4020 = vmatmul.msk.f32.gmra.mxu1 %vm771_vm1, %v6902_v46  ;;  %v6909_v46 = vld [vmem:[#allocation33_spill] sm:$0xff] }
 0x2ab   : > { %v5957_v2 = vadd.f32 %v2494_v11, %v2401_v19  ;;  %v6907_v19 = vld [vmem:[#allocation11_spill] sm:$0xff] }
 0x2ac   : > { %v6908_v37 = vmax.f32 %v6907_v19, 0.0  ;;  %v6915_v19 = vld [vmem:[#allocation13_spill] sm:$0xff] }
 0x2ad   : > { %3986 = vmatmul.msk.f32.vlgmr.msrb.gmra.mxu3 %vm771_vm1, %v4824_v42  ;;  %v6906_v42 = vld [vmem:[#allocation97_spill] sm:$0xff]  ;;  %v5978_v5 = vpop.f32.mrf.mxu0 }
 0x2ae   : > { %3968 = vmatmul.msk.f32.gmra.mxu0 %vm771_vm1, %v6862_v4  ;;  %v2243_v4 = vadd.f32 %v5769_v9, %v6906_v42  ;;  %v6913_v42 = vld [vmem:[#allocation35_spill] sm:$0xff] }
 0x2af   : > { %v2503_v20 = vpop.f32.mrf.mxu1 }
 0x2b0   : > { %v2338_v14 = vpop.f32.mrf.mxu3 }
 0x2b1   : > { %v2402_v13 = vadd.f32 %v2338_v14, %v2242_v36 }
 0x2b2   : > { %4021 = vmatmul.msk.f32.gmra.mxu1 %vm771_vm1, %v6904_v31  ;;  %v6911_v31 = vld [vmem:[#allocation12_spill] sm:$0xff] }
 0x2b3   : > { %v5970_v11 = vadd.f32 %v2497_v16, %v2402_v13 }
 0x2b5   : > { %3987 = vmatmul.msk.f32.gmra.mxu3 %vm771_vm1, %v6905_v58  ;;  %v5991_v8 = vpop.f32.mrf.mxu0  ;;  %v6912_v58 = vmax.f32 %v6911_v31, 0.0 }
 0x2b6   : > { %3969 = vmatmul.msk.f32.gmra.mxu0 %vm771_vm1, %v6865_v10  ;;  %v6910_v10 = vld [vmem:[#allocation98_spill] sm:$0xff] }
 0x2b7   : > { %v2506_v30 = vpop.f32.mrf.mxu1  ;;  %v2244_v9 = vadd.f32 %v5785_v32, %v6910_v10  ;;  %v6917_v10 = vld [vmem:[#allocation37_spill] sm:$0xff] }
 0x2b8   : > { %v2341_v29 = vpop.f32.mrf.mxu3 }
 0x2b9   : > { %v2403_v28 = vadd.f32 %v2341_v29, %v2243_v4 }
 0x2ba   : > { %4022 = vmatmul.msk.f32.gmra.mxu1 %vm771_vm1, %v6908_v37  ;;  %v6916_v37 = vmax.f32 %v6915_v19, 0.0 }
 0x2bb   : > { %v5983_v16 = vadd.f32 %v2500_v60, %v2403_v28 }
 0x2bd   : > { %3988 = vmatmul.msk.f32.gmra.mxu3 %vm771_vm1, %v6909_v46 }
 0x2be   : > { %3970 = vmatmul.msk.f32.gmra.mxu0 %vm771_vm1, %v6868_v53  ;;  %v6914_v53 = vld [vmem:[#allocation99_spill] sm:$0xff] }
 0x2bf   : > { %v2509_v36 = vpop.f32.mrf.mxu1  ;;  %v2245_v32 = vadd.f32 %v5805_v39, %v6914_v53  ;;  %v6921_v53 = vld [vmem:[#allocation39_spill] sm:$0xff] }
 0x2c0   : > { %v2344_v14 = vpop.f32.mrf.mxu3 }
 0x2c1   : > { %v2404_v13 = vadd.f32 %v2344_v14, %v2244_v9  ;;  %v6017_v9 = vpop.f32.mrf.mxu2 }
 0x2c2   : > { %4023 = vmatmul.msk.f32.gmra.mxu1 %vm771_vm1, %v6912_v58  ;;  %v6919_v58 = vld [vmem:[#allocation14_spill] sm:$0xff] }
 0x2c3   : > { %v5996_v60 = vadd.f32 %v2503_v20, %v2404_v13  ;;  %v6009_v20 = vpop.f32.mrf.mxu0 }
 0x2c5   : > { %3989 = vmatmul.msk.f32.gmra.mxu3 %vm771_vm1, %v6913_v42  ;;  %v6920_v42 = vmax.f32 %v6919_v58, 0.0 }
 0x2c6   : > { %3971 = vmatmul.msk.f32.gmra.mxu0 %vm771_vm1, %v6871_v48  ;;  %v6918_v48 = vld [vmem:[#allocation100_spill] sm:$0xff] }
 0x2c7   : > { %v2512_v4 = vpop.f32.mrf.mxu1  ;;  %v2246_v39 = vadd.f32 %v5823_v21, %v6918_v48 }
 0x2c8   : > { %v2347_v29 = vpop.f32.mrf.mxu3 }
 0x2c9   : > { %v2405_v28 = vadd.f32 %v2347_v29, %v2245_v32 }
 0x2ca   : > { %4024 = vmatmul.msk.f32.gmra.mxu1 %vm771_vm1, %v6916_v37  ;;  %v6923_v37 = vld [vmem:[#allocation15_spill] sm:$0xff] }
 0x2cb   : > { %v6007_v46 = vadd.f32 %v2506_v30, %v2405_v28  ;;  %v6026_v32 = vpop.f32.mrf.mxu0  ;;  %v6032_v28 = vpop.f32.mrf.mxu2 }
 0x2cd   : > { %3990 = vmatmul.msk.f32.gmra.mxu3 %vm771_vm1, %v6917_v10  ;;  %v6924_v10 = vmax.f32 %v6923_v37, 0.0 }
 0x2ce   : > { %3972 = vmatmul.msk.f32.gmra.mxu0 %vm771_vm1, %v6875_v52  ;;  %v6922_v52 = vld [vmem:[#allocation101_spill] sm:$0xff] }
 0x2cf   : > { %v2515_v31 = vpop.f32.mrf.mxu1  ;;  %v2247_v21 = vadd.f32 %v5837_v51, %v6922_v52 }
 0x2d0   : > { %v2350_v14 = vpop.f32.mrf.mxu3 }
 0x2d1   : > { %v2406_v13 = vadd.f32 %v2350_v14, %v2246_v39  ;;  %v6925_v39 = vld [vmem:[#allocation41_spill] sm:$0xff] }
 0x2d2   : > { %4025 = vmatmul.msk.f32.gmra.mxu1 %vm771_vm1, %v6920_v42  ;;  %v6927_v42 = vld [vmem:[#allocation16_spill] sm:$0xff] }
 0x2d3   : > { %v6022_v30 = vadd.f32 %v2509_v36, %v2406_v13  ;;  %v6045_v14 = vpop.f32.mrf.mxu0 }
 0x2d5   : > { %3991 = vmatmul.msk.f32.gmra.mxu3 %vm771_vm1, %v6921_v53  ;;  %v6928_v53 = vmax.f32 %v6927_v42, 0.0 }
 0x2d6   : > { %3973 = vmatmul.msk.f32.gmra.mxu0 %vm771_vm1, %v6879_v22  ;;  %v6926_v22 = vld [vmem:[#allocation102_spill] sm:$0xff] }
 0x2d7   : > { %v2518_v48 = vpop.f32.mrf.mxu1  ;;  %v2248_v51 = vadd.f32 %v5855_v17, %v6926_v22 }
 0x2d8   : > { %v2353_v29 = vpop.f32.mrf.mxu3 }
 0x2d9   : > { %v2407_v19 = vadd.f32 %v2353_v29, %v2247_v21  ;;  %v6929_v21 = vld [vmem:[#allocation43_spill] sm:$0xff] }
 0x2da   : > { %4026 = vmatmul.msk.f32.gmra.mxu1 %vm771_vm1, %v6924_v10 }
 0x2db   : > { %v6037_v36 = vadd.f32 %v2512_v4, %v2407_v19  ;;  %v6050_v4 = vpop.f32.mrf.mxu2  ;;  %v6060_v10 = vpop.f32.mrf.mxu0 }
 0x2dd   : > { %3992 = vmatmul.msk.f32.gmra.mxu3 %vm771_vm1, %v6925_v39  ;;  %v6931_v39 = vld [vmem:[#allocation17_spill] sm:$0xff] }
 0x2de   : > { %3974 = vmatmul.msk.f32.gmra.mxu0 %vm771_vm1, %v6882_v25  ;;  %v6930_v25 = vld [vmem:[#allocation103_spill] sm:$0xff]  ;;  %v6932_v22 = vmax.f32 %v6931_v39, 0.0 }
 0x2df   : > { %v2521_v29 = vpop.f32.mrf.mxu1  ;;  %v2249_v17 = vadd.f32 %v5873_v49, %v6930_v25 }
 0x2e0   : > { %v2356_v13 = vpop.f32.mrf.mxu3 }
 0x2e1   : > { %v2408_v58 = vadd.f32 %v2356_v13, %v2248_v51  ;;  %v6933_v13 = vld [vmem:[#allocation45_spill] sm:$0xff] }
 0x2e2   : > { %4027 = vmatmul.msk.f32.gmra.mxu1 %vm771_vm1, %v6928_v53 }
 0x2e3   : > { %v6052_v52 = vadd.f32 %v2515_v31, %v2408_v58  ;;  %v6067_v51 = vpop.f32.mrf.mxu2 }
 0x2e5   : > { %3993 = vmatmul.msk.f32.gmra.mxu3 %vm771_vm1, %v6929_v21  ;;  %v6935_v21 = vld [vmem:[#allocation18_spill] sm:$0xff] }
 0x2e6   : > { %3975 = vmatmul.msk.f32.gmra.mxu0 %vm771_vm1, %v6885_v23  ;;  %v6934_v23 = vld [vmem:[#allocation104_spill] sm:$0xff]  ;;  %v6936_v25 = vmax.f32 %v6935_v21, 0.0  ;;  %v6941_v21 = vld [vmem:[#allocation50_spill] sm:$0xff] }
 0x2e7   : > { %v2250_v49 = vadd.f32 %v5893_v34, %v6934_v23  ;;  %v2524_v58 = vpop.f32.mrf.mxu1 }
 0x2e8   : > { %v2359_v19 = vpop.f32.mrf.mxu3 }
 0x2e9   : > { %v2409_v37 = vadd.f32 %v2359_v19, %v2249_v17  ;;  %v6080_v17 = vpop.f32.mrf.mxu0  ;;  %v6937_v19 = vld [vmem:[#allocation47_spill] sm:$0xff] }
 0x2ea   : > { %4028 = vmatmul.msk.f32.gmra.mxu1 %vm771_vm1, %v6932_v22  ;;  %v2734_v22 = vrot.slane %v5919_v33, 1 }
 0x2eb   : > { %v6065_v31 = vadd.f32 %v2518_v48, %v2409_v37  ;;  %v6088_v37 = vpop.f32.mrf.mxu2 }
 0x2ed   : > { %3994 = vmatmul.msk.f32.gmra.mxu3 %vm771_vm1, %v6933_v13  ;;  %v2735_v13 = vrot.slane %v5934_v41, 1 }
 0x2ee   : > { %3976 = vmatmul.msk.f32.gmra.mxu0 %vm771_vm1, %v6887_v50  ;;  %v6938_v50 = vld [vmem:[#allocation105_spill] sm:$0xff] }
 0x2ef   : > { %v2251_v34 = vadd.f32 %v5915_v0, %v6938_v50  ;;  %v2527_v23 = vpop.f32.mrf.mxu1 }
 0x2f0   : > { %v2362_v42 = vpop.f32.mrf.mxu3 }
 0x2f1   : > { %v2410_v53 = vadd.f32 %v2362_v42, %v2250_v49  ;;  %v6939_v49 = vld [vmem:[#allocation19_spill] sm:$0xff]  ;;  %v6100_v0 = vpop.f32.mrf.mxu0 }
 0x2f2   : > { %4029 = vmatmul.msk.f32.gmra.mxu1 %vm771_vm1, %v6936_v25  ;;  %v6940_v42 = vmax.f32 %v6939_v49, 0.0  ;;  %v6942_v25 = vld [vmem:[#allocation106_spill] sm:$0xff]  ;;  %v6943_v49 = vld [vmem:[#allocation20_spill] sm:$0xff] }
 0x2f3   : > { %v6078_v48 = vadd.f32 %v2521_v29, %v2410_v53 }
 0x2f5   : > { %3995 = vmatmul.msk.f32.gmra.mxu3 %vm771_vm1, %v6937_v19  ;;  %v2252_v19 = vadd.f32 %v5941_v18, %v6942_v25 }
 0x2f6   : > { %3977 = vmatmul.msk.f32.gmra.mxu0 %vm771_vm1, %v6890_v40  ;;  %v2736_v40 = vsel %vm1364_vm3, %v2734_v22, %v2735_v13  ;;  %v6945_v22 = vld [vmem:[#allocation52_spill] sm:$0xff] }
 0x2f8   : > { %v2365_v39 = vpop.f32.mrf.mxu3 }
 0x2f9   : > { %v2411_v29 = vadd.f32 %v2365_v39, %v2251_v34  ;;  %v6106_v34 = vpop.f32.mrf.mxu2 }
 0x2fa   : > { %4030 = vmatmul.msk.f32.gmra.mxu1 %vm771_vm1, %v6940_v42  ;;  %v2530_v42 = vpop.f32.mrf.mxu1 }
 0x2fb   : > { %v6095_v53 = vadd.f32 %v2524_v58, %v2411_v29  ;;  %v6944_v58 = vmax.f32 %v6943_v49, 0.0 }
 0x2fd   : > { %3996 = vmatmul.msk.f32.gmra.mxu3 %vm771_vm1, %v6941_v21  ;;  %v6119_v21 = vpop.f32.mrf.mxu0 }
 0x2fe   : > { %3978 = vmatmul.msk.f32.gmra.mxu0 %vm771_vm1, %v6893_v63  ;;  %v6946_v63 = vld [vmem:[#allocation107_spill] sm:$0xff] }
 0x2ff   : > { %v2253_v18 = vadd.f32 %v5961_v7, %v6946_v63 }
 0x300   : > { %v2368_v50 = vpop.f32.mrf.mxu3 }
 0x301   : > { %v2412_v39 = vadd.f32 %v2368_v50, %v2252_v19  ;;  %v6947_v50 = vld [vmem:[#allocation21_spill] sm:$0xff] }
 0x302   : > { %4031 = vmatmul.msk.f32.gmra.mxu1 %vm771_vm1, %v6944_v58  ;;  %v6948_v49 = vmax.f32 %v6947_v50, 0.0  ;;  %v6950_v58 = vld [vmem:[#allocation54_spill] sm:$0xff] }
 0x303   : > { %v6111_v29 = vadd.f32 %v2527_v23, %v2412_v39  ;;  %v6124_v23 = vpop.f32.mrf.mxu2  ;;  %v6952_v50 = vld [vmem:[#allocation22_spill] sm:$0xff] }
 0x305   : > { %3997 = vmatmul.msk.f32.gmra.mxu3 %vm771_vm1, %v6945_v22  ;;  %v2533_v22 = vpop.f32.mrf.mxu1 }
 0x306   : > { %3979 = vmatmul.msk.f32.gmra.mxu0 %vm771_vm1, %v5512_v57  ;;  %v6951_v57 = vld [vmem:[#allocation49_spill] sm:$0xff] }
 0x307   : > { %v2254_v7 = vadd.f32 %v5978_v5, %v6951_v57 }
 0x308   : > { %v2371_v25 = vpop.f32.mrf.mxu3 }
 0x309   : > { %v2413_v19 = vadd.f32 %v2371_v25, %v2253_v18  ;;  %v6134_v25 = vpop.f32.mrf.mxu0 }
 0x30a   : > { %4032 = vmatmul.msk.f32.gmra.mxu1 %vm771_vm1, %v6948_v49  ;;  %v6953_v49 = vmax.f32 %v6952_v50, 0.0 }
 0x30b   : > { %v6126_v39 = vadd.f32 %v2530_v42, %v2413_v19  ;;  %v6141_v19 = vpop.f32.mrf.mxu2 }
 0x30d   : > { %6949 = vst [vmem:[#allocation61_spill] sm:$0xff] %v6126_v39  ;;  %3998 = vmatmul.msk.f32.gmra.mxu3 %vm771_vm1, %v6950_v58  ;;  %v6955_v58 = vld [vmem:[#allocation57_spill] sm:$0xff]  ;;  %v2536_v57 = vpop.f32.mrf.mxu1  ;;  %v6957_v39 = vld [vmem:[#allocation23_spill] sm:$0xff] }
 0x30e   : > { %3980 = vmatmul.msk.f32.gmra.mxu0 %vm771_vm1, %v5924_v3  ;;  %v6956_v3 = vld [vmem:[#allocation51_spill] sm:$0xff]  ;;  %v6958_v50 = vmax.f32 %v6957_v39, 0.0 }
 0x30f   : > { %v2255_v5 = vadd.f32 %v5991_v8, %v6956_v3 }
 0x310   : > { %v2374_v63 = vpop.f32.mrf.mxu3 }
 0x311   : > { %v2414_v18 = vadd.f32 %v2374_v63, %v2254_v7 }
 0x312   : > { %4033 = vmatmul.msk.f32.gmra.mxu1 %vm771_vm1, %v6953_v49  ;;  %v6156_v49 = vld [vmem:[#allocation2 + $0x1a8] sm:$0x3] }
 0x313   : > { %v6139_v42 = vadd.f32 %v2533_v22, %v2414_v18  ;;  %v6154_v18 = vpop.f32.mrf.mxu0  ;;  %v6163_v3 = vpop.f32.mrf.mxu2  ;;  %v2737_v39 = vrot.slane %v6156_v49, 1 }
 0x315   : > { %6954 = vst [vmem:[#allocation68_spill] sm:$0xff] %v6139_v42  ;;  %3999 = vmatmul.msk.f32.gmra.mxu3 %vm771_vm1, %v6955_v58  ;;  %v6960_v58 = vld [vmem:[#allocation60_spill] sm:$0xff]  ;;  %v6964_v42 = vld [vmem:[#allocation63_spill] sm:$0xff] }
 0x316   : > { %3981 = vmatmul.msk.f32.gmra.mxu0 %vm771_vm1, %v5944_v62  ;;  %v6961_v62 = vld [vmem:[#allocation53_spill] sm:$0xff] }
 0x317   : > { %v2256_v8 = vadd.f32 %v6009_v20, %v6961_v62  ;;  %v6965_v20 = vld [vmem:[#allocation56_spill] sm:$0xff] }
 0x318   : > { %v2377_v7 = vpop.f32.mrf.mxu3  ;;  %v2257_v62 = vadd.f32 %v6026_v32, %v6965_v20 }
 0x319   : > { %v2415_v63 = vadd.f32 %v2377_v7, %v2255_v5 }
 0x31a   : > { %4034 = vmatmul.msk.f32.gmra.mxu1 %vm771_vm1, %v6958_v50 }
 0x31b   : > { %v6152_v22 = vadd.f32 %v2536_v57, %v2415_v63  ;;  %v2539_v57 = vpop.f32.mrf.mxu1  ;;  %v6962_v63 = vld [vmem:[#allocation24_spill] sm:$0xff] }
 0x31c   : > { %v6963_v50 = vmax.f32 %v6962_v63, 0.0 }
 0x31d   : > { %6959 = vst [vmem:[#allocation64_spill] sm:$0xff] %v6152_v22  ;;  %4000 = vmatmul.msk.f32.gmra.mxu3 %vm771_vm1, %v6960_v58  ;;  %v2738_v58 = vsel %vm1364_vm3, %v2735_v13, %v2737_v39  ;;  %v2861_v13 = vadd.f32 %v6045_v14, %v5733_v6 }
 0x31e   : > { %3982 = vmatmul.msk.f32.gmra.mxu0 %vm771_vm1, %v2736_v40  ;;  %v6174_v40 = vpop.f32.mrf.mxu0 }
 0x320   : > { %v2380_v5 = vpop.f32.mrf.mxu3 }
 0x321   : > { %v2416_v7 = vadd.f32 %v2380_v5, %v2256_v8  ;;  %v6179_v5 = vpop.f32.mrf.mxu2 }
 0x322   : > { %4035 = vmatmul.msk.f32.gmra.mxu1 %vm771_vm1, %v6963_v50  ;;  %v6967_v50 = vld [vmem:[#allocation25_spill] sm:$0xff] }
 0x323   : > { %v6169_v22 = vadd.f32 %v2539_v57, %v2416_v7  ;;  %v6968_v7 = vmax.f32 %v6967_v50, 0.0  ;;  %v6198_v57 = vld [vmem:[%s6589_s10] ss:$0 sm:$0xff] }
 0x325   : > { %4001 = vmatmul.msk.f32.gmra.mxu3 %vm771_vm1, %v6964_v42  ;;  %v6193_v42 = vld [vmem:[%s6588_s9] ss:$0 sm:$0xff] }
 0x326   : > { %3983 = vmatmul.msk.f32.gmra.mxu0 %vm771_vm1, %v2738_v58  ;;  %v6969_v58 = vld [vmem:[#allocation26_spill] sm:$0xff] }
 0x327   : > { %v6970_v20 = vmax.f32 %v6969_v58, 0.0 }
 0x328   : > { %v2383_v8 = vpop.f32.mrf.mxu3 }
 0x329   : > { %v6181_v63 = vadd.f32 %v2383_v8, %v2257_v62  ;;  %v6971_v62 = vld [vmem:[#allocation59_spill] sm:$0xff] }
 0x32a   : > { %4036 = vmatmul.msk.f32.gmra.mxu1 %vm771_vm1, %v6968_v7  ;;  %v2862_v8 = vadd.f32 %v6060_v10, %v6971_v62  ;;  %v2863_v10 = vadd.f32 %v6080_v17, %v5759_v35 }
 0x32b   : > { %6966 = vst [vmem:[#allocation71_spill] sm:$0xff] %v6181_v63  ;;  %v6974_v63 = vld [vmem:[#allocation72_spill] sm:$0xff] }
 0x32d   : > { %4002 = vmatmul.msk.f32.gmra.mxu3 %vm771_vm1, %v6857_v26  ;;  %v6203_v26 = vpop.f32.mrf.mxu2 }
 0x330   : > { %v2924_v32 = vpop.f32.mrf.mxu3 }
 0x331   : > { %v3020_v39 = vadd.f32 %v2924_v32, %v2861_v13  ;;  %v6972_v32 = vld [vmem:[#allocation27_spill] sm:$0xff] }
 0x332   : > { %4037 = vmatmul.msk.f32.gmra.mxu1 %vm771_vm1, %v6970_v20  ;;  %v6973_v58 = vmax.f32 %v6972_v32, 0.0 }
 0x333   : > { %v3056_v6 = vmul.f32 %v6193_v42, %v3020_v39 }
 0x335   : > { %v3092_v14 = vadd.f32 %v6198_v57, %v3056_v6  ;;  %4003 = vmatmul.msk.f32.gmra.mxu3 %vm771_vm1, %v6860_v45  ;;  %v6216_v39 = vpop.f32.mrf.mxu2  ;;  %v6221_v45 = vpop.f32.mrf.mxu0 }
 0x337   : > { %v3124_v50 = vmax.f32 %v3092_v14, 0.0 }
 0x338   : > { %v2927_v7 = vpop.f32.mrf.mxu3 }
 0x339   : > { %v3021_v13 = vadd.f32 %v2927_v7, %v2862_v8  ;;  %4052 = vmatmul.msk.f32.vlgmr.msrb.gmra.mxu2 %vm771_vm1, %v3124_v50  ;;  %v6975_v50 = vld [vmem:[#allocation28_spill] sm:$0xff] }
 0x33a   : > { %4038 = vmatmul.msk.f32.gmra.mxu1 %vm771_vm1, %v6973_v58  ;;  %v6976_v7 = vmax.f32 %v6975_v50, 0.0  ;;  %v6977_v58 = vld [vmem:[#allocation75_spill] sm:$0xff] }
 0x33b   : > { %v3057_v20 = vmul.f32 %v6193_v42, %v3021_v13 }
 0x33d   : > { %v3093_v6 = vadd.f32 %v6198_v57, %v3057_v20  ;;  %4004 = vmatmul.msk.f32.gmra.mxu3 %vm771_vm1, %v6974_v63  ;;  %v2864_v63 = vadd.f32 %v6100_v0, %v5773_v43  ;;  %v6235_v35 = vpop.f32.mrf.mxu2  ;;  %v2792_v20 = vpop.f32.mrf.mxu0  ;;  %v2865_v43 = vadd.f32 %v6119_v21, %v5787_v54 }
 0x33f   : > { %v3125_v14 = vmax.f32 %v3093_v6, 0.0 }
 0x340   : > { %v2930_v62 = vpop.f32.mrf.mxu3 }
 0x341   : > { %v3022_v8 = vadd.f32 %v2930_v62, %v2863_v10  ;;  %4053 = vmatmul.msk.f32.gmra.mxu2 %vm771_vm1, %v3125_v14  ;;  %v6978_v14 = vld [vmem:[#allocation29_spill] sm:$0xff] }
 0x342   : > { %4039 = vmatmul.msk.f32.gmra.mxu1 %vm771_vm1, %v6976_v7  ;;  %v6979_v62 = vmax.f32 %v6978_v14, 0.0 }
 0x343   : > { %v3058_v13 = vmul.f32 %v6193_v42, %v3022_v8 }
 0x345   : > { %v3094_v32 = vadd.f32 %v6198_v57, %v3058_v13  ;;  %4005 = vmatmul.msk.f32.gmra.mxu3 %vm771_vm1, %v6977_v58  ;;  %v6247_v13 = vpop.f32.mrf.mxu2  ;;  %v2795_v58 = vpop.f32.mrf.mxu0 }
 0x347   : > { %v3126_v17 = vmax.f32 %v3094_v32, 0.0 }
 0x348   : > { %v2933_v6 = vpop.f32.mrf.mxu3 }
 0x349   : > { %v3023_v10 = vadd.f32 %v2933_v6, %v2864_v63  ;;  %4054 = vmatmul.msk.f32.gmra.mxu2 %vm771_vm1, %v3126_v17  ;;  %v6980_v63 = vld [vmem:[#allocation30_spill] sm:$0xff] }
 0x34a   : > { %4040 = vmatmul.msk.f32.gmra.mxu1 %vm771_vm1, %v6979_v62  ;;  %v6981_v17 = vmax.f32 %v6980_v63, 0.0 }
 0x34b   : > { %v3059_v8 = vmul.f32 %v6193_v42, %v3023_v10 }
 0x34d   : > { %v3095_v50 = vadd.f32 %v6198_v57, %v3059_v8  ;;  %4006 = vmatmul.msk.f32.gmra.mxu3 %vm771_vm1, %v6870_v44  ;;  %v6982_v44 = vld [vmem:[#allocation55_spill] sm:$0xff]  ;;  %v6260_v8 = vpop.f32.mrf.mxu1 }
 0x34e   : > { %v2866_v54 = vadd.f32 %v6134_v25, %v6982_v44  ;;  %v6985_v25 = vld [vmem:[#allocation66_spill] sm:$0xff] }
 0x34f   : > { %v3127_v0 = vmax.f32 %v3095_v50, 0.0  ;;  %v6983_v50 = vld [vmem:[#allocation32_spill] sm:$0xff]  ;;  %v2867_v63 = vadd.f32 %v6154_v18, %v6985_v25 }
 0x350   : > { %v2936_v7 = vpop.f32.mrf.mxu3 }
 0x351   : > { %v3024_v32 = vadd.f32 %v2936_v7, %v2865_v43  ;;  %4055 = vmatmul.msk.f32.gmra.mxu2 %vm771_vm1, %v3127_v0  ;;  %v6984_v43 = vmax.f32 %v6983_v50, 0.0  ;;  %v6265_v0 = vpop.f32.mrf.mxu2 }
 0x352   : > { %4041 = vmatmul.msk.f32.gmra.mxu1 %vm771_vm1, %v6981_v17 }
 0x353   : > { %v3060_v6 = vmul.f32 %v6193_v42, %v3024_v32  ;;  %v2798_v32 = vpop.f32.mrf.mxu0 }
 0x355   : > { %v3096_v10 = vadd.f32 %v6198_v57, %v3060_v6  ;;  %4007 = vmatmul.msk.f32.gmra.mxu3 %vm771_vm1, %v6873_v47 }
 0x357   : > { %v3128_v21 = vmax.f32 %v3096_v10, 0.0 }
 0x358   : > { %v2939_v14 = vpop.f32.mrf.mxu3 }
 0x359   : > { %v3025_v62 = vadd.f32 %v2939_v14, %v2866_v54  ;;  %4056 = vmatmul.msk.f32.gmra.mxu2 %vm771_vm1, %v3128_v21  ;;  %v6275_v54 = vpop.f32.mrf.mxu2 }
 0x35a   : > { %4042 = vmatmul.msk.f32.gmra.mxu1 %vm771_vm1, %v6984_v43 }
 0x35b   : > { %v3061_v7 = vmul.f32 %v6193_v42, %v3025_v62  ;;  %v2801_v14 = vpop.f32.mrf.mxu0 }
 0x35d   : > { %v3097_v47 = vadd.f32 %v6198_v57, %v3061_v7  ;;  %4008 = vmatmul.msk.f32.gmra.mxu3 %vm771_vm1, %v6877_v24  ;;  %v2868_v24 = vadd.f32 %v6174_v40, %v5827_v12  ;;  %v2709_v7 = vadd.f32 %v6017_v9, %v5841_v61  ;;  %v2710_v61 = vadd.f32 %v6032_v28, %v5853_v15 }
 0x35e   : > { %v2711_v28 = vadd.f32 %v6050_v4, %v5867_v27  ;;  %v6987_v4 = vld [vmem:[#allocation62_spill] sm:$0xff] }
 0x35f   : > { %v3129_v17 = vmax.f32 %v3097_v47, 0.0 }
 0x360   : > { %v2942_v6 = vpop.f32.mrf.mxu3 }
 0x361   : > { %v3026_v10 = vadd.f32 %v2942_v6, %v2867_v63  ;;  %4057 = vmatmul.msk.f32.gmra.mxu2 %vm771_vm1, %v3129_v17  ;;  %v6290_v25 = vpop.f32.mrf.mxu2 }
 0x363   : > { %v3062_v44 = vmul.f32 %v6193_v42, %v3026_v10  ;;  %v2804_v40 = vpop.f32.mrf.mxu0 }
 0x365   : > { %v3098_v21 = vadd.f32 %v6198_v57, %v3062_v44  ;;  %4009 = vmatmul.msk.f32.gmra.mxu3 %vm771_vm1, %v6881_v56  ;;  %v2869_v56 = vadd.f32 %v6221_v45, %v2709_v7  ;;  %v2893_v44 = vrot.slane %v5919_v33, 2 }
 0x367   : > { %v3130_v62 = vmax.f32 %v3098_v21, 0.0  ;;  %v2894_v21 = vrot.slane %v5934_v41, 2 }
 0x368   : > { %v2945_v18 = vpop.f32.mrf.mxu3 }
 0x369   : > { %v3027_v50 = vadd.f32 %v2945_v18, %v2868_v24  ;;  %4058 = vmatmul.msk.f32.gmra.mxu2 %vm771_vm1, %v3130_v62  ;;  %v6301_v24 = vpop.f32.mrf.mxu2  ;;  %v2895_v33 = vsel %vm1807_vm4, %v2893_v44, %v2894_v21 }
 0x36b   : > { %v3063_v43 = vmul.f32 %v6193_v42, %v3027_v50  ;;  %v2807_v18 = vpop.f32.mrf.mxu0  ;;  %v2871_v50 = vadd.f32 %v2795_v58, %v2711_v28 }
 0x36d   : > { %v3099_v47 = vadd.f32 %v6198_v57, %v3063_v43  ;;  %4010 = vmatmul.msk.f32.gmra.mxu3 %vm771_vm1, %v6884_v59  ;;  %v2870_v59 = vadd.f32 %v2792_v20, %v2710_v61  ;;  %v6986_v20 = vld [vmem:[#allocation95_spill] sm:$0xff] }
 0x36f   : > { %v3131_v12 = vmax.f32 %v3099_v47, 0.0 }
 0x370   : > { %v2948_v63 = vpop.f32.mrf.mxu3 }
 0x371   : > { %v3028_v17 = vadd.f32 %v2948_v63, %v2869_v56  ;;  %4059 = vmatmul.msk.f32.gmra.mxu2 %vm771_vm1, %v3131_v12  ;;  %v6314_v56 = vpop.f32.mrf.mxu2  ;;  %v2712_v63 = vadd.f32 %v6067_v51, %v6987_v4 }
 0x373   : > { %v3064_v6 = vmul.f32 %v6193_v42, %v3028_v17  ;;  %v2810_v27 = vpop.f32.mrf.mxu0  ;;  %v2872_v61 = vadd.f32 %v2798_v32, %v2712_v63 }
 0x375   : > { %v3100_v9 = vadd.f32 %v6198_v57, %v3064_v6  ;;  %4011 = vmatmul.msk.f32.gmra.mxu3 %vm771_vm1, %v5471_v38  ;;  %v6988_v6 = vld [vmem:[#allocation96_spill] sm:$0xff] }
 0x377   : > { %v3132_v45 = vmax.f32 %v3100_v9, 0.0 }
 0x378   : > { %v2951_v10 = vpop.f32.mrf.mxu3 }
 0x379   : > { %v3029_v62 = vadd.f32 %v2951_v10, %v2870_v59  ;;  %4060 = vmatmul.msk.f32.gmra.mxu2 %vm771_vm1, %v3132_v45  ;;  %v6989_v10 = vld [vmem:[#allocation69_spill] sm:$0xff] }
 0x37a   : > { %v2713_v44 = vadd.f32 %v6088_v37, %v6989_v10 }
 0x37b   : > { %v3065_v15 = vmul.f32 %v6193_v42, %v3029_v62  ;;  %v6326_v62 = vpop.f32.mrf.mxu2  ;;  %v2813_v28 = vpop.f32.mrf.mxu0 }
 0x37d   : > { %v3101_v38 = vadd.f32 %v6198_v57, %v3065_v15  ;;  %4012 = vmatmul.msk.f32.gmra.mxu3 %vm771_vm1, %v6986_v20  ;;  %v6990_v15 = vld [vmem:[#allocation58_spill] sm:$0xff] }
 0x37f   : > { %v3133_v43 = vmax.f32 %v3101_v38, 0.0  ;;  %v2873_v38 = vadd.f32 %v2801_v14, %v2713_v44 }
 0x380   : > { %v2954_v7 = vpop.f32.mrf.mxu3 }
 0x381   : > { %v3030_v47 = vadd.f32 %v2954_v7, %v2871_v50  ;;  %4061 = vmatmul.msk.f32.gmra.mxu2 %vm771_vm1, %v3133_v43  ;;  %v2714_v7 = vadd.f32 %v6106_v34, %v5921_v1  ;;  %v3178_v34 = vpop.f32.mrf.mxu1 }
 0x383   : > { %v3066_v12 = vmul.f32 %v6193_v42, %v3030_v47  ;;  %v6991_v47 = vld [vmem:[#allocation65_spill] sm:$0xff]  ;;  %v2874_v4 = vadd.f32 %v2804_v40, %v2714_v7  ;;  %v2816_v14 = vpop.f32.mrf.mxu0  ;;  %v2896_v40 = vrot.slane %v6156_v49, 2 }
 0x385   : > { %v3102_v17 = vadd.f32 %v6198_v57, %v3066_v12  ;;  %4013 = vmatmul.msk.f32.gmra.mxu3 %vm771_vm1, %v6988_v6  ;;  %v6338_v12 = vpop.f32.mrf.mxu2 }
 0x387   : > { %v3134_v58 = vmax.f32 %v3102_v17, 0.0 }
 0x388   : > { %v2957_v9 = vpop.f32.mrf.mxu3 }
 0x389   : > { %v3031_v59 = vadd.f32 %v2957_v9, %v2872_v61  ;;  %4062 = vmatmul.msk.f32.gmra.mxu2 %vm771_vm1, %v3134_v58  ;;  %v2715_v58 = vadd.f32 %v6124_v23, %v5939_v55  ;;  %v6992_v9 = vld [vmem:[#allocation34_spill] sm:$0xff]  ;;  %v2897_v23 = vsel %vm1807_vm4, %v2894_v21, %v2896_v40  ;;  %v6998_v40 = vld [vmem:[#allocation40_spill] sm:$0xff] }
 0x38b   : > { %v3067_v45 = vmul.f32 %v6193_v42, %v3031_v59  ;;  %v6993_v59 = vmax.f32 %v6992_v9, 0.0  ;;  %v2819_v55 = vpop.f32.mrf.mxu0 }
 0x38d   : > { %v3103_v51 = vadd.f32 %v6198_v57, %v3067_v45  ;;  %4014 = vmatmul.msk.f32.gmra.mxu3 %vm771_vm1, %v6990_v15  ;;  %4043 = vmatmul.msk.f32.gmra.mxu1 %vm771_vm1, %v6993_v59  ;;  %v2875_v45 = vadd.f32 %v2807_v18, %v2715_v58  ;;  %v6351_v15 = vpop.f32.mrf.mxu2  ;;  %v3181_v18 = vpop.f32.mrf.mxu1 }
 0x38f   : > { %v3135_v32 = vmax.f32 %v3103_v51, 0.0 }
 0x390   : > { %v2960_v20 = vpop.f32.mrf.mxu3 }
 0x391   : > { %v3032_v50 = vadd.f32 %v2960_v20, %v2873_v38  ;;  %4063 = vmatmul.msk.f32.gmra.mxu2 %vm771_vm1, %v3135_v32  ;;  %v2716_v38 = vadd.f32 %v6141_v19, %v5957_v2  ;;  %v6994_v32 = vld [vmem:[#allocation36_spill] sm:$0xff]  ;;  %v2717_v19 = vadd.f32 %v6163_v3, %v5970_v11  ;;  %v2718_v11 = vadd.f32 %v6179_v5, %v5983_v16 }
 0x392   : > { %v6995_v20 = vmax.f32 %v6994_v32, 0.0  ;;  %v2719_v5 = vadd.f32 %v6203_v26, %v5996_v60 }
 0x393   : > { %v3068_v43 = vmul.f32 %v6193_v42, %v3032_v50  ;;  %v2876_v50 = vadd.f32 %v2810_v27, %v2716_v38  ;;  %v2822_v2 = vpop.f32.mrf.mxu0  ;;  %v2877_v27 = vadd.f32 %v2813_v28, %v2717_v19 }
 0x395   : > { %v3104_v37 = vadd.f32 %v6198_v57, %v3068_v43  ;;  %4015 = vmatmul.msk.f32.gmra.mxu3 %vm771_vm1, %v6991_v47  ;;  %4044 = vmatmul.msk.f32.gmra.mxu1 %vm771_vm1, %v6995_v20  ;;  %v6365_v21 = vpop.f32.mrf.mxu2  ;;  %v7000_v20 = vld [vmem:[#allocation42_spill] sm:$0xff] }
 0x397   : > { %v3136_v63 = vmax.f32 %v3104_v37, 0.0 }
 0x398   : > { %v2963_v17 = vpop.f32.mrf.mxu3 }
 0x399   : > { %v3033_v6 = vadd.f32 %v2963_v17, %v2874_v4  ;;  %4064 = vmatmul.msk.f32.gmra.mxu2 %vm771_vm1, %v3136_v63  ;;  %v3184_v4 = vpop.f32.mrf.mxu1  ;;  %v6996_v63 = vld [vmem:[#allocation38_spill] sm:$0xff] }
 0x39a   : > { %v6997_v17 = vmax.f32 %v6996_v63, 0.0  ;;  %v7002_v63 = vld [vmem:[#allocation44_spill] sm:$0xff] }
 0x39b   : > { %v3069_v61 = vmul.f32 %v6193_v42, %v3033_v6  ;;  %v2825_v28 = vpop.f32.mrf.mxu0 }
 0x39d   : > { %v3105_v1 = vadd.f32 %v6198_v57, %v3069_v61  ;;  %4016 = vmatmul.msk.f32.gmra.mxu3 %vm771_vm1, %v2895_v33  ;;  %4045 = vmatmul.msk.f32.gmra.mxu1 %vm771_vm1, %v6997_v17  ;;  %v6376_v9 = vpop.f32.mrf.mxu2  ;;  %v7003_v17 = vmax.f32 %v7002_v63, 0.0 }
 0x39f   : > { %v3137_v10 = vmax.f32 %v3105_v1, 0.0 }
 0x3a0   : > { %v2966_v44 = vpop.f32.mrf.mxu3 }
 0x3a1   : > { %v3034_v51 = vadd.f32 %v2966_v44, %v2875_v45  ;;  %4065 = vmatmul.msk.f32.gmra.mxu2 %vm771_vm1, %v3137_v10  ;;  %v3187_v59 = vpop.f32.mrf.mxu1  ;;  %v6999_v45 = vmax.f32 %v6998_v40, 0.0  ;;  %v2878_v10 = vadd.f32 %v2816_v14, %v2718_v11  ;;  %v7001_v14 = vmax.f32 %v7000_v20, 0.0 }
 0x3a3   : > { %v3070_v33 = vmul.f32 %v6193_v42, %v3034_v51 }
 0x3a5   : > { %v3106_v49 = vadd.f32 %v6198_v57, %v3070_v33  ;;  %4017 = vmatmul.msk.f32.gmra.mxu3 %vm771_vm1, %v2897_v23  ;;  %4046 = vmatmul.msk.f32.gmra.mxu1 %vm771_vm1, %v6999_v45 }
 0x3a7   : > { %v3138_v43 = vmax.f32 %v3106_v49, 0.0 }
 0x3a8   : > { %v2969_v7 = vpop.f32.mrf.mxu3 }
 0x3a9   : > { %v3035_v41 = vadd.f32 %v2969_v7, %v2876_v50  ;;  %4066 = vmatmul.msk.f32.gmra.mxu2 %vm771_vm1, %v3138_v43  ;;  %v3190_v32 = vpop.f32.mrf.mxu1  ;;  %v2879_v50 = vadd.f32 %v2819_v55, %v2719_v5  ;;  %v2828_v7 = vpop.f32.mrf.mxu0 }
 0x3ab   : > { %v3071_v37 = vmul.f32 %v6193_v42, %v3035_v41 }
 0x3ad   : > { %v3107_v47 = vadd.f32 %v6198_v57, %v3071_v37  ;;  %4047 = vmatmul.msk.f32.gmra.mxu1 %vm771_vm1, %v7001_v14 }
 0x3af   : > { %v3139_v6 = vmax.f32 %v3107_v47, 0.0 }
 0x3b0   : > { %v2972_v61 = vpop.f32.mrf.mxu3 }
 0x3b1   : > { %v3036_v58 = vadd.f32 %v2972_v61, %v2877_v27  ;;  %4067 = vmatmul.msk.f32.gmra.mxu2 %vm771_vm1, %v3139_v6  ;;  %v3193_v47 = vpop.f32.mrf.mxu1 }
 0x3b3   : > { %v3072_v1 = vmul.f32 %v6193_v42, %v3036_v58 }
 0x3b5   : > { %v3108_v3 = vadd.f32 %v6198_v57, %v3072_v1  ;;  %4048 = vmatmul.msk.f32.gmra.mxu1 %vm771_vm1, %v7003_v17  ;;  %v2831_v1 = vpop.f32.mrf.mxu0 }
 0x3b7   : > { %v3140_v44 = vmax.f32 %v3108_v3, 0.0 }
 0x3b8   : > { %v2975_v51 = vpop.f32.mrf.mxu3 }
 0x3b9   : > { %v3037_v23 = vadd.f32 %v2975_v51, %v2878_v10  ;;  %4068 = vmatmul.msk.f32.gmra.mxu2 %vm771_vm1, %v3140_v44  ;;  %v3196_v40 = vpop.f32.mrf.mxu1 }
 0x3bb   : > { %v3073_v33 = vmul.f32 %v6193_v42, %v3037_v23 }
 0x3bc   : > { %v3390_v16 = vpop.f32.mrf.mxu2 }
 0x3bd   : > { %v3109_v38 = vadd.f32 %v6198_v57, %v3073_v33  ;;  %v3391_v49 = vadd.f32 %v3390_v16, %v3178_v34  ;;  %v2720_v34 = vadd.f32 %v6216_v39, %v6007_v46 }
 0x3bf   : > { %v3141_v43 = vmax.f32 %v3109_v38, 0.0  ;;  %3487 = vst.msk [vmem:[%s6395_s17] sm:$0xff] %vm3486_vm5, %v3391_v49  ;;  %v2880_v27 = vadd.f32 %v2822_v2, %v2720_v34  ;;  %v7004_v2 = vld [vmem:[#allocation46_spill] sm:$0xff] }
 0x3c0   : > { %v2978_v41 = vpop.f32.mrf.mxu3  ;;  %v7005_v45 = vmax.f32 %v7004_v2, 0.0 }
 0x3c1   : > { %v3038_v37 = vadd.f32 %v2978_v41, %v2879_v50  ;;  %4069 = vmatmul.msk.f32.gmra.mxu2 %vm771_vm1, %v3141_v43  ;;  %v3199_v38 = vpop.f32.mrf.mxu1 }
 0x3c2   : > { %4049 = vmatmul.msk.f32.gmra.mxu1 %vm771_vm1, %v7005_v45 }
 0x3c3   : > { %v3074_v60 = vmul.f32 %v6193_v42, %v3038_v37 }
 0x3c4   : > { %v3393_v26 = vpop.f32.mrf.mxu2 }
 0x3c5   : > { %v3110_v55 = vadd.f32 %v6198_v57, %v3074_v60  ;;  %v3394_v19 = vadd.f32 %v3393_v26, %v3181_v18  ;;  %v2721_v18 = vadd.f32 %v6235_v35, %v6022_v30  ;;  %v2834_v30 = vpop.f32.mrf.mxu0 }
 0x3c7   : > { %v3142_v6 = vmax.f32 %v3110_v55, 0.0  ;;  %3488 = vst.msk [vmem:[%s6395_s17 + $0x8] sm:$0xff] %vm3486_vm5, %v3394_v19  ;;  %v2881_v10 = vadd.f32 %v2825_v28, %v2721_v18  ;;  %v7006_v28 = vld [vmem:[#allocation48_spill] sm:$0xff] }
 0x3c8   : > { %v2981_v61 = vpop.f32.mrf.mxu3  ;;  %v7007_v49 = vmax.f32 %v7006_v28, 0.0 }
 0x3c9   : > { %v3039_v58 = vadd.f32 %v2981_v61, %v2880_v27  ;;  %4070 = vmatmul.msk.f32.gmra.mxu2 %vm771_vm1, %v3142_v6  ;;  %v3202_v60 = vpop.f32.mrf.mxu1 }
 0x3ca   : > { %4050 = vmatmul.msk.f32.gmra.mxu1 %vm771_vm1, %v7007_v49 }
 0x3cb   : > { %v3075_v46 = vmul.f32 %v6193_v42, %v3039_v58 }
 0x3cc   : > { %v3396_v39 = vpop.f32.mrf.mxu2 }
 0x3cd   : > { %v3111_v11 = vadd.f32 %v6198_v57, %v3075_v46  ;;  %v3397_v3 = vadd.f32 %v3396_v39, %v3184_v4  ;;  %v2722_v4 = vadd.f32 %v6247_v13, %v6037_v36  ;;  %v2723_v13 = vadd.f32 %v6265_v0, %v6052_v52  ;;  %v2837_v26 = vpop.f32.mrf.mxu0 }
 0x3ce   : > { %v2724_v52 = vadd.f32 %v6275_v54, %v6065_v31  ;;  %v2725_v31 = vadd.f32 %v6290_v25, %v6078_v48  ;;  %v2726_v48 = vadd.f32 %v6301_v24, %v6095_v53  ;;  %v2727_v53 = vadd.f32 %v6314_v56, %v6111_v29 }
 0x3cf   : > { %v3143_v44 = vmax.f32 %v3111_v11, 0.0  ;;  %3489 = vst.msk [vmem:[%s6395_s17 + $0x10] sm:$0xff] %vm3486_vm5, %v3397_v3  ;;  %v2882_v20 = vadd.f32 %v2828_v7, %v2722_v4  ;;  %v2883_v7 = vadd.f32 %v2831_v1, %v2723_v13 }
 0x3d0   : > { %v2984_v51 = vpop.f32.mrf.mxu3  ;;  %v2884_v6 = vadd.f32 %v2834_v30, %v2724_v52  ;;  %v2885_v3 = vadd.f32 %v2837_v26, %v2725_v31  ;;  %v7009_v52 = vld [vmem:[#allocation68_spill] sm:$0xff] }
 0x3d1   : > { %v3040_v23 = vadd.f32 %v2984_v51, %v2881_v10  ;;  %4071 = vmatmul.msk.f32.gmra.mxu2 %vm771_vm1, %v3143_v44  ;;  %v3205_v27 = vpop.f32.mrf.mxu1  ;;  %v7010_v31 = vld [vmem:[#allocation64_spill] sm:$0xff] }
 0x3d3   : > { %v3076_v33 = vmul.f32 %v6193_v42, %v3040_v23 }
 0x3d4   : > { %v3399_v35 = vpop.f32.mrf.mxu2 }
 0x3d5   : > { %v3112_v16 = vadd.f32 %v6198_v57, %v3076_v33  ;;  %v3400_v5 = vadd.f32 %v3399_v35, %v3187_v59  ;;  %v2840_v58 = vpop.f32.mrf.mxu0 }
 0x3d6   : > { %v2886_v30 = vadd.f32 %v2840_v58, %v2726_v48 }
 0x3d7   : > { %v3144_v14 = vmax.f32 %v3112_v16, 0.0  ;;  %3490 = vst.msk [vmem:[%s6395_s17 + $0x18] sm:$0xff] %vm3486_vm5, %v3400_v5 }
 0x3d8   : > { %v2987_v50 = vpop.f32.mrf.mxu3 }
 0x3d9   : > { %v3041_v43 = vadd.f32 %v2987_v50, %v2882_v20  ;;  %4072 = vmatmul.msk.f32.gmra.mxu2 %vm771_vm1, %v3144_v14  ;;  %v3208_v11 = vpop.f32.mrf.mxu1 }
 0x3db   : > { %v3077_v41 = vmul.f32 %v6193_v42, %v3041_v43 }
 0x3dc   : > { %v3402_v36 = vpop.f32.mrf.mxu2 }
 0x3dd   : > { %v3113_v59 = vadd.f32 %v6198_v57, %v3077_v41  ;;  %v3403_v37 = vadd.f32 %v3402_v36, %v3190_v32  ;;  %v2843_v44 = vpop.f32.mrf.mxu0 }
 0x3de   : > { %v2887_v14 = vadd.f32 %v2843_v44, %v2727_v53 }
 0x3df   : > { %v3145_v34 = vmax.f32 %v3113_v59, 0.0  ;;  %3491 = vst.msk [vmem:[%s6395_s17 + $0x20] sm:$0xff] %vm3486_vm5, %v3403_v37  ;;  %v7008_v59 = vld [vmem:[#allocation61_spill] sm:$0xff] }
 0x3e0   : > { %v2990_v55 = vpop.f32.mrf.mxu3  ;;  %v2728_v37 = vadd.f32 %v6326_v62, %v7008_v59  ;;  %v2729_v62 = vadd.f32 %v6338_v12, %v7009_v52  ;;  %v2730_v12 = vadd.f32 %v6351_v15, %v7010_v31  ;;  %v2731_v15 = vadd.f32 %v6365_v21, %v6169_v22 }
 0x3e1   : > { %v3042_v19 = vadd.f32 %v2990_v55, %v2883_v7  ;;  %4073 = vmatmul.msk.f32.gmra.mxu2 %vm771_vm1, %v3145_v34  ;;  %v3211_v33 = vpop.f32.mrf.mxu1 }
 0x3e3   : > { %v3078_v63 = vmul.f32 %v6193_v42, %v3042_v19 }
 0x3e4   : > { %v3405_v17 = vpop.f32.mrf.mxu2 }
 0x3e5   : > { %v3114_v0 = vadd.f32 %v6198_v57, %v3078_v63  ;;  %v3406_v32 = vadd.f32 %v3405_v17, %v3193_v47  ;;  %v2846_v28 = vpop.f32.mrf.mxu0 }
 0x3e6   : > { %v2888_v7 = vadd.f32 %v2846_v28, %v2728_v37 }
 0x3e7   : > { %v3146_v61 = vmax.f32 %v3114_v0, 0.0  ;;  %3492 = vst.msk [vmem:[%s6395_s17 + $0x28] sm:$0xff] %vm3486_vm5, %v3406_v32 }
 0x3e8   : > { %v2993_v1 = vpop.f32.mrf.mxu3 }
 0x3e9   : > { %v3043_v46 = vadd.f32 %v2993_v1, %v2884_v6  ;;  %4074 = vmatmul.msk.f32.gmra.mxu2 %vm771_vm1, %v3146_v61  ;;  %v3214_v20 = vpop.f32.mrf.mxu1 }
 0x3eb   : > { %v3079_v39 = vmul.f32 %v6193_v42, %v3043_v46 }
 0x3ec   : > { %v3408_v18 = vpop.f32.mrf.mxu2 }
 0x3ed   : > { %v3115_v54 = vadd.f32 %v6198_v57, %v3079_v39  ;;  %v3409_v47 = vadd.f32 %v3408_v18, %v3196_v40  ;;  %v2849_v26 = vpop.f32.mrf.mxu0 }
 0x3ee   : > { %v2889_v6 = vadd.f32 %v2849_v26, %v2729_v62 }
 0x3ef   : > { %v3147_v2 = vmax.f32 %v3115_v54, 0.0  ;;  %3493 = vst.msk [vmem:[%s6395_s17 + $0x30] sm:$0xff] %vm3486_vm5, %v3409_v47 }
 0x3f0   : > { %v2996_v45 = vpop.f32.mrf.mxu3 }
 0x3f1   : > { %v3044_v10 = vadd.f32 %v2996_v45, %v2885_v3  ;;  %4075 = vmatmul.msk.f32.gmra.mxu2 %vm771_vm1, %v3147_v2 }
 0x3f3   : > { %v3080_v51 = vmul.f32 %v6193_v42, %v3044_v10 }
 0x3f4   : > { %v3411_v23 = vpop.f32.mrf.mxu2 }
 0x3f5   : > { %v3116_v25 = vadd.f32 %v6198_v57, %v3080_v51  ;;  %v3412_v40 = vadd.f32 %v3411_v23, %v3199_v38  ;;  %v2852_v58 = vpop.f32.mrf.mxu0 }
 0x3f6   : > { %v2890_v3 = vadd.f32 %v2852_v58, %v2730_v12 }
 0x3f7   : > { %v3148_v35 = vmax.f32 %v3116_v25, 0.0  ;;  %3494 = vst.msk [vmem:[%s6395_s17 + $0x38] sm:$0xff] %vm3486_vm5, %v3412_v40 }
 0x3f8   : > { %v2999_v4 = vpop.f32.mrf.mxu3 }
 0x3f9   : > { %v3045_v16 = vadd.f32 %v2999_v4, %v2886_v30  ;;  %4076 = vmatmul.msk.f32.gmra.mxu2 %vm771_vm1, %v3148_v35  ;;  %v7011_v4 = vld [vmem:[#allocation71_spill] sm:$0xff] }
 0x3fb   : > { %v3081_v5 = vmul.f32 %v6193_v42, %v3045_v16  ;;  %v2576_v16 = vadd.f32 %v6260_v8, %v7011_v4 }
 0x3fc   : > { %v3414_v49 = vpop.f32.mrf.mxu2 }
 0x3fd   : > { %v3117_v24 = vadd.f32 %v6198_v57, %v3081_v5  ;;  %v3415_v38 = vadd.f32 %v3414_v49, %v3202_v60  ;;  %v3217_v60 = vpop.f32.mrf.mxu1  ;;  %v2855_v44 = vpop.f32.mrf.mxu0  ;;  %v2732_v21 = vadd.f32 %v6376_v9, %v2576_v16 }
 0x3ff   : > { %v3149_v50 = vmax.f32 %v3117_v24, 0.0  ;;  %3495 = vst.msk [vmem:[%s6395_s17 + $0x40] sm:$0xff] %vm3486_vm5, %v3415_v38 }
 0x400   : > { %v3002_v43 = vpop.f32.mrf.mxu3 }
 0x401   : > { %v3046_v41 = vadd.f32 %v3002_v43, %v2887_v14  ;;  %4077 = vmatmul.msk.f32.gmra.mxu2 %vm771_vm1, %v3149_v50 }
 0x403   : > { %v3082_v36 = vmul.f32 %v6193_v42, %v3046_v41 }
 0x404   : > { %v3417_v13 = vpop.f32.mrf.mxu2 }
 0x405   : > { %v3118_v29 = vadd.f32 %v6198_v57, %v3082_v36  ;;  %v3418_v56 = vadd.f32 %v3417_v13, %v3205_v27  ;;  %v3220_v27 = vpop.f32.mrf.mxu1  ;;  %v2858_v49 = vpop.f32.mrf.mxu0 }
 0x407   : > { %v3150_v34 = vmax.f32 %v3118_v29, 0.0  ;;  %3496 = vst.msk [vmem:[%s6395_s17 + $0x48] sm:$0xff] %vm3486_vm5, %v3418_v56 }
 0x408   : > { %v3005_v55 = vpop.f32.mrf.mxu3 }
 0x409   : > { %v3047_v19 = vadd.f32 %v3005_v55, %v2888_v7  ;;  %4078 = vmatmul.msk.f32.gmra.mxu2 %vm771_vm1, %v3150_v34 }
 0x40b   : > { %v3083_v63 = vmul.f32 %v6193_v42, %v3047_v19 }
 0x40c   : > { %v3420_v17 = vpop.f32.mrf.mxu2 }
 0x40d   : > { %v3119_v0 = vadd.f32 %v6198_v57, %v3083_v63  ;;  %v3421_v32 = vadd.f32 %v3420_v17, %v3208_v11  ;;  %v3223_v11 = vpop.f32.mrf.mxu1 }
 0x40f   : > { %v3151_v61 = vmax.f32 %v3119_v0, 0.0  ;;  %3497 = vst.msk [vmem:[%s6395_s17 + $0x50] sm:$0xff] %vm3486_vm5, %v3421_v32 }
 0x410   : > { %v3008_v1 = vpop.f32.mrf.mxu3 }
 0x411   : > { %v3048_v46 = vadd.f32 %v3008_v1, %v2889_v6  ;;  %4079 = vmatmul.msk.f32.gmra.mxu2 %vm771_vm1, %v3151_v61 }
 0x413   : > { %v3084_v39 = vmul.f32 %v6193_v42, %v3048_v46 }
 0x414   : > { %v3423_v18 = vpop.f32.mrf.mxu2 }
 0x415   : > { %v3120_v54 = vadd.f32 %v6198_v57, %v3084_v39  ;;  %v3424_v47 = vadd.f32 %v3423_v18, %v3211_v33  ;;  %v3226_v40 = vpop.f32.mrf.mxu1  ;;  %v2891_v33 = vadd.f32 %v2855_v44, %v2731_v15 }
 0x417   : > { %v3152_v2 = vmax.f32 %v3120_v54, 0.0  ;;  %3498 = vst.msk [vmem:[%s6395_s17 + $0x58] sm:$0xff] %vm3486_vm5, %v3424_v47 }
 0x418   : > { %v3011_v45 = vpop.f32.mrf.mxu3 }
 0x419   : > { %v3049_v10 = vadd.f32 %v3011_v45, %v2890_v3  ;;  %4080 = vmatmul.msk.f32.gmra.mxu2 %vm771_vm1, %v3152_v2 }
 0x41b   : > { %v3085_v51 = vmul.f32 %v6193_v42, %v3049_v10 }
 0x41c   : > { %v3426_v23 = vpop.f32.mrf.mxu2 }
 0x41d   : > { %v3121_v48 = vadd.f32 %v6198_v57, %v3085_v51  ;;  %v3427_v25 = vadd.f32 %v3426_v23, %v3214_v20  ;;  %v3229_v38 = vpop.f32.mrf.mxu1  ;;  %v2892_v20 = vadd.f32 %v2858_v49, %v2732_v21 }
 0x41f   : > { %v3153_v30 = vmax.f32 %v3121_v48, 0.0  ;;  %3499 = vst.msk [vmem:[%s6395_s17 + $0x60] sm:$0xff] %vm3486_vm5, %v3427_v25 }
 0x420   : > { %v3014_v35 = vpop.f32.mrf.mxu3 }
 0x421   : > { %v3050_v5 = vadd.f32 %v3014_v35, %v2891_v33  ;;  %4081 = vmatmul.msk.f32.gmra.mxu2 %vm771_vm1, %v3153_v30 }
 0x423   : > { %v3086_v28 = vmul.f32 %v6193_v42, %v3050_v5 }
 0x424   : > { %v3429_v22 = vpop.f32.mrf.mxu2 }
 0x425   : > { %v3122_v53 = vadd.f32 %v6198_v57, %v3086_v28  ;;  %v3430_v24 = vadd.f32 %v3429_v22, %v3217_v60  ;;  %v3232_v59 = vpop.f32.mrf.mxu1 }
 0x427   : > { %v3154_v14 = vmax.f32 %v3122_v53, 0.0  ;;  %3500 = vst.msk [vmem:[%s6395_s17 + $0x68] sm:$0xff] %vm3486_vm5, %v3430_v24 }
 0x428   : > { %v3017_v8 = vpop.f32.mrf.mxu3 }
 0x429   : > { %v3051_v50 = vadd.f32 %v3017_v8, %v2892_v20  ;;  %4082 = vmatmul.msk.f32.gmra.mxu2 %vm771_vm1, %v3154_v14 }
 0x42b   : > { %v3087_v43 = vmul.f32 %v6193_v42, %v3051_v50 }
 0x42c   : > { %v3432_v41 = vpop.f32.mrf.mxu2 }
 0x42d   : > { %v3123_v36 = vadd.f32 %v6198_v57, %v3087_v43  ;;  %v3433_v9 = vadd.f32 %v3432_v41, %v3220_v27  ;;  %v3235_v56 = vpop.f32.mrf.mxu1 }
 0x42f   : > { %v3155_v13 = vmax.f32 %v3123_v36, 0.0  ;;  %3501 = vst.msk [vmem:[%s6395_s17 + $0x70] sm:$0xff] %vm3486_vm5, %v3433_v9 }
 0x431   : > { %4083 = vmatmul.msk.f32.gmra.mxu2 %vm771_vm1, %v3155_v13 }
 0x434   : > { %v3435_v37 = vpop.f32.mrf.mxu2 }
 0x435   : > { %v3436_v29 = vadd.f32 %v3435_v37, %v3223_v11  ;;  %v3238_v26 = vpop.f32.mrf.mxu1 }
 0x437   : > { %3502 = vst.msk [vmem:[%s6395_s17 + $0x78] sm:$0xff] %vm3486_vm5, %v3436_v29 }
 0x43c   : > { %v3438_v60 = vpop.f32.mrf.mxu2 }
 0x43d   : > { %v3439_v42 = vadd.f32 %v3438_v60, %v3226_v40  ;;  %v3241_v19 = vpop.f32.mrf.mxu1 }
 0x43f   : > { %3503 = vst.msk [vmem:[%s6395_s17 + $0x80] sm:$0xff] %vm3486_vm5, %v3439_v42 }
 0x444   : > { %v3441_v57 = vpop.f32.mrf.mxu2 }
 0x445   : > { %v3442_v7 = vadd.f32 %v3441_v57, %v3229_v38  ;;  %v3244_v52 = vpop.f32.mrf.mxu1 }
 0x447   : > { %3504 = vst.msk [vmem:[%s6395_s17 + $0x88] sm:$0xff] %vm3486_vm5, %v3442_v7 }
 0x44c   : > { %v3444_v34 = vpop.f32.mrf.mxu2 }
 0x44d   : > { %v3445_v55 = vadd.f32 %v3444_v34, %v3232_v59  ;;  %v3247_v32 = vpop.f32.mrf.mxu1 }
 0x44f   : > { %3505 = vst.msk [vmem:[%s6395_s17 + $0x90] sm:$0xff] %vm3486_vm5, %v3445_v55 }
 0x454   : > { %v3447_v63 = vpop.f32.mrf.mxu2 }
 0x455   : > { %v3448_v17 = vadd.f32 %v3447_v63, %v3235_v56  ;;  %v3250_v58 = vpop.f32.mrf.mxu1 }
 0x457   : > { %3506 = vst.msk [vmem:[%s6395_s17 + $0x98] sm:$0xff] %vm3486_vm5, %v3448_v17 }
 0x45c   : > { %v3450_v62 = vpop.f32.mrf.mxu2 }
 0x45d   : > { %v3451_v0 = vadd.f32 %v3450_v62, %v3238_v26  ;;  %v3253_v18 = vpop.f32.mrf.mxu1 }
 0x45f   : > { %3507 = vst.msk [vmem:[%s6395_s17 + $0xa0] sm:$0xff] %vm3486_vm5, %v3451_v0 }
 0x464   : > { %v3453_v27 = vpop.f32.mrf.mxu2 }
 0x465   : > { %v3454_v6 = vadd.f32 %v3453_v27, %v3241_v19  ;;  %v3256_v54 = vpop.f32.mrf.mxu1 }
 0x467   : > { %3508 = vst.msk [vmem:[%s6395_s17 + $0xa8] sm:$0xff] %vm3486_vm5, %v3454_v6 }
 0x46c   : > { %v3456_v61 = vpop.f32.mrf.mxu2 }
 0x46d   : > { %v3457_v1 = vadd.f32 %v3456_v61, %v3244_v52  ;;  %v3259_v3 = vpop.f32.mrf.mxu1 }
 0x46f   : > { %3509 = vst.msk [vmem:[%s6395_s17 + $0xb0] sm:$0xff] %vm3486_vm5, %v3457_v1 }
 0x474   : > { %v3459_v46 = vpop.f32.mrf.mxu2 }
 0x475   : > { %v3460_v39 = vadd.f32 %v3459_v46, %v3247_v32  ;;  %v3262_v44 = vpop.f32.mrf.mxu1 }
 0x477   : > { %3510 = vst.msk [vmem:[%s6395_s17 + $0xb8] sm:$0xff] %vm3486_vm5, %v3460_v39 }
 0x47c   : > { %v3462_v31 = vpop.f32.mrf.mxu2 }
 0x47d   : > { %v3463_v12 = vadd.f32 %v3462_v31, %v3250_v58  ;;  %v3265_v48 = vpop.f32.mrf.mxu1 }
 0x47f   : > { %3511 = vst.msk [vmem:[%s6395_s17 + $0xc0] sm:$0xff] %vm3486_vm5, %v3463_v12 }
 0x484   : > { %v3465_v47 = vpop.f32.mrf.mxu2 }
 0x485   : > { %v3466_v11 = vadd.f32 %v3465_v47, %v3253_v18  ;;  %v3268_v33 = vpop.f32.mrf.mxu1 }
 0x487   : > { %3512 = vst.msk [vmem:[%s6395_s17 + $0xc8] sm:$0xff] %vm3486_vm5, %v3466_v11 }
 0x48c   : > { %v3468_v2 = vpop.f32.mrf.mxu2 }
 0x48d   : > { %v3469_v45 = vadd.f32 %v3468_v2, %v3256_v54  ;;  %v3271_v4 = vpop.f32.mrf.mxu1 }
 0x48f   : > { %3513 = vst.msk [vmem:[%s6395_s17 + $0xd0] sm:$0xff] %vm3486_vm5, %v3469_v45 }
 0x494   : > { %v3471_v10 = vpop.f32.mrf.mxu2 }
 0x495   : > { %v3472_v51 = vadd.f32 %v3471_v10, %v3259_v3 }
 0x497   : > { %3514 = vst.msk [vmem:[%s6395_s17 + $0xd8] sm:$0xff] %vm3486_vm5, %v3472_v51 }
 0x49c   : > { %v3474_v23 = vpop.f32.mrf.mxu2 }
 0x49d   : > { %v3475_v15 = vadd.f32 %v3474_v23, %v3262_v44 }
 0x49f   : > { %3515 = vst.msk [vmem:[%s6395_s17 + $0xe0] sm:$0xff] %vm3486_vm5, %v3475_v15 }
 0x4a4   : > { %v3477_v25 = vpop.f32.mrf.mxu2 }
 0x4a5   : > { %v3478_v40 = vadd.f32 %v3477_v25, %v3265_v48 }
 0x4a7   : > { %3516 = vst.msk [vmem:[%s6395_s17 + $0xe8] sm:$0xff] %vm3486_vm5, %v3478_v40 }
 0x4ac   : > { %v3480_v30 = vpop.f32.mrf.mxu2 }
 0x4ad   : > { %v3481_v35 = vadd.f32 %v3480_v30, %v3268_v33 }
 0x4af   : > { %3517 = vst.msk [vmem:[%s6395_s17 + $0xf0] sm:$0xff] %vm3486_vm5, %v3481_v35 }
 0x4b4   : > { %v3483_v16 = vpop.f32.mrf.mxu2 }
 0x4b5   : > { %v3484_v5 = vadd.f32 %v3483_v16, %v3271_v4 }
 0x4b7   : > { %3518 = vst.msk [vmem:[%s6395_s17 + $0xf8] sm:$0xff] %vm3486_vm5, %v3484_v5 }
 0x4b8   : > { %4202 = shalt.err (!%p4199_p5)
}
 0x4b9   : > { %s4256_s24 = smov 128   ;;  %s4257_s17 = smov 8  }
 0x4ba   : > { %4097 = dma.vmem_to_hbm [thread:$0]  (%p4368_p4), %s3536_s22, 4096, %s3538_s14, %s3520_s28, %s4256_s24, %s4256_s24, %s4257_s17  }
 0x4bb PF: > { %p4103_p6 = scmp.ge.s32.totalorder %s4253_s30, 2  ;;  %s3552_s19 = sand.u32 1, %s4233_s25  }
 0x4bc   : > { %s3553_s1 = scalar_lea.sflag [#allocation4], %s3552_s19 }
 0x4bd   : > { %p4100_p7 = pnand %p4103_p6, %p4375_p8 }
 0x4bf   : > { %p4101_p9 = pneg %p4100_p7 }
 0x4c1   : > { %4228 = dma.done.wait (%p4101_p9), %s3553_s1, 4096  }
 0x4c2   : > { %4230 = vsyncadd (%p4101_p9), %s3553_s1, 4294963200  ;;  %s26_s30 = sadd.s32 1, %s4253_s30   ;;  %s7012_s28 = sld [smem:[#allocation6_spill]] }
 0x4c3   : > { %p23_p10 = scmp.ge.s32.totalorder %s26_s30, 4   ;;  %s7013_s29 = sld [smem:[#allocation7_spill]] }
 0x4c4   : > { %s7014_s25 = smov %s4237_s26  ;;  %s7015_s26 = smov %s4241_s27 }
 0x4c5   : > { %s7016_s27 = smov %s4381_s21  ;;  %25 = sbr.rel (!%p23_p10) target bundleno = 7 (0x7), region = 123 }
 0x4ca   :  { %3559 = vsyncpa [#allocation4], 1 }
 0x4cb   :  { %3561 = vsyncpa [#allocation4 + $0x1], 1 }

</bundles_post_ra>
